<compile_context>
chip_gen: v7x
topology: tpu7x:2x2x1
jax: 0.10.0
libtpu: 0.0.40
codegen_flags: <defaults>
</compile_context>

<pallas_src>
import math
from functools import partial

import jax
import jax.numpy as jnp
from jax import lax
from jax.experimental import pallas as pl
from jax.experimental.pallas import tpu as pltpu

BN_EPS = 1e-4          # BatchNorm1d eps in full_block
AT = 0.5               # self.at
ALPHA = 1.0            # self.alpha
NEG_INF = -1e30
DENOM_GUARD = 1e-30
LANE = 128


def _rup(v, m=LANE):
    return ((v + m - 1) // m) * m


def _vmem():
    return pl.BlockSpec(memory_space=pltpu.MemorySpace.VMEM)


def _bf16(x):
    return x.astype(jnp.bfloat16)


def _elu(y):
    # ELU(alpha=1); Dropout identity in eval.  min() keeps the discarded exp branch finite.
    return jnp.where(y > 0.0, y, jnp.exp(jnp.minimum(y, 0.0)) - 1.0)


def _mm(a, b):
    return jnp.dot(a, b, preferred_element_type=jnp.float32)


def _mm_t(a, b):
    # (a^T) @ b without an explicit transpose: contract axis 0 of both operands.
    return lax.dot_general(a, b, (((0,), (0,)), ((), ())),
                           preferred_element_type=jnp.float32)


def _mm_nt(a, b):
    # a @ b^T without an explicit transpose: contract last axis of both operands.
    return lax.dot_general(a, b, (((1,), (1,)), ((), ())),
                           preferred_element_type=jnp.float32)


# ------------------------------------------------------------------
# The single fused forward kernel
# ------------------------------------------------------------------
def _fused_forward_kernel(
        # inputs
        x_ref, adjt_ref, adjpt_ref, adjd_ref, adjpd_ref,
        w1_ref, b1_ref, w2_ref, b2_ref,
        wg1_ref, bg1_ref, wh_ref, bh_ref, wg2_ref, bg2_ref,
        wdf_ref, wdm_ref, bd_ref,
        cf_ref, cm_ref, csq_ref, kmask_ref, mmu_ref, mdec_ref,
        # outputs (all 128-lane-dense padded slabs)
        o_featx_ref, o_mu_ref, o_mu1_ref, o_defeat_ref, o_q_ref, o_dehr_ref,
        *, scale_g1, scale_h, scale_g2):

    adjt = adjt_ref[...]       # [tgt, src] mask for adj
    adjpt = adjpt_ref[...]     # [tgt, src] mask for adj_prue
    adjd = adjd_ref[...]       # (N,1) diag of adj      (self-loop indicator)
    adjpd = adjpd_ref[...]     # (N,1) diag of adj_prue

    # ---------------- encoder: 2 x (Linear + folded BN + ELU) ----------------
    h1 = _elu(_mm(_bf16(x_ref[...]), w1_ref[...]) + b1_ref[...])
    featx = _elu(_mm(_bf16(h1), w2_ref[...]) + b2_ref[...])
    o_featx_ref[...] = featx
    featx_bf = _bf16(featx)

    # ---------------- TransformerConv helpers (heads=1) ----------------
    def project(x_bf, w4_ref, b4_ref):
        w4 = w4_ref[...]
        cp = w4.shape[1] // 4          # lane-padded per-head width (multiple of 128)
        proj = _mm(x_bf, w4) + b4_ref[...]
        return (proj[:, 0:cp], proj[:, cp:2 * cp],
                proj[:, 2 * cp:3 * cp], proj[:, 3 * cp:4 * cp])

    def attn(logits, dlog, mask_t, mask_d, v_bf, skip):
        # masked softmax over incoming edges (f32 math), conv output, and the
        # diagonal attention weight (used for post-matmul self-loop removal).
        msk = mask_t > 0.0
        neg = jnp.where(msk, logits, NEG_INF)
        m = jnp.max(neg, axis=-1, keepdims=True)
        e = jnp.where(msk, jnp.exp(neg - m), 0.0)
        s = jnp.sum(e, axis=-1, keepdims=True)
        r = pl.reciprocal(jnp.maximum(s, DENOM_GUARD), approx=True)   # EUP slot
        p_bf = _bf16(e * r)                                           # cast once, used twice
        h = _mm(p_bf, v_bf) + skip                                    # conv output (f32)
        pdiag = jnp.where(mask_d > 0.0, jnp.exp(dlog - m) * r, 0.0)   # (N,1) == P[i,i]
        return h, _bf16(h), p_bf, pdiag

    def mix(branch_a, branch_p, relu):
        (ha, hab, pab, pda) = branch_a
        (hp, hpb, ppb, pdp) = branch_p
        # A @ h == (P with zero diag)^T @ h == P^T @ h - P[i,i] * h_i   (no diag mask)
        ya = _mm_t(pab, hab) - pda * ha
        yp = _mm_t(ppb, hpb) - pdp * hp
        y = (1.0 - AT) * ya + AT * yp
        return jnp.maximum(y, 0.0) if relu else y

    def dual_shared(x_bf, w4_ref, b4_ref, scale, relu):
        # gc1 / gc2: both graph branches share x and weights -> ONE projection,
        # ONE [N,N] logits matrix, two masked softmaxes.
        q, k, v, skip = project(x_bf, w4_ref, b4_ref)
        vb = _bf16(v)
        logits = _mm_nt(_bf16(q), _bf16(k)) * scale
        dlog = jnp.sum(q * k, axis=-1, keepdims=True) * scale
        ba = attn(logits, dlog, adjt, adjd, vb, skip)
        bp = attn(logits, dlog, adjpt, adjpd, vb, skip)
        return mix(ba, bp, relu)

    def dual_seq(x_bf, w4_ref, b4_ref, scale):
        # hidden layer: the adj_prue branch consumes the UPDATED x (branch-1 output),
        # exactly as in the reference source.
        q, k, v, skip = project(x_bf, w4_ref, b4_ref)
        logits = _mm_nt(_bf16(q), _bf16(k)) * scale
        dlog = jnp.sum(q * k, axis=-1, keepdims=True) * scale
        ba = attn(logits, dlog, adjt, adjd, _bf16(v), skip)
        ha_bf = ba[1]
        q2, k2, v2, skip2 = project(ha_bf, w4_ref, b4_ref)
        logits2 = _mm_nt(_bf16(q2), _bf16(k2)) * scale
        dlog2 = jnp.sum(q2 * k2, axis=-1, keepdims=True) * scale
        bp = attn(logits2, dlog2, adjpt, adjpd, _bf16(v2), skip2)
        return mix(ba, bp, relu=True)

    # ---------------- graph tower ----------------
    x1 = dual_shared(featx_bf, wg1_ref, bg1_ref, scale_g1, relu=True)   # gc1 + mix + relu
    x2 = dual_seq(_bf16(x1), wh_ref, bh_ref, scale_h)                   # hidden conv pair
    mu = dual_shared(_bf16(x2), wg2_ref, bg2_ref, scale_g2, relu=False) # gc2 + mix
    mu_bf = _bf16(mu)
    o_mu_ref[...] = mu
    # mu1 = mean over the 6 chunks of mu   (f32 averaging matmul, lane-dense output)
    o_mu1_ref[...] = _mm(mu, mmu_ref[...])

    # ---------------- decoder full_block + mean over the 6 super-res chunks -------------
    # z = concat(feat_x, mu) is never materialized: decoder weights are split host-side.
    dehr = _elu(_mm(featx_bf, wdf_ref[...]) + _mm(mu_bf, wdm_ref[...]) + bd_ref[...])
    o_dehr_ref[...] = dehr
    o_defeat_ref[...] = _mm(dehr, mdec_ref[...])

    # ---------------- DEC soft assignment q (f32 throughout, K padded to 128 lanes) -----
    cross = _mm_nt(featx, cf_ref[...]) + _mm_nt(mu, cm_ref[...])        # z . c_k
    z2 = (jnp.sum(featx * featx, axis=-1, keepdims=True)
          + jnp.sum(mu * mu, axis=-1, keepdims=True))
    d2 = z2 + csq_ref[...] - 2.0 * cross                                # ||z_i - c_k||^2
    qv = kmask_ref[...] / (1.0 + d2 * (1.0 / ALPHA))                    # padded k -> 0
    expo = (ALPHA + 1.0) / 2.0
    if expo != 1.0:
        qv = qv ** expo
    o_q_ref[...] = qv / jnp.sum(qv, axis=-1, keepdims=True)             # exact divide


# ------------------------------------------------------------------
# Parameter init (logical shapes; BN folded into the Linear layers)
# ------------------------------------------------------------------
def init_params(key, input_dim, feat_h1, feat_h2, gcn_h1, gcn_h2, n_clusters):
    keys = iter(jax.random.split(key, 64))

    def lin(in_f, out_f):
        s = 1.0 / math.sqrt(in_f)
        w = jax.random.uniform(next(keys), (in_f, out_f), jnp.float32, -s, s)
        b = jax.random.uniform(next(keys), (1, out_f), jnp.float32, -s, s)
        return w, b

    def block(in_f, out_f):
        # Linear + BatchNorm1d(eval, eps=1e-4) folded into a single affine x@W'+b'
        w, b = lin(in_f, out_f)
        gamma = 1.0 + 0.1 * jax.random.normal(next(keys), (1, out_f), jnp.float32)
        beta = 0.1 * jax.random.normal(next(keys), (1, out_f), jnp.float32)
        mean = 0.1 * jax.random.normal(next(keys), (1, out_f), jnp.float32)
        var = 1.0 + 0.1 * jnp.abs(jax.random.normal(next(keys), (1, out_f), jnp.float32))
        scale = gamma * lax.rsqrt(var + BN_EPS)
        return dict(w=w * scale, b=(b - mean) * scale + beta)
        # TODO(synk): training-mode BatchNorm (batch stats) / dropout are not modeled (eval only).

    def tconv(in_f, out_f):
        wq, bq = lin(in_f, out_f)
        wk, bk = lin(in_f, out_f)
        wv, bv = lin(in_f, out_f)
        ws, bs = lin(in_f, out_f)
        return dict(wq=wq, bq=bq, wk=wk, bk=bk, wv=wv, bv=bv, ws=ws, bs=bs, out_f=out_f)

    latent = gcn_h2 + feat_h2
    xavier_std = math.sqrt(2.0 / (n_clusters + latent))
    return dict(
        enc1=block(input_dim, feat_h1),
        enc2=block(feat_h1, feat_h2),
        dec=block(latent, input_dim * 6),
        gc1=tconv(feat_h2, gcn_h1),
        hid0=tconv(gcn_h1, gcn_h1),          # layer_num - 2 == 1 hidden conv
        gc2=tconv(gcn_h1, gcn_h2),
        cluster=xavier_std * jax.random.normal(next(keys), (n_clusters, latent), jnp.float32),
    )


# ------------------------------------------------------------------
# Host-side packing: lane-align everything once, pre-cast MXU operands to bf16
# ------------------------------------------------------------------
def pack_params(p, input_dim, feat_h1, feat_h2, gcn_h1, gcn_h2, n_clusters):
    f32, bf = jnp.float32, jnp.bfloat16
    F1P, F2P = _rup(feat_h1), _rup(feat_h2)
    C1P, C2P = _rup(gcn_h1), _rup(gcn_h2)
    IP, DOP, KP = _rup(input_dim), _rup(6 * input_dim), _rup(n_clusters)

    def pad(a, shape):
        out = jnp.zeros(shape, a.dtype)
        return out.at[tuple(slice(0, s) for s in a.shape)].set(a)

    def pack_conv(t, in_pad, out_pad):
        # q|k|v|skip packed per head into 128-lane-aligned slots of one matmul;
        # zero rows / zero bias in the padded region keep padded activations at 0.
        of = t["out_f"]
        w4 = jnp.zeros((in_pad, 4 * out_pad), f32)
        b4 = jnp.zeros((1, 4 * out_pad), f32)
        for h, nm in enumerate("qkvs"):
            w4 = w4.at[: t["w" + nm].shape[0], h * out_pad: h * out_pad + of].set(t["w" + nm])
            b4 = b4.at[:, h * out_pad: h * out_pad + of].set(t["b" + nm])
        return w4.astype(bf), b4

    wg1, bg1 = pack_conv(p["gc1"], F2P, C1P)
    wh, bh = pack_conv(p["hid0"], C1P, C1P)
    wg2, bg2 = pack_conv(p["gc2"], C1P, C2P)

    wd, bd = p["dec"]["w"], p["dec"]["b"]       # (latent, 6*input_dim)
    cl = p["cluster"]                           # (K, latent), latent = feat_h2 + gcn_h2

    # averaging matrices for the .view(N,6,-1).mean(1) reductions
    sub = gcn_h2 // 6
    mmu = jnp.zeros((C2P, C2P), f32)
    mdec = jnp.zeros((DOP, IP), f32)
    for k in range(6):
        mmu = mmu.at[k * sub:(k + 1) * sub, 0:sub].add(jnp.eye(sub, dtype=f32) / 6.0)
        mdec = mdec.at[k * input_dim:(k + 1) * input_dim, 0:input_dim].add(
            jnp.eye(input_dim, dtype=f32) / 6.0)

    return dict(
        meta=dict(input_dim=input_dim, feat_h2=feat_h2, gcn_h1=gcn_h1, gcn_h2=gcn_h2,
                  n_clusters=n_clusters, F2P=F2P, C1P=C1P, C2P=C2P, IP=IP, DOP=DOP, KP=KP),
        w1=pad(p["enc1"]["w"], (input_dim, F1P)).astype(bf), b1=pad(p["enc1"]["b"], (1, F1P)),
        w2=pad(p["enc2"]["w"], (F1P, F2P)).astype(bf), b2=pad(p["enc2"]["b"], (1, F2P)),
        wg1=wg1, bg1=bg1, wh=wh, bh=bh, wg2=wg2, bg2=bg2,
        # decoder / cluster weights split along the z = concat(feat_x, mu) boundary
        wdf=pad(wd[:feat_h2], (F2P, DOP)).astype(bf),
        wdm=pad(wd[feat_h2:], (C2P, DOP)).astype(bf),
        bd=pad(bd, (1, DOP)),
        cf=pad(cl[:, :feat_h2], (KP, F2P)),
        cm=pad(cl[:, feat_h2:], (KP, C2P)),
        csq=pad(jnp.sum(cl * cl, axis=1)[None, :], (1, KP)),
        kmask=pad(jnp.ones((1, n_clusters), f32), (1, KP)),
        mmu=mmu, mdec=mdec,
    )


# ------------------------------------------------------------------
# Full forward (eval mode). x_neighbor / spatial / training are unused by the
# reference forward and accepted only for signature fidelity.
# ------------------------------------------------------------------
def st_transformer_forward(kp, x, x_neighbor, adj, adj_prue, spatial, training=False):
    del x_neighbor, spatial, training
    meta = kp["meta"]
    n = x.shape[0]

    # adjacency in [tgt, src] layout + its diagonal (self-loop weights), built ONCE.
    # TODO(synk): at production N store these as int8 (4x less HBM/VMEM) and row-tile.
    adjt = jnp.transpose(adj).astype(jnp.float32)
    adjpt = jnp.transpose(adj_prue).astype(jnp.float32)
    adjd = jnp.diagonal(adj).astype(jnp.float32).reshape(n, 1)
    adjpd = jnp.diagonal(adj_prue).astype(jnp.float32).reshape(n, 1)

    kern = partial(_fused_forward_kernel,
                   scale_g1=1.0 / math.sqrt(meta["gcn_h1"]),
                   scale_h=1.0 / math.sqrt(meta["gcn_h1"]),
                   scale_g2=1.0 / math.sqrt(meta["gcn_h2"]))

    out_shape = (
        jax.ShapeDtypeStruct((n, meta["F2P"]), jnp.float32),   # feat_x (lane-padded)
        jax.ShapeDtypeStruct((n, meta["C2P"]), jnp.float32),   # mu
        jax.ShapeDtypeStruct((n, meta["C2P"]), jnp.float32),   # mu1
        jax.ShapeDtypeStruct((n, meta["IP"]), jnp.float32),    # de_feat
        jax.ShapeDtypeStruct((n, meta["KP"]), jnp.float32),    # q
        jax.ShapeDtypeStruct((n, meta["DOP"]), jnp.float32),   # de_feat_hr (flat)
    )

    featx_p, mu_p, mu1_p, defeat_p, q_p, dehr_p = pl.pallas_call(
        kern,
        out_shape=out_shape,
        in_specs=[_vmem()] * 24,
        out_specs=tuple(_vmem() for _ in range(6)),
    )(x, adjt, adjpt, adjd, adjpd,
      kp["w1"], kp["b1"], kp["w2"], kp["b2"],
      kp["wg1"], kp["bg1"], kp["wh"], kp["bh"], kp["wg2"], kp["bg2"],
      kp["wdf"], kp["wdm"], kp["bd"],
      kp["cf"], kp["cm"], kp["csq"], kp["kmask"], kp["mmu"], kp["mdec"])

    # trivial wrapper-side slices of the lane-dense slabs
    feat_x = featx_p[:, :meta["feat_h2"]]
    mu = mu_p[:, :meta["gcn_h2"]]
    mu1 = mu1_p[:, :meta["gcn_h2"] // 6]
    de_feat = defeat_p[:, :meta["input_dim"]]
    q = q_p[:, :meta["n_clusters"]]
    de_feat_hr = dehr_p[:, :6 * meta["input_dim"]].reshape(n * 6, meta["input_dim"])

    z = jnp.concatenate([feat_x, mu], axis=1)
    z1 = jnp.concatenate([feat_x, mu1], axis=1)
    return z1, de_feat, q, feat_x, de_feat_hr, z


# ------------------------------------------------------------------
if __name__ == "__main__":
    # small synthetic problem
    N = 16              # number of spots / nodes
    INPUT_DIM = 32
    FEAT_H1, FEAT_H2 = 64, 32
    GCN_H1, GCN_H2 = 32, 24     # gcn_hidden2 must be divisible by 6
    N_CLUSTERS = 8

    root = jax.random.PRNGKey(0)
    k_par, k_x = jax.random.split(root)

    params = init_params(k_par, INPUT_DIM, FEAT_H1, FEAT_H2, GCN_H1, GCN_H2, N_CLUSTERS)
    kp = pack_params(params, INPUT_DIM, FEAT_H1, FEAT_H2, GCN_H1, GCN_H2, N_CLUSTERS)

    x = jax.random.normal(k_x, (N, INPUT_DIM), jnp.float32)

    # dense adjacency masks adj[src, tgt] (symmetric rings, no self-loops)
    idx = jnp.arange(N)
    adj = (jnp.zeros((N, N), jnp.float32)
           .at[idx, (idx + 1) % N].set(1.0)
           .at[idx, (idx - 1) % N].set(1.0))
    adj_prue = (jnp.zeros((N, N), jnp.float32)
                .at[idx, (idx + 2) % N].set(1.0)
                .at[idx, (idx - 2) % N].set(1.0))

    fwd = jax.jit(partial(st_transformer_forward, kp))
    outs = fwd(x, None, adj, adj_prue, None, False)
    outs = jax.block_until_ready(outs)
    z1, de_feat, q, feat_x, de_feat_hr, z = outs

    assert z1.shape == (N, FEAT_H2 + GCN_H2 // 6)
    assert de_feat.shape == (N, INPUT_DIM)
    assert q.shape == (N, N_CLUSTERS)
    assert feat_x.shape == (N, FEAT_H2)
    assert de_feat_hr.shape == (N * 6, INPUT_DIM)
    assert z.shape == (N, FEAT_H2 + GCN_H2)
    for o in outs:
        assert bool(jnp.all(jnp.isfinite(o)))
    # q rows sum to 1
    assert bool(jnp.allclose(jnp.sum(q, axis=1), 1.0, atol=1e-5))

    print("KERNEL_OK")
</pallas_src>

<mosaic_0001>
module attributes {stable_mosaic.version = 11 : i64} {
  func.func @_fused_forward_kernel(%arg0: memref<16x32xf32, #tpu.memory_space<vmem>>, %arg1: memref<16x16xf32, #tpu.memory_space<vmem>>, %arg2: memref<16x16xf32, #tpu.memory_space<vmem>>, %arg3: memref<16x1xf32, #tpu.memory_space<vmem>>, %arg4: memref<16x1xf32, #tpu.memory_space<vmem>>, %arg5: memref<32x128xbf16, #tpu.memory_space<vmem>>, %arg6: memref<1x128xf32, #tpu.memory_space<vmem>>, %arg7: memref<128x128xbf16, #tpu.memory_space<vmem>>, %arg8: memref<1x128xf32, #tpu.memory_space<vmem>>, %arg9: memref<128x512xbf16, #tpu.memory_space<vmem>>, %arg10: memref<1x512xf32, #tpu.memory_space<vmem>>, %arg11: memref<128x512xbf16, #tpu.memory_space<vmem>>, %arg12: memref<1x512xf32, #tpu.memory_space<vmem>>, %arg13: memref<128x512xbf16, #tpu.memory_space<vmem>>, %arg14: memref<1x512xf32, #tpu.memory_space<vmem>>, %arg15: memref<128x256xbf16, #tpu.memory_space<vmem>>, %arg16: memref<128x256xbf16, #tpu.memory_space<vmem>>, %arg17: memref<1x256xf32, #tpu.memory_space<vmem>>, %arg18: memref<128x128xf32, #tpu.memory_space<vmem>>, %arg19: memref<128x128xf32, #tpu.memory_space<vmem>>, %arg20: memref<1x128xf32, #tpu.memory_space<vmem>>, %arg21: memref<1x128xf32, #tpu.memory_space<vmem>>, %arg22: memref<128x128xf32, #tpu.memory_space<vmem>>, %arg23: memref<256x128xf32, #tpu.memory_space<vmem>>, %arg24: memref<16x128xf32, #tpu.memory_space<vmem>>, %arg25: memref<16x128xf32, #tpu.memory_space<vmem>>, %arg26: memref<16x128xf32, #tpu.memory_space<vmem>>, %arg27: memref<16x128xf32, #tpu.memory_space<vmem>>, %arg28: memref<16x128xf32, #tpu.memory_space<vmem>>, %arg29: memref<16x256xf32, #tpu.memory_space<vmem>>) attributes {dimension_semantics = [], scalar_prefetch = 0 : i64, scratch_operands = 0 : i64, tpu.core_type = #tpu.core_type<tc>} {
    %c0 = arith.constant 0 : index
    %c0_0 = arith.constant 0 : index
    %0 = vector.load %arg1[%c0, %c0_0] : memref<16x16xf32, #tpu.memory_space<vmem>>, vector<16x16xf32>
    %c0_1 = arith.constant 0 : index
    %c0_2 = arith.constant 0 : index
    %1 = vector.load %arg2[%c0_1, %c0_2] : memref<16x16xf32, #tpu.memory_space<vmem>>, vector<16x16xf32>
    %c0_3 = arith.constant 0 : index
    %c0_4 = arith.constant 0 : index
    %2 = vector.load %arg3[%c0_3, %c0_4] : memref<16x1xf32, #tpu.memory_space<vmem>>, vector<16x1xf32>
    %c0_5 = arith.constant 0 : index
    %c0_6 = arith.constant 0 : index
    %3 = vector.load %arg4[%c0_5, %c0_6] : memref<16x1xf32, #tpu.memory_space<vmem>>, vector<16x1xf32>
    %c0_7 = arith.constant 0 : index
    %c0_8 = arith.constant 0 : index
    %4 = vector.load %arg0[%c0_7, %c0_8] : memref<16x32xf32, #tpu.memory_space<vmem>>, vector<16x32xf32>
    %5 = arith.truncf %4 : vector<16x32xf32> to vector<16x32xbf16>
    %c0_9 = arith.constant 0 : index
    %c0_10 = arith.constant 0 : index
    %6 = vector.load %arg5[%c0_9, %c0_10] : memref<32x128xbf16, #tpu.memory_space<vmem>>, vector<32x128xbf16>
    %cst = arith.constant dense<0.000000e+00> : vector<16x128xf32>
    %7 = tpu.matmul %5, %6, %cst {dimension_numbers = #tpu.dot_dimension_numbers<[1], [0], [0], [1], [0, 0, 1, 1], [], []>} : vector<16x32xbf16>, vector<32x128xbf16>, vector<16x128xf32> -> vector<16x128xf32>
    %c0_11 = arith.constant 0 : index
    %c0_12 = arith.constant 0 : index
    %8 = vector.load %arg6[%c0_11, %c0_12] : memref<1x128xf32, #tpu.memory_space<vmem>>, vector<1x128xf32>
    %9 = vector.broadcast %8 : vector<1x128xf32> to vector<16x128xf32>
    %10 = arith.addf %7, %9 : vector<16x128xf32>
    %cst_13 = arith.constant 0.000000e+00 : f32
    %11 = vector.broadcast %cst_13 : f32 to vector<16x128xf32>
    %12 = arith.cmpf ogt, %10, %11 : vector<16x128xf32>
    %cst_14 = arith.constant 0.000000e+00 : f32
    %13 = vector.broadcast %cst_14 : f32 to vector<16x128xf32>
    %14 = arith.minimumf %10, %13 : vector<16x128xf32>
    %15 = math.exp %14 : vector<16x128xf32>
    %cst_15 = arith.constant 1.000000e+00 : f32
    %16 = vector.broadcast %cst_15 : f32 to vector<16x128xf32>
    %17 = arith.subf %15, %16 : vector<16x128xf32>
    %18 = arith.select %12, %10, %17 : vector<16x128xi1>, vector<16x128xf32>
    %19 = arith.truncf %18 : vector<16x128xf32> to vector<16x128xbf16>
    %c0_16 = arith.constant 0 : index
    %c0_17 = arith.constant 0 : index
    %20 = vector.load %arg7[%c0_16, %c0_17] : memref<128x128xbf16, #tpu.memory_space<vmem>>, vector<128x128xbf16>
    %cst_18 = arith.constant dense<0.000000e+00> : vector<16x128xf32>
    %21 = tpu.matmul %19, %20, %cst_18 {dimension_numbers = #tpu.dot_dimension_numbers<[1], [0], [0], [1], [0, 0, 1, 1], [], []>} : vector<16x128xbf16>, vector<128x128xbf16>, vector<16x128xf32> -> vector<16x128xf32>
    %c0_19 = arith.constant 0 : index
    %c0_20 = arith.constant 0 : index
    %22 = vector.load %arg8[%c0_19, %c0_20] : memref<1x128xf32, #tpu.memory_space<vmem>>, vector<1x128xf32>
    %23 = vector.broadcast %22 : vector<1x128xf32> to vector<16x128xf32>
    %24 = arith.addf %21, %23 : vector<16x128xf32>
    %cst_21 = arith.constant 0.000000e+00 : f32
    %25 = vector.broadcast %cst_21 : f32 to vector<16x128xf32>
    %26 = arith.cmpf ogt, %24, %25 : vector<16x128xf32>
    %cst_22 = arith.constant 0.000000e+00 : f32
    %27 = vector.broadcast %cst_22 : f32 to vector<16x128xf32>
    %28 = arith.minimumf %24, %27 : vector<16x128xf32>
    %29 = math.exp %28 : vector<16x128xf32>
    %cst_23 = arith.constant 1.000000e+00 : f32
    %30 = vector.broadcast %cst_23 : f32 to vector<16x128xf32>
    %31 = arith.subf %29, %30 : vector<16x128xf32>
    %32 = arith.select %26, %24, %31 : vector<16x128xi1>, vector<16x128xf32>
    %c0_24 = arith.constant 0 : index
    %c0_25 = arith.constant 0 : index
    %33 = vector.load %arg24[%c0_24, %c0_25] : memref<16x128xf32, #tpu.memory_space<vmem>>, vector<16x128xf32>
    tpu.vector_store %arg24[%c0_24, %c0_25], %32 {strides = array<i32>} : memref<16x128xf32, #tpu.memory_space<vmem>>, vector<16x128xf32>,
    %34 = arith.truncf %32 : vector<16x128xf32> to vector<16x128xbf16>
    %c0_26 = arith.constant 0 : index
    %c0_27 = arith.constant 0 : index
    %35 = vector.load %arg9[%c0_26, %c0_27] : memref<128x512xbf16, #tpu.memory_space<vmem>>, vector<128x512xbf16>
    %cst_28 = arith.constant dense<0.000000e+00> : vector<16x512xf32>
    %36 = tpu.matmul %34, %35, %cst_28 {dimension_numbers = #tpu.dot_dimension_numbers<[1], [0], [0], [1], [0, 0, 1, 1], [], []>} : vector<16x128xbf16>, vector<128x512xbf16>, vector<16x512xf32> -> vector<16x512xf32>
    %c0_29 = arith.constant 0 : index
    %c0_30 = arith.constant 0 : index
    %37 = vector.load %arg10[%c0_29, %c0_30] : memref<1x512xf32, #tpu.memory_space<vmem>>, vector<1x512xf32>
    %38 = vector.broadcast %37 : vector<1x512xf32> to vector<16x512xf32>
    %39 = arith.addf %36, %38 : vector<16x512xf32>
    %40 = vector.extract_strided_slice %39 {offsets = [0, 0], sizes = [16, 128], strides = [1, 1]} : vector<16x512xf32> to vector<16x128xf32>
    %41 = vector.extract_strided_slice %39 {offsets = [0, 128], sizes = [16, 128], strides = [1, 1]} : vector<16x512xf32> to vector<16x128xf32>
    %42 = vector.extract_strided_slice %39 {offsets = [0, 256], sizes = [16, 128], strides = [1, 1]} : vector<16x512xf32> to vector<16x128xf32>
    %43 = vector.extract_strided_slice %39 {offsets = [0, 384], sizes = [16, 128], strides = [1, 1]} : vector<16x512xf32> to vector<16x128xf32>
    %44 = arith.truncf %42 : vector<16x128xf32> to vector<16x128xbf16>
    %45 = arith.truncf %40 : vector<16x128xf32> to vector<16x128xbf16>
    %46 = arith.truncf %41 : vector<16x128xf32> to vector<16x128xbf16>
    %cst_31 = arith.constant dense<0.000000e+00> : vector<16x16xf32>
    %47 = tpu.matmul %45, %46, %cst_31 {dimension_numbers = #tpu.dot_dimension_numbers<[1], [1], [0], [0], [0, 0, 1, 0], [], []>} : vector<16x128xbf16>, vector<16x128xbf16>, vector<16x16xf32> -> vector<16x16xf32>
    %cst_32 = arith.constant 0.176776692 : f32
    %48 = vector.broadcast %cst_32 : f32 to vector<16x16xf32>
    %49 = arith.mulf %47, %48 : vector<16x16xf32>
    %50 = arith.mulf %40, %41 : vector<16x128xf32>
    %cst_33 = arith.constant dense<0.000000e+00> : vector<16xf32>
    %51 = vector.multi_reduction <add>, %50, %cst_33 [1] : vector<16x128xf32> to vector<16xf32>
    %52 = vector.shape_cast %51 : vector<16xf32> to vector<16x1xf32>
    %cst_34 = arith.constant 0.176776692 : f32
    %53 = vector.broadcast %cst_34 : f32 to vector<16x1xf32>
    %54 = arith.mulf %52, %53 : vector<16x1xf32>
    %cst_35 = arith.constant 0.000000e+00 : f32
    %55 = vector.broadcast %cst_35 : f32 to vector<16x16xf32>
    %56 = arith.cmpf ogt, %0, %55 : vector<16x16xf32>
    %cst_36 = arith.constant -1.000000e+30 : f32
    %57 = vector.broadcast %cst_36 : f32 to vector<16x16xf32>
    %58 = arith.select %56, %49, %57 : vector<16x16xi1>, vector<16x16xf32>
    %cst_37 = arith.constant dense<0xFF800000> : vector<16xf32>
    %59 = vector.multi_reduction <maximumf>, %58, %cst_37 [1] : vector<16x16xf32> to vector<16xf32>
    %60 = vector.shape_cast %59 : vector<16xf32> to vector<16x1xf32>
    %61 = vector.broadcast %60 : vector<16x1xf32> to vector<16x16xf32>
    %62 = arith.subf %58, %61 : vector<16x16xf32>
    %63 = math.exp %62 : vector<16x16xf32>
    %cst_38 = arith.constant 0.000000e+00 : f32
    %64 = vector.broadcast %cst_38 : f32 to vector<16x16xf32>
    %65 = arith.select %56, %63, %64 : vector<16x16xi1>, vector<16x16xf32>
    %cst_39 = arith.constant dense<0.000000e+00> : vector<16xf32>
    %66 = vector.multi_reduction <add>, %65, %cst_39 [1] : vector<16x16xf32> to vector<16xf32>
    %67 = vector.shape_cast %66 : vector<16xf32> to vector<16x1xf32>
    %cst_40 = arith.constant 1.000000e-30 : f32
    %68 = vector.broadcast %cst_40 : f32 to vector<16x1xf32>
    %69 = arith.maximumf %67, %68 : vector<16x1xf32>
    %70 = tpu.reciprocal %69 {approx = true} : vector<16x1xf32> -> vector<16x1xf32>
    %71 = vector.broadcast %70 : vector<16x1xf32> to vector<16x16xf32>
    %72 = arith.mulf %65, %71 : vector<16x16xf32>
    %73 = arith.truncf %72 : vector<16x16xf32> to vector<16x16xbf16>
    %cst_41 = arith.constant dense<0.000000e+00> : vector<16x128xf32>
    %74 = tpu.matmul %73, %44, %cst_41 {dimension_numbers = #tpu.dot_dimension_numbers<[1], [0], [0], [1], [0, 0, 1, 1], [], []>} : vector<16x16xbf16>, vector<16x128xbf16>, vector<16x128xf32> -> vector<16x128xf32>
    %75 = arith.addf %74, %43 : vector<16x128xf32>
    %cst_42 = arith.constant 0.000000e+00 : f32
    %76 = vector.broadcast %cst_42 : f32 to vector<16x1xf32>
    %77 = arith.cmpf ogt, %2, %76 : vector<16x1xf32>
    %78 = arith.subf %54, %60 : vector<16x1xf32>
    %79 = math.exp %78 : vector<16x1xf32>
    %80 = arith.mulf %79, %70 : vector<16x1xf32>
    %cst_43 = arith.constant 0.000000e+00 : f32
    %81 = vector.broadcast %cst_43 : f32 to vector<16x1xf32>
    %82 = arith.select %77, %80, %81 : vector<16x1xi1>, vector<16x1xf32>
    %83 = arith.truncf %75 : vector<16x128xf32> to vector<16x128xbf16>
    %cst_44 = arith.constant 0.000000e+00 : f32
    %84 = vector.broadcast %cst_44 : f32 to vector<16x16xf32>
    %85 = arith.cmpf ogt, %1, %84 : vector<16x16xf32>
    %cst_45 = arith.constant -1.000000e+30 : f32
    %86 = vector.broadcast %cst_45 : f32 to vector<16x16xf32>
    %87 = arith.select %85, %49, %86 : vector<16x16xi1>, vector<16x16xf32>
    %cst_46 = arith.constant dense<0xFF800000> : vector<16xf32>
    %88 = vector.multi_reduction <maximumf>, %87, %cst_46 [1] : vector<16x16xf32> to vector<16xf32>
    %89 = vector.shape_cast %88 : vector<16xf32> to vector<16x1xf32>
    %90 = vector.broadcast %89 : vector<16x1xf32> to vector<16x16xf32>
    %91 = arith.subf %87, %90 : vector<16x16xf32>
    %92 = math.exp %91 : vector<16x16xf32>
    %cst_47 = arith.constant 0.000000e+00 : f32
    %93 = vector.broadcast %cst_47 : f32 to vector<16x16xf32>
    %94 = arith.select %85, %92, %93 : vector<16x16xi1>, vector<16x16xf32>
    %cst_48 = arith.constant dense<0.000000e+00> : vector<16xf32>
    %95 = vector.multi_reduction <add>, %94, %cst_48 [1] : vector<16x16xf32> to vector<16xf32>
    %96 = vector.shape_cast %95 : vector<16xf32> to vector<16x1xf32>
    %cst_49 = arith.constant 1.000000e-30 : f32
    %97 = vector.broadcast %cst_49 : f32 to vector<16x1xf32>
    %98 = arith.maximumf %96, %97 : vector<16x1xf32>
    %99 = tpu.reciprocal %98 {approx = true} : vector<16x1xf32> -> vector<16x1xf32>
    %100 = vector.broadcast %99 : vector<16x1xf32> to vector<16x16xf32>
    %101 = arith.mulf %94, %100 : vector<16x16xf32>
    %102 = arith.truncf %101 : vector<16x16xf32> to vector<16x16xbf16>
    %cst_50 = arith.constant dense<0.000000e+00> : vector<16x128xf32>
    %103 = tpu.matmul %102, %44, %cst_50 {dimension_numbers = #tpu.dot_dimension_numbers<[1], [0], [0], [1], [0, 0, 1, 1], [], []>} : vector<16x16xbf16>, vector<16x128xbf16>, vector<16x128xf32> -> vector<16x128xf32>
    %104 = arith.addf %103, %43 : vector<16x128xf32>
    %cst_51 = arith.constant 0.000000e+00 : f32
    %105 = vector.broadcast %cst_51 : f32 to vector<16x1xf32>
    %106 = arith.cmpf ogt, %3, %105 : vector<16x1xf32>
    %107 = arith.subf %54, %89 : vector<16x1xf32>
    %108 = math.exp %107 : vector<16x1xf32>
    %109 = arith.mulf %108, %99 : vector<16x1xf32>
    %cst_52 = arith.constant 0.000000e+00 : f32
    %110 = vector.broadcast %cst_52 : f32 to vector<16x1xf32>
    %111 = arith.select %106, %109, %110 : vector<16x1xi1>, vector<16x1xf32>
    %112 = arith.truncf %104 : vector<16x128xf32> to vector<16x128xbf16>
    %cst_53 = arith.constant dense<0.000000e+00> : vector<16x128xf32>
    %113 = tpu.matmul %73, %83, %cst_53 {dimension_numbers = #tpu.dot_dimension_numbers<[0], [0], [1], [1], [0, 1, 1, 1], [], []>} : vector<16x16xbf16>, vector<16x128xbf16>, vector<16x128xf32> -> vector<16x128xf32>
    %114 = vector.broadcast %82 : vector<16x1xf32> to vector<16x128xf32>
    %115 = arith.mulf %114, %75 : vector<16x128xf32>
    %116 = arith.subf %113, %115 : vector<16x128xf32>
    %cst_54 = arith.constant dense<0.000000e+00> : vector<16x128xf32>
    %117 = tpu.matmul %102, %112, %cst_54 {dimension_numbers = #tpu.dot_dimension_numbers<[0], [0], [1], [1], [0, 1, 1, 1], [], []>} : vector<16x16xbf16>, vector<16x128xbf16>, vector<16x128xf32> -> vector<16x128xf32>
    %118 = vector.broadcast %111 : vector<16x1xf32> to vector<16x128xf32>
    %119 = arith.mulf %118, %104 : vector<16x128xf32>
    %120 = arith.subf %117, %119 : vector<16x128xf32>
    %cst_55 = arith.constant 5.000000e-01 : f32
    %121 = vector.broadcast %cst_55 : f32 to vector<16x128xf32>
    %122 = arith.mulf %121, %116 : vector<16x128xf32>
    %cst_56 = arith.constant 5.000000e-01 : f32
    %123 = vector.broadcast %cst_56 : f32 to vector<16x128xf32>
    %124 = arith.mulf %123, %120 : vector<16x128xf32>
    %125 = arith.addf %122, %124 : vector<16x128xf32>
    %cst_57 = arith.constant 0.000000e+00 : f32
    %126 = vector.broadcast %cst_57 : f32 to vector<16x128xf32>
    %127 = arith.maximumf %125, %126 : vector<16x128xf32>
    %128 = arith.truncf %127 : vector<16x128xf32> to vector<16x128xbf16>
    %c0_58 = arith.constant 0 : index
    %c0_59 = arith.constant 0 : index
    %129 = vector.load %arg11[%c0_58, %c0_59] : memref<128x512xbf16, #tpu.memory_space<vmem>>, vector<128x512xbf16>
    %cst_60 = arith.constant dense<0.000000e+00> : vector<16x512xf32>
    %130 = tpu.matmul %128, %129, %cst_60 {dimension_numbers = #tpu.dot_dimension_numbers<[1], [0], [0], [1], [0, 0, 1, 1], [], []>} : vector<16x128xbf16>, vector<128x512xbf16>, vector<16x512xf32> -> vector<16x512xf32>
    %c0_61 = arith.constant 0 : index
    %c0_62 = arith.constant 0 : index
    %131 = vector.load %arg12[%c0_61, %c0_62] : memref<1x512xf32, #tpu.memory_space<vmem>>, vector<1x512xf32>
    %132 = vector.broadcast %131 : vector<1x512xf32> to vector<16x512xf32>
    %133 = arith.addf %130, %132 : vector<16x512xf32>
    %134 = vector.extract_strided_slice %133 {offsets = [0, 0], sizes = [16, 128], strides = [1, 1]} : vector<16x512xf32> to vector<16x128xf32>
    %135 = vector.extract_strided_slice %133 {offsets = [0, 128], sizes = [16, 128], strides = [1, 1]} : vector<16x512xf32> to vector<16x128xf32>
    %136 = vector.extract_strided_slice %133 {offsets = [0, 256], sizes = [16, 128], strides = [1, 1]} : vector<16x512xf32> to vector<16x128xf32>
    %137 = vector.extract_strided_slice %133 {offsets = [0, 384], sizes = [16, 128], strides = [1, 1]} : vector<16x512xf32> to vector<16x128xf32>
    %138 = arith.truncf %134 : vector<16x128xf32> to vector<16x128xbf16>
    %139 = arith.truncf %135 : vector<16x128xf32> to vector<16x128xbf16>
    %cst_63 = arith.constant dense<0.000000e+00> : vector<16x16xf32>
    %140 = tpu.matmul %138, %139, %cst_63 {dimension_numbers = #tpu.dot_dimension_numbers<[1], [1], [0], [0], [0, 0, 1, 0], [], []>} : vector<16x128xbf16>, vector<16x128xbf16>, vector<16x16xf32> -> vector<16x16xf32>
    %cst_64 = arith.constant 0.176776692 : f32
    %141 = vector.broadcast %cst_64 : f32 to vector<16x16xf32>
    %142 = arith.mulf %140, %141 : vector<16x16xf32>
    %143 = arith.mulf %134, %135 : vector<16x128xf32>
    %cst_65 = arith.constant dense<0.000000e+00> : vector<16xf32>
    %144 = vector.multi_reduction <add>, %143, %cst_65 [1] : vector<16x128xf32> to vector<16xf32>
    %145 = vector.shape_cast %144 : vector<16xf32> to vector<16x1xf32>
    %cst_66 = arith.constant 0.176776692 : f32
    %146 = vector.broadcast %cst_66 : f32 to vector<16x1xf32>
    %147 = arith.mulf %145, %146 : vector<16x1xf32>
    %148 = arith.truncf %136 : vector<16x128xf32> to vector<16x128xbf16>
    %cst_67 = arith.constant 0.000000e+00 : f32
    %149 = vector.broadcast %cst_67 : f32 to vector<16x16xf32>
    %150 = arith.cmpf ogt, %0, %149 : vector<16x16xf32>
    %cst_68 = arith.constant -1.000000e+30 : f32
    %151 = vector.broadcast %cst_68 : f32 to vector<16x16xf32>
    %152 = arith.select %150, %142, %151 : vector<16x16xi1>, vector<16x16xf32>
    %cst_69 = arith.constant dense<0xFF800000> : vector<16xf32>
    %153 = vector.multi_reduction <maximumf>, %152, %cst_69 [1] : vector<16x16xf32> to vector<16xf32>
    %154 = vector.shape_cast %153 : vector<16xf32> to vector<16x1xf32>
    %155 = vector.broadcast %154 : vector<16x1xf32> to vector<16x16xf32>
    %156 = arith.subf %152, %155 : vector<16x16xf32>
    %157 = math.exp %156 : vector<16x16xf32>
    %cst_70 = arith.constant 0.000000e+00 : f32
    %158 = vector.broadcast %cst_70 : f32 to vector<16x16xf32>
    %159 = arith.select %150, %157, %158 : vector<16x16xi1>, vector<16x16xf32>
    %cst_71 = arith.constant dense<0.000000e+00> : vector<16xf32>
    %160 = vector.multi_reduction <add>, %159, %cst_71 [1] : vector<16x16xf32> to vector<16xf32>
    %161 = vector.shape_cast %160 : vector<16xf32> to vector<16x1xf32>
    %cst_72 = arith.constant 1.000000e-30 : f32
    %162 = vector.broadcast %cst_72 : f32 to vector<16x1xf32>
    %163 = arith.maximumf %161, %162 : vector<16x1xf32>
    %164 = tpu.reciprocal %163 {approx = true} : vector<16x1xf32> -> vector<16x1xf32>
    %165 = vector.broadcast %164 : vector<16x1xf32> to vector<16x16xf32>
    %166 = arith.mulf %159, %165 : vector<16x16xf32>
    %167 = arith.truncf %166 : vector<16x16xf32> to vector<16x16xbf16>
    %cst_73 = arith.constant dense<0.000000e+00> : vector<16x128xf32>
    %168 = tpu.matmul %167, %148, %cst_73 {dimension_numbers = #tpu.dot_dimension_numbers<[1], [0], [0], [1], [0, 0, 1, 1], [], []>} : vector<16x16xbf16>, vector<16x128xbf16>, vector<16x128xf32> -> vector<16x128xf32>
    %169 = arith.addf %168, %137 : vector<16x128xf32>
    %cst_74 = arith.constant 0.000000e+00 : f32
    %170 = vector.broadcast %cst_74 : f32 to vector<16x1xf32>
    %171 = arith.cmpf ogt, %2, %170 : vector<16x1xf32>
    %172 = arith.subf %147, %154 : vector<16x1xf32>
    %173 = math.exp %172 : vector<16x1xf32>
    %174 = arith.mulf %173, %164 : vector<16x1xf32>
    %cst_75 = arith.constant 0.000000e+00 : f32
    %175 = vector.broadcast %cst_75 : f32 to vector<16x1xf32>
    %176 = arith.select %171, %174, %175 : vector<16x1xi1>, vector<16x1xf32>
    %177 = arith.truncf %169 : vector<16x128xf32> to vector<16x128xbf16>
    %c0_76 = arith.constant 0 : index
    %c0_77 = arith.constant 0 : index
    %178 = vector.load %arg11[%c0_76, %c0_77] : memref<128x512xbf16, #tpu.memory_space<vmem>>, vector<128x512xbf16>
    %cst_78 = arith.constant dense<0.000000e+00> : vector<16x512xf32>
    %179 = tpu.matmul %177, %178, %cst_78 {dimension_numbers = #tpu.dot_dimension_numbers<[1], [0], [0], [1], [0, 0, 1, 1], [], []>} : vector<16x128xbf16>, vector<128x512xbf16>, vector<16x512xf32> -> vector<16x512xf32>
    %c0_79 = arith.constant 0 : index
    %c0_80 = arith.constant 0 : index
    %180 = vector.load %arg12[%c0_79, %c0_80] : memref<1x512xf32, #tpu.memory_space<vmem>>, vector<1x512xf32>
    %181 = vector.broadcast %180 : vector<1x512xf32> to vector<16x512xf32>
    %182 = arith.addf %179, %181 : vector<16x512xf32>
    %183 = vector.extract_strided_slice %182 {offsets = [0, 0], sizes = [16, 128], strides = [1, 1]} : vector<16x512xf32> to vector<16x128xf32>
    %184 = vector.extract_strided_slice %182 {offsets = [0, 128], sizes = [16, 128], strides = [1, 1]} : vector<16x512xf32> to vector<16x128xf32>
    %185 = vector.extract_strided_slice %182 {offsets = [0, 256], sizes = [16, 128], strides = [1, 1]} : vector<16x512xf32> to vector<16x128xf32>
    %186 = vector.extract_strided_slice %182 {offsets = [0, 384], sizes = [16, 128], strides = [1, 1]} : vector<16x512xf32> to vector<16x128xf32>
    %187 = arith.truncf %183 : vector<16x128xf32> to vector<16x128xbf16>
    %188 = arith.truncf %184 : vector<16x128xf32> to vector<16x128xbf16>
    %cst_81 = arith.constant dense<0.000000e+00> : vector<16x16xf32>
    %189 = tpu.matmul %187, %188, %cst_81 {dimension_numbers = #tpu.dot_dimension_numbers<[1], [1], [0], [0], [0, 0, 1, 0], [], []>} : vector<16x128xbf16>, vector<16x128xbf16>, vector<16x16xf32> -> vector<16x16xf32>
    %cst_82 = arith.constant 0.176776692 : f32
    %190 = vector.broadcast %cst_82 : f32 to vector<16x16xf32>
    %191 = arith.mulf %189, %190 : vector<16x16xf32>
    %192 = arith.mulf %183, %184 : vector<16x128xf32>
    %cst_83 = arith.constant dense<0.000000e+00> : vector<16xf32>
    %193 = vector.multi_reduction <add>, %192, %cst_83 [1] : vector<16x128xf32> to vector<16xf32>
    %194 = vector.shape_cast %193 : vector<16xf32> to vector<16x1xf32>
    %cst_84 = arith.constant 0.176776692 : f32
    %195 = vector.broadcast %cst_84 : f32 to vector<16x1xf32>
    %196 = arith.mulf %194, %195 : vector<16x1xf32>
    %197 = arith.truncf %185 : vector<16x128xf32> to vector<16x128xbf16>
    %cst_85 = arith.constant 0.000000e+00 : f32
    %198 = vector.broadcast %cst_85 : f32 to vector<16x16xf32>
    %199 = arith.cmpf ogt, %1, %198 : vector<16x16xf32>
    %cst_86 = arith.constant -1.000000e+30 : f32
    %200 = vector.broadcast %cst_86 : f32 to vector<16x16xf32>
    %201 = arith.select %199, %191, %200 : vector<16x16xi1>, vector<16x16xf32>
    %cst_87 = arith.constant dense<0xFF800000> : vector<16xf32>
    %202 = vector.multi_reduction <maximumf>, %201, %cst_87 [1] : vector<16x16xf32> to vector<16xf32>
    %203 = vector.shape_cast %202 : vector<16xf32> to vector<16x1xf32>
    %204 = vector.broadcast %203 : vector<16x1xf32> to vector<16x16xf32>
    %205 = arith.subf %201, %204 : vector<16x16xf32>
    %206 = math.exp %205 : vector<16x16xf32>
    %cst_88 = arith.constant 0.000000e+00 : f32
    %207 = vector.broadcast %cst_88 : f32 to vector<16x16xf32>
    %208 = arith.select %199, %206, %207 : vector<16x16xi1>, vector<16x16xf32>
    %cst_89 = arith.constant dense<0.000000e+00> : vector<16xf32>
    %209 = vector.multi_reduction <add>, %208, %cst_89 [1] : vector<16x16xf32> to vector<16xf32>
    %210 = vector.shape_cast %209 : vector<16xf32> to vector<16x1xf32>
    %cst_90 = arith.constant 1.000000e-30 : f32
    %211 = vector.broadcast %cst_90 : f32 to vector<16x1xf32>
    %212 = arith.maximumf %210, %211 : vector<16x1xf32>
    %213 = tpu.reciprocal %212 {approx = true} : vector<16x1xf32> -> vector<16x1xf32>
    %214 = vector.broadcast %213 : vector<16x1xf32> to vector<16x16xf32>
    %215 = arith.mulf %208, %214 : vector<16x16xf32>
    %216 = arith.truncf %215 : vector<16x16xf32> to vector<16x16xbf16>
    %cst_91 = arith.constant dense<0.000000e+00> : vector<16x128xf32>
    %217 = tpu.matmul %216, %197, %cst_91 {dimension_numbers = #tpu.dot_dimension_numbers<[1], [0], [0], [1], [0, 0, 1, 1], [], []>} : vector<16x16xbf16>, vector<16x128xbf16>, vector<16x128xf32> -> vector<16x128xf32>
    %218 = arith.addf %217, %186 : vector<16x128xf32>
    %cst_92 = arith.constant 0.000000e+00 : f32
    %219 = vector.broadcast %cst_92 : f32 to vector<16x1xf32>
    %220 = arith.cmpf ogt, %3, %219 : vector<16x1xf32>
    %221 = arith.subf %196, %203 : vector<16x1xf32>
    %222 = math.exp %221 : vector<16x1xf32>
    %223 = arith.mulf %222, %213 : vector<16x1xf32>
    %cst_93 = arith.constant 0.000000e+00 : f32
    %224 = vector.broadcast %cst_93 : f32 to vector<16x1xf32>
    %225 = arith.select %220, %223, %224 : vector<16x1xi1>, vector<16x1xf32>
    %226 = arith.truncf %218 : vector<16x128xf32> to vector<16x128xbf16>
    %cst_94 = arith.constant dense<0.000000e+00> : vector<16x128xf32>
    %227 = tpu.matmul %167, %177, %cst_94 {dimension_numbers = #tpu.dot_dimension_numbers<[0], [0], [1], [1], [0, 1, 1, 1], [], []>} : vector<16x16xbf16>, vector<16x128xbf16>, vector<16x128xf32> -> vector<16x128xf32>
    %228 = vector.broadcast %176 : vector<16x1xf32> to vector<16x128xf32>
    %229 = arith.mulf %228, %169 : vector<16x128xf32>
    %230 = arith.subf %227, %229 : vector<16x128xf32>
    %cst_95 = arith.constant dense<0.000000e+00> : vector<16x128xf32>
    %231 = tpu.matmul %216, %226, %cst_95 {dimension_numbers = #tpu.dot_dimension_numbers<[0], [0], [1], [1], [0, 1, 1, 1], [], []>} : vector<16x16xbf16>, vector<16x128xbf16>, vector<16x128xf32> -> vector<16x128xf32>
    %232 = vector.broadcast %225 : vector<16x1xf32> to vector<16x128xf32>
    %233 = arith.mulf %232, %218 : vector<16x128xf32>
    %234 = arith.subf %231, %233 : vector<16x128xf32>
    %cst_96 = arith.constant 5.000000e-01 : f32
    %235 = vector.broadcast %cst_96 : f32 to vector<16x128xf32>
    %236 = arith.mulf %235, %230 : vector<16x128xf32>
    %cst_97 = arith.constant 5.000000e-01 : f32
    %237 = vector.broadcast %cst_97 : f32 to vector<16x128xf32>
    %238 = arith.mulf %237, %234 : vector<16x128xf32>
    %239 = arith.addf %236, %238 : vector<16x128xf32>
    %cst_98 = arith.constant 0.000000e+00 : f32
    %240 = vector.broadcast %cst_98 : f32 to vector<16x128xf32>
    %241 = arith.maximumf %239, %240 : vector<16x128xf32>
    %242 = arith.truncf %241 : vector<16x128xf32> to vector<16x128xbf16>
    %c0_99 = arith.constant 0 : index
    %c0_100 = arith.constant 0 : index
    %243 = vector.load %arg13[%c0_99, %c0_100] : memref<128x512xbf16, #tpu.memory_space<vmem>>, vector<128x512xbf16>
    %cst_101 = arith.constant dense<0.000000e+00> : vector<16x512xf32>
    %244 = tpu.matmul %242, %243, %cst_101 {dimension_numbers = #tpu.dot_dimension_numbers<[1], [0], [0], [1], [0, 0, 1, 1], [], []>} : vector<16x128xbf16>, vector<128x512xbf16>, vector<16x512xf32> -> vector<16x512xf32>
    %c0_102 = arith.constant 0 : index
    %c0_103 = arith.constant 0 : index
    %245 = vector.load %arg14[%c0_102, %c0_103] : memref<1x512xf32, #tpu.memory_space<vmem>>, vector<1x512xf32>
    %246 = vector.broadcast %245 : vector<1x512xf32> to vector<16x512xf32>
    %247 = arith.addf %244, %246 : vector<16x512xf32>
    %248 = vector.extract_strided_slice %247 {offsets = [0, 0], sizes = [16, 128], strides = [1, 1]} : vector<16x512xf32> to vector<16x128xf32>
    %249 = vector.extract_strided_slice %247 {offsets = [0, 128], sizes = [16, 128], strides = [1, 1]} : vector<16x512xf32> to vector<16x128xf32>
    %250 = vector.extract_strided_slice %247 {offsets = [0, 256], sizes = [16, 128], strides = [1, 1]} : vector<16x512xf32> to vector<16x128xf32>
    %251 = vector.extract_strided_slice %247 {offsets = [0, 384], sizes = [16, 128], strides = [1, 1]} : vector<16x512xf32> to vector<16x128xf32>
    %252 = arith.truncf %250 : vector<16x128xf32> to vector<16x128xbf16>
    %253 = arith.truncf %248 : vector<16x128xf32> to vector<16x128xbf16>
    %254 = arith.truncf %249 : vector<16x128xf32> to vector<16x128xbf16>
    %cst_104 = arith.constant dense<0.000000e+00> : vector<16x16xf32>
    %255 = tpu.matmul %253, %254, %cst_104 {dimension_numbers = #tpu.dot_dimension_numbers<[1], [1], [0], [0], [0, 0, 1, 0], [], []>} : vector<16x128xbf16>, vector<16x128xbf16>, vector<16x16xf32> -> vector<16x16xf32>
    %cst_105 = arith.constant 0.204124153 : f32
    %256 = vector.broadcast %cst_105 : f32 to vector<16x16xf32>
    %257 = arith.mulf %255, %256 : vector<16x16xf32>
    %258 = arith.mulf %248, %249 : vector<16x128xf32>
    %cst_106 = arith.constant dense<0.000000e+00> : vector<16xf32>
    %259 = vector.multi_reduction <add>, %258, %cst_106 [1] : vector<16x128xf32> to vector<16xf32>
    %260 = vector.shape_cast %259 : vector<16xf32> to vector<16x1xf32>
    %cst_107 = arith.constant 0.204124153 : f32
    %261 = vector.broadcast %cst_107 : f32 to vector<16x1xf32>
    %262 = arith.mulf %260, %261 : vector<16x1xf32>
    %cst_108 = arith.constant 0.000000e+00 : f32
    %263 = vector.broadcast %cst_108 : f32 to vector<16x16xf32>
    %264 = arith.cmpf ogt, %0, %263 : vector<16x16xf32>
    %cst_109 = arith.constant -1.000000e+30 : f32
    %265 = vector.broadcast %cst_109 : f32 to vector<16x16xf32>
    %266 = arith.select %264, %257, %265 : vector<16x16xi1>, vector<16x16xf32>
    %cst_110 = arith.constant dense<0xFF800000> : vector<16xf32>
    %267 = vector.multi_reduction <maximumf>, %266, %cst_110 [1] : vector<16x16xf32> to vector<16xf32>
    %268 = vector.shape_cast %267 : vector<16xf32> to vector<16x1xf32>
    %269 = vector.broadcast %268 : vector<16x1xf32> to vector<16x16xf32>
    %270 = arith.subf %266, %269 : vector<16x16xf32>
    %271 = math.exp %270 : vector<16x16xf32>
    %cst_111 = arith.constant 0.000000e+00 : f32
    %272 = vector.broadcast %cst_111 : f32 to vector<16x16xf32>
    %273 = arith.select %264, %271, %272 : vector<16x16xi1>, vector<16x16xf32>
    %cst_112 = arith.constant dense<0.000000e+00> : vector<16xf32>
    %274 = vector.multi_reduction <add>, %273, %cst_112 [1] : vector<16x16xf32> to vector<16xf32>
    %275 = vector.shape_cast %274 : vector<16xf32> to vector<16x1xf32>
    %cst_113 = arith.constant 1.000000e-30 : f32
    %276 = vector.broadcast %cst_113 : f32 to vector<16x1xf32>
    %277 = arith.maximumf %275, %276 : vector<16x1xf32>
    %278 = tpu.reciprocal %277 {approx = true} : vector<16x1xf32> -> vector<16x1xf32>
    %279 = vector.broadcast %278 : vector<16x1xf32> to vector<16x16xf32>
    %280 = arith.mulf %273, %279 : vector<16x16xf32>
    %281 = arith.truncf %280 : vector<16x16xf32> to vector<16x16xbf16>
    %cst_114 = arith.constant dense<0.000000e+00> : vector<16x128xf32>
    %282 = tpu.matmul %281, %252, %cst_114 {dimension_numbers = #tpu.dot_dimension_numbers<[1], [0], [0], [1], [0, 0, 1, 1], [], []>} : vector<16x16xbf16>, vector<16x128xbf16>, vector<16x128xf32> -> vector<16x128xf32>
    %283 = arith.addf %282, %251 : vector<16x128xf32>
    %cst_115 = arith.constant 0.000000e+00 : f32
    %284 = vector.broadcast %cst_115 : f32 to vector<16x1xf32>
    %285 = arith.cmpf ogt, %2, %284 : vector<16x1xf32>
    %286 = arith.subf %262, %268 : vector<16x1xf32>
    %287 = math.exp %286 : vector<16x1xf32>
    %288 = arith.mulf %287, %278 : vector<16x1xf32>
    %cst_116 = arith.constant 0.000000e+00 : f32
    %289 = vector.broadcast %cst_116 : f32 to vector<16x1xf32>
    %290 = arith.select %285, %288, %289 : vector<16x1xi1>, vector<16x1xf32>
    %291 = arith.truncf %283 : vector<16x128xf32> to vector<16x128xbf16>
    %cst_117 = arith.constant 0.000000e+00 : f32
    %292 = vector.broadcast %cst_117 : f32 to vector<16x16xf32>
    %293 = arith.cmpf ogt, %1, %292 : vector<16x16xf32>
    %cst_118 = arith.constant -1.000000e+30 : f32
    %294 = vector.broadcast %cst_118 : f32 to vector<16x16xf32>
    %295 = arith.select %293, %257, %294 : vector<16x16xi1>, vector<16x16xf32>
    %cst_119 = arith.constant dense<0xFF800000> : vector<16xf32>
    %296 = vector.multi_reduction <maximumf>, %295, %cst_119 [1] : vector<16x16xf32> to vector<16xf32>
    %297 = vector.shape_cast %296 : vector<16xf32> to vector<16x1xf32>
    %298 = vector.broadcast %297 : vector<16x1xf32> to vector<16x16xf32>
    %299 = arith.subf %295, %298 : vector<16x16xf32>
    %300 = math.exp %299 : vector<16x16xf32>
    %cst_120 = arith.constant 0.000000e+00 : f32
    %301 = vector.broadcast %cst_120 : f32 to vector<16x16xf32>
    %302 = arith.select %293, %300, %301 : vector<16x16xi1>, vector<16x16xf32>
    %cst_121 = arith.constant dense<0.000000e+00> : vector<16xf32>
    %303 = vector.multi_reduction <add>, %302, %cst_121 [1] : vector<16x16xf32> to vector<16xf32>
    %304 = vector.shape_cast %303 : vector<16xf32> to vector<16x1xf32>
    %cst_122 = arith.constant 1.000000e-30 : f32
    %305 = vector.broadcast %cst_122 : f32 to vector<16x1xf32>
    %306 = arith.maximumf %304, %305 : vector<16x1xf32>
    %307 = tpu.reciprocal %306 {approx = true} : vector<16x1xf32> -> vector<16x1xf32>
    %308 = vector.broadcast %307 : vector<16x1xf32> to vector<16x16xf32>
    %309 = arith.mulf %302, %308 : vector<16x16xf32>
    %310 = arith.truncf %309 : vector<16x16xf32> to vector<16x16xbf16>
    %cst_123 = arith.constant dense<0.000000e+00> : vector<16x128xf32>
    %311 = tpu.matmul %310, %252, %cst_123 {dimension_numbers = #tpu.dot_dimension_numbers<[1], [0], [0], [1], [0, 0, 1, 1], [], []>} : vector<16x16xbf16>, vector<16x128xbf16>, vector<16x128xf32> -> vector<16x128xf32>
    %312 = arith.addf %311, %251 : vector<16x128xf32>
    %cst_124 = arith.constant 0.000000e+00 : f32
    %313 = vector.broadcast %cst_124 : f32 to vector<16x1xf32>
    %314 = arith.cmpf ogt, %3, %313 : vector<16x1xf32>
    %315 = arith.subf %262, %297 : vector<16x1xf32>
    %316 = math.exp %315 : vector<16x1xf32>
    %317 = arith.mulf %316, %307 : vector<16x1xf32>
    %cst_125 = arith.constant 0.000000e+00 : f32
    %318 = vector.broadcast %cst_125 : f32 to vector<16x1xf32>
    %319 = arith.select %314, %317, %318 : vector<16x1xi1>, vector<16x1xf32>
    %320 = arith.truncf %312 : vector<16x128xf32> to vector<16x128xbf16>
    %cst_126 = arith.constant dense<0.000000e+00> : vector<16x128xf32>
    %321 = tpu.matmul %281, %291, %cst_126 {dimension_numbers = #tpu.dot_dimension_numbers<[0], [0], [1], [1], [0, 1, 1, 1], [], []>} : vector<16x16xbf16>, vector<16x128xbf16>, vector<16x128xf32> -> vector<16x128xf32>
    %322 = vector.broadcast %290 : vector<16x1xf32> to vector<16x128xf32>
    %323 = arith.mulf %322, %283 : vector<16x128xf32>
    %324 = arith.subf %321, %323 : vector<16x128xf32>
    %cst_127 = arith.constant dense<0.000000e+00> : vector<16x128xf32>
    %325 = tpu.matmul %310, %320, %cst_127 {dimension_numbers = #tpu.dot_dimension_numbers<[0], [0], [1], [1], [0, 1, 1, 1], [], []>} : vector<16x16xbf16>, vector<16x128xbf16>, vector<16x128xf32> -> vector<16x128xf32>
    %326 = vector.broadcast %319 : vector<16x1xf32> to vector<16x128xf32>
    %327 = arith.mulf %326, %312 : vector<16x128xf32>
    %328 = arith.subf %325, %327 : vector<16x128xf32>
    %cst_128 = arith.constant 5.000000e-01 : f32
    %329 = vector.broadcast %cst_128 : f32 to vector<16x128xf32>
    %330 = arith.mulf %329, %324 : vector<16x128xf32>
    %cst_129 = arith.constant 5.000000e-01 : f32
    %331 = vector.broadcast %cst_129 : f32 to vector<16x128xf32>
    %332 = arith.mulf %331, %328 : vector<16x128xf32>
    %333 = arith.addf %330, %332 : vector<16x128xf32>
    %334 = arith.truncf %333 : vector<16x128xf32> to vector<16x128xbf16>
    %c0_130 = arith.constant 0 : index
    %c0_131 = arith.constant 0 : index
    %335 = vector.load %arg25[%c0_130, %c0_131] : memref<16x128xf32, #tpu.memory_space<vmem>>, vector<16x128xf32>
    tpu.vector_store %arg25[%c0_130, %c0_131], %333 {strides = array<i32>} : memref<16x128xf32, #tpu.memory_space<vmem>>, vector<16x128xf32>,
    %c0_132 = arith.constant 0 : index
    %c0_133 = arith.constant 0 : index
    %336 = vector.load %arg22[%c0_132, %c0_133] : memref<128x128xf32, #tpu.memory_space<vmem>>, vector<128x128xf32>
    %cst_134 = arith.constant dense<0.000000e+00> : vector<16x128xf32>
    %337 = tpu.matmul %333, %336, %cst_134 {dimension_numbers = #tpu.dot_dimension_numbers<[1], [0], [0], [1], [0, 0, 1, 1], [], []>} : vector<16x128xf32>, vector<128x128xf32>, vector<16x128xf32> -> vector<16x128xf32>
    %c0_135 = arith.constant 0 : index
    %c0_136 = arith.constant 0 : index
    %338 = vector.load %arg26[%c0_135, %c0_136] : memref<16x128xf32, #tpu.memory_space<vmem>>, vector<16x128xf32>
    tpu.vector_store %arg26[%c0_135, %c0_136], %337 {strides = array<i32>} : memref<16x128xf32, #tpu.memory_space<vmem>>, vector<16x128xf32>,
    %c0_137 = arith.constant 0 : index
    %c0_138 = arith.constant 0 : index
    %339 = vector.load %arg15[%c0_137, %c0_138] : memref<128x256xbf16, #tpu.memory_space<vmem>>, vector<128x256xbf16>
    %cst_139 = arith.constant dense<0.000000e+00> : vector<16x256xf32>
    %340 = tpu.matmul %34, %339, %cst_139 {dimension_numbers = #tpu.dot_dimension_numbers<[1], [0], [0], [1], [0, 0, 1, 1], [], []>} : vector<16x128xbf16>, vector<128x256xbf16>, vector<16x256xf32> -> vector<16x256xf32>
    %c0_140 = arith.constant 0 : index
    %c0_141 = arith.constant 0 : index
    %341 = vector.load %arg16[%c0_140, %c0_141] : memref<128x256xbf16, #tpu.memory_space<vmem>>, vector<128x256xbf16>
    %cst_142 = arith.constant dense<0.000000e+00> : vector<16x256xf32>
    %342 = tpu.matmul %334, %341, %cst_142 {dimension_numbers = #tpu.dot_dimension_numbers<[1], [0], [0], [1], [0, 0, 1, 1], [], []>} : vector<16x128xbf16>, vector<128x256xbf16>, vector<16x256xf32> -> vector<16x256xf32>
    %343 = arith.addf %340, %342 : vector<16x256xf32>
    %c0_143 = arith.constant 0 : index
    %c0_144 = arith.constant 0 : index
    %344 = vector.load %arg17[%c0_143, %c0_144] : memref<1x256xf32, #tpu.memory_space<vmem>>, vector<1x256xf32>
    %345 = vector.broadcast %344 : vector<1x256xf32> to vector<16x256xf32>
    %346 = arith.addf %343, %345 : vector<16x256xf32>
    %cst_145 = arith.constant 0.000000e+00 : f32
    %347 = vector.broadcast %cst_145 : f32 to vector<16x256xf32>
    %348 = arith.cmpf ogt, %346, %347 : vector<16x256xf32>
    %cst_146 = arith.constant 0.000000e+00 : f32
    %349 = vector.broadcast %cst_146 : f32 to vector<16x256xf32>
    %350 = arith.minimumf %346, %349 : vector<16x256xf32>
    %351 = math.exp %350 : vector<16x256xf32>
    %cst_147 = arith.constant 1.000000e+00 : f32
    %352 = vector.broadcast %cst_147 : f32 to vector<16x256xf32>
    %353 = arith.subf %351, %352 : vector<16x256xf32>
    %354 = arith.select %348, %346, %353 : vector<16x256xi1>, vector<16x256xf32>
    %c0_148 = arith.constant 0 : index
    %c0_149 = arith.constant 0 : index
    %355 = vector.load %arg29[%c0_148, %c0_149] : memref<16x256xf32, #tpu.memory_space<vmem>>, vector<16x256xf32>
    tpu.vector_store %arg29[%c0_148, %c0_149], %354 {strides = array<i32>} : memref<16x256xf32, #tpu.memory_space<vmem>>, vector<16x256xf32>,
    %c0_150 = arith.constant 0 : index
    %c0_151 = arith.constant 0 : index
    %356 = vector.load %arg23[%c0_150, %c0_151] : memref<256x128xf32, #tpu.memory_space<vmem>>, vector<256x128xf32>
    %cst_152 = arith.constant dense<0.000000e+00> : vector<16x128xf32>
    %357 = tpu.matmul %354, %356, %cst_152 {dimension_numbers = #tpu.dot_dimension_numbers<[1], [0], [0], [1], [0, 0, 1, 1], [], []>} : vector<16x256xf32>, vector<256x128xf32>, vector<16x128xf32> -> vector<16x128xf32>
    %c0_153 = arith.constant 0 : index
    %c0_154 = arith.constant 0 : index
    %358 = vector.load %arg27[%c0_153, %c0_154] : memref<16x128xf32, #tpu.memory_space<vmem>>, vector<16x128xf32>
    tpu.vector_store %arg27[%c0_153, %c0_154], %357 {strides = array<i32>} : memref<16x128xf32, #tpu.memory_space<vmem>>, vector<16x128xf32>,
    %c0_155 = arith.constant 0 : index
    %c0_156 = arith.constant 0 : index
    %359 = vector.load %arg18[%c0_155, %c0_156] : memref<128x128xf32, #tpu.memory_space<vmem>>, vector<128x128xf32>
    %cst_157 = arith.constant dense<0.000000e+00> : vector<16x128xf32>
    %360 = tpu.matmul %32, %359, %cst_157 {dimension_numbers = #tpu.dot_dimension_numbers<[1], [1], [0], [0], [0, 0, 1, 0], [], []>} : vector<16x128xf32>, vector<128x128xf32>, vector<16x128xf32> -> vector<16x128xf32>
    %c0_158 = arith.constant 0 : index
    %c0_159 = arith.constant 0 : index
    %361 = vector.load %arg19[%c0_158, %c0_159] : memref<128x128xf32, #tpu.memory_space<vmem>>, vector<128x128xf32>
    %cst_160 = arith.constant dense<0.000000e+00> : vector<16x128xf32>
    %362 = tpu.matmul %333, %361, %cst_160 {dimension_numbers = #tpu.dot_dimension_numbers<[1], [1], [0], [0], [0, 0, 1, 0], [], []>} : vector<16x128xf32>, vector<128x128xf32>, vector<16x128xf32> -> vector<16x128xf32>
    %363 = arith.addf %360, %362 : vector<16x128xf32>
    %364 = arith.mulf %32, %32 : vector<16x128xf32>
    %cst_161 = arith.constant dense<0.000000e+00> : vector<16xf32>
    %365 = vector.multi_reduction <add>, %364, %cst_161 [1] : vector<16x128xf32> to vector<16xf32>
    %366 = vector.shape_cast %365 : vector<16xf32> to vector<16x1xf32>
    %367 = arith.mulf %333, %333 : vector<16x128xf32>
    %cst_162 = arith.constant dense<0.000000e+00> : vector<16xf32>
    %368 = vector.multi_reduction <add>, %367, %cst_162 [1] : vector<16x128xf32> to vector<16xf32>
    %369 = vector.shape_cast %368 : vector<16xf32> to vector<16x1xf32>
    %370 = arith.addf %366, %369 : vector<16x1xf32>
    %c0_163 = arith.constant 0 : index
    %c0_164 = arith.constant 0 : index
    %371 = vector.load %arg20[%c0_163, %c0_164] : memref<1x128xf32, #tpu.memory_space<vmem>>, vector<1x128xf32>
    %372 = vector.broadcast %370 : vector<16x1xf32> to vector<16x128xf32>
    %373 = vector.broadcast %371 : vector<1x128xf32> to vector<16x128xf32>
    %374 = arith.addf %372, %373 : vector<16x128xf32>
    %cst_165 = arith.constant 2.000000e+00 : f32
    %375 = vector.broadcast %cst_165 : f32 to vector<16x128xf32>
    %376 = arith.mulf %375, %363 : vector<16x128xf32>
    %377 = arith.subf %374, %376 : vector<16x128xf32>
    %c0_166 = arith.constant 0 : index
    %c0_167 = arith.constant 0 : index
    %378 = vector.load %arg21[%c0_166, %c0_167] : memref<1x128xf32, #tpu.memory_space<vmem>>, vector<1x128xf32>
    %cst_168 = arith.constant 1.000000e+00 : f32
    %379 = vector.broadcast %cst_168 : f32 to vector<16x128xf32>
    %380 = arith.mulf %377, %379 : vector<16x128xf32>
    %cst_169 = arith.constant 1.000000e+00 : f32
    %381 = vector.broadcast %cst_169 : f32 to vector<16x128xf32>
    %382 = arith.addf %381, %380 : vector<16x128xf32>
    %383 = vector.broadcast %378 : vector<1x128xf32> to vector<16x128xf32>
    %384 = arith.divf %383, %382 : vector<16x128xf32>
    %cst_170 = arith.constant dense<0.000000e+00> : vector<16xf32>
    %385 = vector.multi_reduction <add>, %384, %cst_170 [1] : vector<16x128xf32> to vector<16xf32>
    %386 = vector.shape_cast %385 : vector<16xf32> to vector<16x1xf32>
    %387 = vector.broadcast %386 : vector<16x1xf32> to vector<16x128xf32>
    %388 = arith.divf %384, %387 : vector<16x128xf32>
    %c0_171 = arith.constant 0 : index
    %c0_172 = arith.constant 0 : index
    %389 = vector.load %arg28[%c0_171, %c0_172] : memref<16x128xf32, #tpu.memory_space<vmem>>, vector<16x128xf32>
    tpu.vector_store %arg28[%c0_171, %c0_172], %388 {strides = array<i32>} : memref<16x128xf32, #tpu.memory_space<vmem>>, vector<16x128xf32>,
    return
  }
}

</mosaic_0001>

<bundles_post_ra>
// kernel: st_transformer_forward.1
= control target key start
LH: loop header
LB: loop body
LE: loop exit
PB: predicated region body
PF: predicated region fallthrough
CT: control target
= control target key end

     0   :  { %s4364_s6 = smov 1   ;;  %s4365_s10 = smov 2   ;;  %s5385_s0 = inlined_call_operand.smem [shape: u32[30], index: -1, kind: input, shape index: {}] }
   0x1   :  { %s4407_s5 = sld [smem:[%s5385_s0]]   ;;  %s4366_s14 = smov 3  }
   0x2   :  { %s4412_s9 = sld [smem:[%s5385_s0 + %s4364_s6]]   ;;  %s4367_s18 = smov 4  }
   0x3   :  { %s4417_s13 = sld [smem:[%s5385_s0 + %s4365_s10]]   ;;  %s4368_s22 = smov 5  }
   0x4   :  { %s4422_s17 = sld [smem:[%s5385_s0 + %s4366_s14]]   ;;  %s4369_s26 = smov 6  }
   0x5   :  { %s4427_s21 = sld [smem:[%s5385_s0 + %s4367_s18]]   ;;  %s4370_s30 = smov 7  }
   0x6   :  { %s4432_s25 = sld [smem:[%s5385_s0 + %s4368_s22]]   ;;  %s4371_s4 = smov 8  }
   0x7   :  { %s4437_s29 = sld [smem:[%s5385_s0 + %s4369_s26]]   ;;  %s4372_s10 = smov 9  }
   0x8   :  { %s4442_s3 = sld [smem:[%s5385_s0 + %s4370_s30]]   ;;  %s4373_s15 = smov 10  }
   0x9   :  { %s4447_s8 = sld [smem:[%s5385_s0 + %s4371_s4]]   ;;  %s4374_s20 = smov 11  }
   0xa   :  { %s4452_s14 = sld [smem:[%s5385_s0 + %s4372_s10]]   ;;  %s4375_s26 = smov 12  }
   0xb   :  { %s4457_s19 = sld [smem:[%s5385_s0 + %s4373_s15]]   ;;  %s4376_s1 = smov 13  }
   0xc   :  { %s4462_s24 = sld [smem:[%s5385_s0 + %s4374_s20]]   ;;  %s4377_s7 = smov 14  }
   0xd   :  { %s4467_s30 = sld [smem:[%s5385_s0 + %s4375_s26]]   ;;  %s4378_s15 = smov 15  }
   0xe   :  { %s4472_s6 = sld [smem:[%s5385_s0 + %s4376_s1]]   ;;  %s4379_s22 = smov 16  }
   0xf   :  { %s4477_s12 = sld [smem:[%s5385_s0 + %s4377_s7]]   ;;  %s4380_s28 = smov 17  }
  0x10   :  { %s4482_s20 = sld [smem:[%s5385_s0 + %s4378_s15]]   ;;  %s4381_s7 = smov 18  }
  0x11   :  { %s4487_s27 = sld [smem:[%s5385_s0 + %s4379_s22]]   ;;  %s4382_s15 = smov 19  }
  0x12   :  { %s4492_s4 = sld [smem:[%s5385_s0 + %s4380_s28]]   ;;  %s4383_s22 = smov 20  }
  0x13   :  { %s4384_s28 = smov 21  }
  0x14   :  { %5411 = sst [smem:[#allocation5_spill]] %s4472_s6 }
  0x15   :  { %5412 = sst [smem:[#allocation6_spill]] %s4477_s12 }
  0x16   :  { %5413 = sst [smem:[#allocation7_spill]] %s4482_s20 }
  0x17   :  { %5414 = sst [smem:[#allocation8_spill]] %s4487_s27 }
  0x18   :  { %5415 = sst [smem:[#allocation9_spill]] %s4492_s4 }
  0x19   :  { %s4497_s12 = sld [smem:[%s5385_s0 + %s4381_s7]]   ;;  %s4385_s7 = smov 22  }
  0x1a   :  { %s4502_s20 = sld [smem:[%s5385_s0 + %s4382_s15]]   ;;  %s4386_s15 = smov 23  }
  0x1b   :  { %s4507_s27 = sld [smem:[%s5385_s0 + %s4383_s22]]   ;;  %s4387_s22 = smov 24  }
  0x1c   :  { %s4512_s4 = sld [smem:[%s5385_s0 + %s4384_s28]]   ;;  %s4388_s28 = smov 25  }
  0x1f   :  { %5416 = sst [smem:[#allocation10_spill]] %s4497_s12 }
  0x20   :  { %5417 = sst [smem:[#allocation11_spill]] %s4502_s20 }
  0x21   :  { %5418 = sst [smem:[#allocation12_spill]] %s4507_s27 }
  0x22   :  { %5419 = sst [smem:[#allocation13_spill]] %s4512_s4 }
  0x23   :  { %s4517_s12 = sld [smem:[%s5385_s0 + %s4385_s7]]   ;;  %s4389_s7 = smov 26  }
  0x24   :  { %s4522_s20 = sld [smem:[%s5385_s0 + %s4386_s15]]   ;;  %s4390_s15 = smov 27  }
  0x25   :  { %s4527_s27 = sld [smem:[%s5385_s0 + %s4387_s22]]   ;;  %s4391_s22 = smov 28  }
  0x26   :  { %s4532_s4 = sld [smem:[%s5385_s0 + %s4388_s28]]   ;;  %s4392_s28 = smov 29  }
  0x27   :  { %s4547_s6 = sld [smem:[%s5385_s0 + %s4391_s22]]  }
  0x29   :  { %5420 = sst [smem:[#allocation14_spill]] %s4517_s12 }
  0x2a   :  { %5421 = sst [smem:[#allocation15_spill]] %s4522_s20 }
  0x2b   :  { %s4537_s12 = sld [smem:[%s5385_s0 + %s4389_s7]]  }
  0x2c   :  { %5422 = sst [smem:[#allocation16_spill]] %s4532_s4 }
  0x2d   :  { %s4542_s20 = sld [smem:[%s5385_s0 + %s4390_s15]]  }
  0x2e   :  { %s4552_s4 = sld [smem:[%s5385_s0 + %s4392_s28]]  }
  0x2f   :  { %v4040_v0 = vld [vmem:[%s4432_s25] sm:$0xff]   ;;  %v5397_v1 = vmov 0.0   ;;  %v4041_v2 = vld [vmem:[%s4432_s25 + $0x8] sm:$0xff]   ;;  %vm4394_vm0 = vmmov 0   ;;  %vm149_vm1 = vcmask 261120  }
  0x30   :  { %3640 = vmatprep.subr.bf16.mxu0 %v5397_v1  ;;  %3648 = vmatprep.subr.bf16.mxu1 %v5397_v1  ;;  %v123_v3 = vld [vmem:[%s4407_s5] sm:$0xff]  ;;  %v124_v4 = vld [vmem:[%s4407_s5 + $0x8] sm:$0xff] }
  0x31   :  { %3641 = vmatpush3.bf16.msra.mxu0 %v4040_v0  ;;  %3644 = vmatprep.mubr.msk.bf16.mxu0 %vm4394_vm0, %v5397_v1  ;;  %v4042_v5 = vld [vmem:[%s4442_s3] sm:$0xff]   ;;  %v4043_v6 = vld [vmem:[%s4442_s3 + $0x8] sm:$0xff]   ;;  %v125_v7 = vpack.c.bf16 %v124_v4, %v123_v3 }
  0x32   :  { %3642 = vmatprep.subr.bf16.mxu0 %v5397_v1  ;;  %3664 = vmatprep.mubr.msk.bf16.mxu1 %vm4394_vm0, %v5397_v1 }
  0x33   :  { %3649 = vmatpush3.bf16.msra.mxu1 %v4042_v5 }
  0x34   :  { %3650 = vmatprep.subr.bf16.mxu1 %v5397_v1 }
  0x35   :  { %3643 = vmatpush3.bf16.msra.mxu0 %v4041_v2 }
  0x37   :  { %3651 = vmatpush3.bf16.msra.mxu1 %v4043_v6 }
  0x38   :  { %3645 = vmatmul.mubr.msk.bf16.vlgmr.msra.gmra.mrb[0].mxu0 %vm149_vm1, %v125_v7  ;;  %3652 = vmatprep.subr.bf16.mxu1 %v5397_v1 }
  0x39   :  { %65 = vsyncpa [#allocation3], 0  ;;  %v4044_v8 = vld [vmem:[%s4442_s3 + $0x10] sm:$0xff]   ;;  %v4045_v9 = vld [vmem:[%s4442_s3 + $0x18] sm:$0xff]   ;;  %v5394_v0 = vmov 0   ;;  %vm692_vm7 = vcmask 130048  }
  0x3a   :  { %v4046_v10 = vld [vmem:[%s4442_s3 + $0x20] sm:$0xff]   ;;  %v4047_v11 = vld [vmem:[%s4442_s3 + $0x28] sm:$0xff]   ;;  %v4048_v12 = vld [vmem:[%s4442_s3 + $0x30] sm:$0xff]   ;;  %580 = vmatprep.mubr.bf16.mxu0 %v5394_v0  ;;  %s5435_s0 = sld [smem:[#allocation5_spill]]  ;;  %s5439_s5 = sld [smem:[#allocation6_spill]] }
  0x3b   :  { %3653 = vmatpush3.bf16.msra.mxu1 %v4044_v8  ;;  %v4049_v13 = vld [vmem:[%s4442_s3 + $0x38] sm:$0xff]   ;;  %v4050_v14 = vld [vmem:[%s4452_s14] ss:$16 sps:$4 sm:$0xff]   ;;  %v4052_v15 = vld [vmem:[%s4452_s14 + $0x4] ss:$16 sps:$4 sm:$0xff]   ;;  %s5444_s25 = sld [smem:[#allocation11_spill]] }
  0x3c   :  { %3654 = vmatprep.subr.bf16.mxu1 %v5397_v1  ;;  %v4055_v16 = vld [vmem:[%s4452_s14 + $0xc] ss:$16 sps:$4 sm:$0xff]   ;;  %v4058_v17 = vld [vmem:[%s4452_s14 + $0x24] ss:$16 sps:$4 sm:$0xff]   ;;  %548 = vmatprep.subr.bf16.mxu0 %v4052_v15  ;;  %v4056_v18 = vld [vmem:[%s4452_s14 + $0x20] ss:$16 sps:$4 sm:$0xff]  }
  0x3d   :  { %549 = vmatpush1.bf16.msra.mxu0 %v4050_v14  ;;  %v3341_v19 = vld [vmem:[%s4437_s29] ss:$0 sm:$0xff]  ;;  %v4053_v36 = vld [vmem:[%s4452_s14 + $0x8] ss:$16 sps:$4 sm:$0xff]   ;;  %v4061_v38 = vld [vmem:[%s4452_s14 + $0x2c] ss:$16 sps:$4 sm:$0xff]  }
  0x3e   :  { %550 = vmatprep.subr.bf16.mxu0 %v4058_v17  ;;  %v4059_v39 = vld [vmem:[%s4452_s14 + $0x28] ss:$16 sps:$4 sm:$0xff]   ;;  %v4064_v40 = vld [vmem:[%s4452_s14 + $0x44] ss:$16 sps:$4 sm:$0xff]   ;;  %v4067_v41 = vld [vmem:[%s4452_s14 + $0x4c] ss:$16 sps:$4 sm:$0xff]  }
  0x3f   :  { %3655 = vmatpush3.bf16.msra.mxu1 %v4045_v9  ;;  %v4062_v42 = vld [vmem:[%s4452_s14 + $0x40] ss:$16 sps:$4 sm:$0xff]   ;;  %v4065_v43 = vld [vmem:[%s4452_s14 + $0x48] ss:$16 sps:$4 sm:$0xff]   ;;  %v4070_v44 = vld [vmem:[%s4452_s14 + $0x64] ss:$16 sps:$4 sm:$0xff]  }
  0x40   :  { %3656 = vmatprep.subr.bf16.mxu1 %v5397_v1  ;;  %v4073_v45 = vld [vmem:[%s4452_s14 + $0x6c] ss:$16 sps:$4 sm:$0xff]   ;;  %v4068_v46 = vld [vmem:[%s4452_s14 + $0x60] ss:$16 sps:$4 sm:$0xff]   ;;  %v4071_v47 = vld [vmem:[%s4452_s14 + $0x68] ss:$16 sps:$4 sm:$0xff]  }
  0x41   :  { %551 = vmatpush1.bf16.msra.mxu0 %v4056_v18  ;;  %v4076_v48 = vld [vmem:[%s4452_s14 + $0x84] ss:$16 sps:$4 sm:$0xff]   ;;  %v4079_v49 = vld [vmem:[%s4452_s14 + $0x8c] ss:$16 sps:$4 sm:$0xff]   ;;  %v4074_v50 = vld [vmem:[%s4452_s14 + $0x80] ss:$16 sps:$4 sm:$0xff]  }
  0x42   :  { %552 = vmatprep.subr.bf16.mxu0 %v4064_v40  ;;  %v4077_v51 = vld [vmem:[%s4452_s14 + $0x88] ss:$16 sps:$4 sm:$0xff]   ;;  %v4082_v52 = vld [vmem:[%s4452_s14 + $0xa4] ss:$16 sps:$4 sm:$0xff]   ;;  %v4085_v53 = vld [vmem:[%s4452_s14 + $0xac] ss:$16 sps:$4 sm:$0xff]  }
  0x43   :  { %3657 = vmatpush3.bf16.msra.mxu1 %v4046_v10  ;;  %v4080_v54 = vld [vmem:[%s4452_s14 + $0xa0] ss:$16 sps:$4 sm:$0xff]   ;;  %v4083_v55 = vld [vmem:[%s4452_s14 + $0xa8] ss:$16 sps:$4 sm:$0xff]   ;;  %v4088_v56 = vld [vmem:[%s4452_s14 + $0xc4] ss:$16 sps:$4 sm:$0xff]  }
  0x44   :  { %3658 = vmatprep.subr.bf16.mxu1 %v5397_v1  ;;  %v4091_v57 = vld [vmem:[%s4452_s14 + $0xcc] ss:$16 sps:$4 sm:$0xff]   ;;  %v4086_v58 = vld [vmem:[%s4452_s14 + $0xc0] ss:$16 sps:$4 sm:$0xff]   ;;  %v4089_v59 = vld [vmem:[%s4452_s14 + $0xc8] ss:$16 sps:$4 sm:$0xff]  }
  0x45   :  { %553 = vmatpush1.bf16.msra.mxu0 %v4062_v42  ;;  %v4094_v60 = vld [vmem:[%s4452_s14 + $0xe4] ss:$16 sps:$4 sm:$0xff]   ;;  %v4097_v61 = vld [vmem:[%s4452_s14 + $0xec] ss:$16 sps:$4 sm:$0xff]   ;;  %v4092_v62 = vld [vmem:[%s4452_s14 + $0xe0] ss:$16 sps:$4 sm:$0xff]  }
  0x46   :  { %554 = vmatprep.subr.bf16.mxu0 %v4070_v44  ;;  %v4095_v63 = vld [vmem:[%s4452_s14 + $0xe8] ss:$16 sps:$4 sm:$0xff]   ;;  %v3347_v2 = vld [vmem:[%s4447_s8] ss:$0 sm:$0xff]  ;;  %s5446_s29 = sld [smem:[#allocation15_spill]]  ;;  %s5447_s3 = sld [smem:[#allocation10_spill]] }
  0x47   :  { %3659 = vmatpush3.bf16.msra.mxu1 %v4047_v11  ;;  %s5448_s8 = sld [smem:[#allocation9_spill]]  ;;  %s5449_s14 = sld [smem:[#allocation12_spill]] }
  0x48   :  { %3660 = vmatprep.subr.bf16.mxu1 %v5397_v1 }
  0x49   :  { %555 = vmatpush1.bf16.msra.mxu0 %v4068_v46 }
  0x4a   :  { %556 = vmatprep.subr.bf16.mxu0 %v4076_v48  ;;  %v4664_v48 = vld [vmem:[%s4417_s13] sm:$0xff] }
  0x4b   :  { %3661 = vmatpush3.bf16.msra.mxu1 %v4048_v12  ;;  %5424 = vst [vmem:[#allocation18_spill] sm:$0xff] %v4664_v48  ;;  %vm777_vm6 = vcmp.gt.f32.partialorder %v4664_v48, 0.0 }
  0x4c   :  { %3662 = vmatprep.subr.bf16.mxu1 %v5397_v1 }
  0x4d   :  { %557 = vmatpush1.bf16.msra.mxu0 %v4074_v50  ;;  %v4670_v50 = vld [vmem:[%s4417_s13 + $0x8] sm:$0xff]  ;;  %s5441_s13 = sld [smem:[#allocation8_spill]] }
  0x4e   :  { %558 = vmatprep.subr.bf16.mxu0 %v4082_v52  ;;  %5425 = vst [vmem:[#allocation19_spill] sm:$0xff] %v4670_v50  ;;  %v4674_v52 = vld [vmem:[%s4412_s9 + $0x8] sm:$0xff]  ;;  %vm778_vm9 = vcmp.gt.f32.partialorder %v4670_v50, 0.0 }
  0x4f   :  { %3663 = vmatpush3.bf16.msra.mxu1 %v4049_v13  ;;  %vm689_vm10 = vcmp.gt.f32.partialorder %v4674_v52, 0.0 }
  0x50   :  { %591 = vmatprep.subr.bf16.mxu1 %v4055_v16 }
  0x51   :  { %559 = vmatpush1.bf16.msra.mxu0 %v4080_v54 }
  0x52   :  { %560 = vmatprep.subr.bf16.mxu0 %v4088_v56 }
  0x55   :  { %561 = vmatpush1.bf16.msra.mxu0 %v4086_v58 }
  0x56   :  { %562 = vmatprep.subr.bf16.mxu0 %v4094_v60 }
  0x59   :  { %563 = vmatpush1.bf16.msra.mxu0 %v4092_v62 }
  0x5a   :  { %3668 = vmatprep.subr.bf16.mxu0 %v5397_v1 }
 0x10b   :  { %v187_v20 = vpop.f32.mrb[0].mxu0 }
 0x10c   :  { %v188_v21 = vadd.f32 %v3341_v19, %v187_v20  ;;  %v3646_v22 = vpop.f32.mrb[1].mxu0  ;;  %v368_v20 = vlaneseq }
 0x10d   :  { %v190_v23 = vpop.f32.mrb[2].mxu0 }
 0x10e   :  { %v196_v24 = vmin.f32 %v188_v21, 0.0  ;;  %v191_v25 = vadd.f32 %v3341_v19, %v190_v23  ;;  %v3647_v26 = vpop.f32.mrb[3].mxu0  ;;  %vm194_vm2 = vcmp.gt.f32.partialorder %v188_v21, 0.0  ;;  %v4634_v23 = vld [vmem:[%s4457_s19] sm:$0xf]  ;;  %s5450_s19 = sld [smem:[#allocation13_spill]] }
 0x110   :  { %v198_v27 = vmul.f32 1.442695, %v196_v24  ;;  %v197_v28 = vmin.f32 %v191_v25, 0.0  ;;  %vm195_vm3 = vcmp.gt.f32.partialorder %v191_v25, 0.0 }
 0x112   :  { %4242 = vpow2.f32 %v198_v27  ;;  %v200_v29 = vmul.f32 1.442695, %v197_v28 }
 0x114   :  { %4244 = vpow2.f32 %v200_v29 }
 0x11c   :  { %v4243_v30 = vpop.eup %4242 }
 0x11d   :  { %v3345_v31 = vadd.f32 -1.0, %v4243_v30 }
 0x11e   :  { %v4245_v32 = vpop.eup %4244 }
 0x11f   :  { %v3346_v33 = vadd.f32 -1.0, %v4245_v32  ;;  %v204_v34 = vsel %vm194_vm2, %v188_v21, %v3345_v31  ;;  %v4628_v21 = vshrl.u32 %v368_v20, 7 }
 0x121   :  { %v205_v35 = vsel %vm195_vm3, %v191_v25, %v3346_v33  ;;  %v4631_v22 = vsub.s32 0, %v4628_v21  ;;  %v4637_v24 = vsub.s32 1, %v4628_v21  ;;  %v4640_v25 = vsub.s32 2, %v4628_v21 }
 0x122   :  { %v206_v37 = vpack.c.bf16 %v205_v35, %v204_v34 }
 0x123   :  { %v371_v26 = vrot.slane %v4634_v23, %v4631_v22  ;;  %v375_v27 = vrot.slane %v4634_v23, %v4637_v24  ;;  %v379_v28 = vrot.slane %v4634_v23, %v4640_v25 }
 0x124   :  { %3665 = vmatmul.mubr.bf16.vlgmr.msra.gmra.mrb[0].mxu1 %v206_v37 }
 0x125   :  { %592 = vmatpush1.bf16.msra.mxu1 %v4053_v36  ;;  %623 = vmatprep.mubr.bf16.mxu1 %v5394_v0 }
 0x126   :  { %593 = vmatprep.subr.bf16.mxu1 %v4061_v38 }
 0x129   :  { %594 = vmatpush1.bf16.msra.mxu1 %v4059_v39 }
 0x12a   :  { %595 = vmatprep.subr.bf16.mxu1 %v4067_v41 }
 0x12d   :  { %596 = vmatpush1.bf16.msra.mxu1 %v4065_v43 }
 0x12e   :  { %597 = vmatprep.subr.bf16.mxu1 %v4073_v45 }
 0x131   :  { %598 = vmatpush1.bf16.msra.mxu1 %v4071_v47 }
 0x132   :  { %599 = vmatprep.subr.bf16.mxu1 %v4079_v49  ;;  %v4667_v49 = vld [vmem:[%s4412_s9] sm:$0xff]  ;;  %s5440_s9 = sld [smem:[#allocation14_spill]] }
 0x133   :  { %vm688_vm8 = vcmp.gt.f32.partialorder %v4667_v49, 0.0 }
 0x135   :  { %600 = vmatpush1.bf16.msra.mxu1 %v4077_v51 }
 0x136   :  { %601 = vmatprep.subr.bf16.mxu1 %v4085_v53 }
 0x139   :  { %602 = vmatpush1.bf16.msra.mxu1 %v4083_v55 }
 0x13a   :  { %603 = vmatprep.subr.bf16.mxu1 %v4091_v57 }
 0x13d   :  { %604 = vmatpush1.bf16.msra.mxu1 %v4089_v59 }
 0x13e   :  { %605 = vmatprep.subr.bf16.mxu1 %v4097_v61 }
 0x141   :  { %606 = vmatpush1.bf16.msra.mxu1 %v4095_v63 }
 0x142   :  { %3692 = vmatprep.subr.bf16.mxu1 %v5397_v1 }
 0x1f7   :  { %v312_v3 = vpop.f32.mrb[0].mxu1 }
 0x1f8   :  { %v313_v4 = vadd.f32 %v3347_v2, %v312_v3  ;;  %v3666_v5 = vpop.f32.mrb[1].mxu1 }
 0x1f9   :  { %v315_v6 = vpop.f32.mrb[2].mxu1 }
 0x1fa   :  { %v321_v7 = vmin.f32 %v313_v4, 0.0  ;;  %v316_v8 = vadd.f32 %v3347_v2, %v315_v6  ;;  %v3667_v9 = vpop.f32.mrb[3].mxu1  ;;  %vm319_vm4 = vcmp.gt.f32.partialorder %v313_v4, 0.0 }
 0x1fc   :  { %v323_v10 = vmul.f32 1.442695, %v321_v7  ;;  %v322_v11 = vmin.f32 %v316_v8, 0.0  ;;  %vm320_vm5 = vcmp.gt.f32.partialorder %v316_v8, 0.0 }
 0x1fe   :  { %4246 = vpow2.f32 %v323_v10  ;;  %v325_v12 = vmul.f32 1.442695, %v322_v11 }
 0x200   :  { %4248 = vpow2.f32 %v325_v12 }
 0x208   :  { %v4247_v13 = vpop.eup %4246 }
 0x209   :  { %v3356_v14 = vadd.f32 -1.0, %v4247_v13 }
 0x20a   :  { %v4249_v15 = vpop.eup %4248 }
 0x20b   :  { %v329_v16 = vsel %vm319_vm4, %v313_v4, %v3356_v14  ;;  %v3357_v17 = vadd.f32 -1.0, %v4249_v15 }
 0x20c   :  { %331 = vst [vmem:[%s4527_s27] sm:$0xff] %v329_v16 }
 0x20d   :  { %v330_v18 = vsel %vm320_vm5, %v316_v8, %v3357_v17 }
 0x20e   :  { %332 = vst [vmem:[%s4527_s27 + $0x8] sm:$0xff] %v330_v18  ;;  %v4620_v19 = vpack.c.bf16 %v330_v18, %v329_v16 }
 0x210   :  { %5423 = vst [vmem:[#allocation17_spill] sm:$0xff] %v4620_v19  ;;  %581 = vmatmul.mubr.bf16.vlgmr.msra.gmra.mrb[4].mxu0 %v4620_v19  ;;  %624 = vmatmul.mubr.bf16.vlgmr.msra.gmra.mrb[4].mxu1 %v4620_v19 }
 0x211   :  { %3670 = vmatprep.mubr.msk.bf16.mxu0 %vm4394_vm0, %v5397_v1  ;;  %3694 = vmatprep.mubr.msk.bf16.mxu1 %vm4394_vm0, %v5397_v1 }
 0x2e3   :  { %v582_v29 = vpop.f32.mrb[4].mxu0  ;;  %v625_v30 = vpop.f32.mrb[4].mxu1 }
 0x2e4   :  { %v583_v31 = vadd.f32 %v582_v29, %v371_v26  ;;  %v584_v32 = vpop.f32.mrb[5].mxu0  ;;  %v4648_v33 = vpop.f32.mrb[5].mxu1  ;;  %v626_v37 = vadd.f32 %v625_v30, %v379_v28 }
 0x2e5   :  { %v585_v34 = vadd.f32 %v584_v32, %v375_v27  ;;  %v586_v35 = vpop.f32.mrb[6].mxu0  ;;  %v629_v36 = vpop.f32.mrb[6].mxu1 }
 0x2e6   :  { %v587_v38 = vadd.f32 %v586_v35, %v371_v26  ;;  %v630_v39 = vadd.f32 %v629_v36, %v379_v28  ;;  %v588_v40 = vpop.f32.mrb[7].mxu0  ;;  %v4650_v41 = vpop.f32.mrb[7].mxu1 }
 0x2e7   :  { %v589_v42 = vadd.f32 %v588_v40, %v375_v27  ;;  %v4652_v43 = vmul.f32 %v585_v34, %v583_v31 }
 0x2e8   :  { %v635_v44 = vpack.c.bf16 %v587_v38, %v583_v31  ;;  %v4654_v45 = vpack.c.bf16 %v630_v39, %v626_v37 }
 0x2e9   :  { %v636_v46 = vpack.c.bf16 %v589_v42, %v585_v34  ;;  %v4656_v47 = vmul.f32 %v589_v42, %v587_v38 }
 0x2eb   :  { %3669 = vmatpush3.bf16.xpose.msra.mxu0 %v636_v46 }
 0x2ec   :  { %3674 = vmatprep.subr.bf16.mxu0 %v5397_v1 }
 0x2f2   :  { %3671 = vmatmul.mubr.bf16.vlgmr.msra.gmra.mrb[8].mxu0 %v635_v44 }
 0x2f3   :  { %3675 = vmatpush3.bf16.msra.mxu0 %v4654_v45  ;;  %3676 = vmatprep.mubr.msk.bf16.mxu0 %vm4394_vm0, %v5397_v1 }
 0x2f4   :  { %3680 = vmatprep.subr.bf16.mxu0 %v5397_v1 }
 0x3c5   :  { %v671_v51 = vpop.f32.mrb[8].mxu0 }
 0x3c6   :  { %v678_v53 = vmul.f32 0.17677669, %v671_v51  ;;  %v3672_v54 = vpop.f32.mrb[9].mxu0 }
 0x3c7   :  { %v674_v55 = vpop.f32.mrb[10].mxu0 }
 0x3c8   :  { %v679_v56 = vmul.f32 0.17677669, %v674_v55  ;;  %v3673_v57 = vpop.f32.mrb[11].mxu0  ;;  %v779_v58 = vsel %vm777_vm6, %v678_v53, -1e+30 }
 0x3c9   :  { %v781_v59 = vsel %vm692_vm7, %v779_v58, -inf  ;;  %v690_v60 = vsel %vm688_vm8, %v678_v53, -1e+30 }
 0x3ca   :  { %782 = vmax.xlane.f32.xlu1 %v781_v59  ;;  %v693_v61 = vsel %vm692_vm7, %v690_v60, -inf  ;;  %v780_v62 = vsel %vm778_vm9, %v679_v56, -1e+30  ;;  %v691_v63 = vsel %vm689_vm10, %v679_v56, -1e+30 }
 0x3cb   :  { %694 = vmax.xlane.f32.xlu0 %v693_v61  ;;  %v784_v2 = vsel %vm692_vm7, %v780_v62, -inf  ;;  %v696_v3 = vsel %vm692_vm7, %v691_v63, -inf }
 0x3ce   :  { %785 = vmax.xlane.f32.xlu1 %v784_v2 }
 0x3cf   :  { %697 = vmax.xlane.f32.xlu0 %v696_v3 }
 0x457   :  { %v4691_v4 = vpop.xlane.xlu1 %782 }
 0x458   :  { %v787_v5 = vsub.f32 %v779_v58, %v4691_v4  ;;  %v4694_v6 = vpop.xlane.xlu0 %694 }
 0x459   :  { %v699_v7 = vsub.f32 %v690_v60, %v4694_v6 }
 0x45a   :  { %v789_v8 = vmul.f32 1.442695, %v787_v5 }
 0x45b   :  { %v701_v9 = vmul.f32 1.442695, %v699_v7  ;;  %v4697_v10 = vpop.xlane.xlu1 %785 }
 0x45c   :  { %4250 = vpow2.f32 %v789_v8  ;;  %v788_v11 = vsub.f32 %v780_v62, %v4697_v10  ;;  %v4700_v12 = vpop.xlane.xlu0 %697 }
 0x45d   :  { %4252 = vpow2.f32 %v701_v9  ;;  %v700_v13 = vsub.f32 %v691_v63, %v4700_v12 }
 0x45e   :  { %v791_v14 = vmul.f32 1.442695, %v788_v11 }
 0x45f   :  { %v703_v15 = vmul.f32 1.442695, %v700_v13 }
 0x460   :  { %4254 = vpow2.f32 %v791_v14  ;;  %v4734_v14 = vld [vmem:[%s4422_s17] sm:$0xff] }
 0x461   :  { %4256 = vpow2.f32 %v703_v15  ;;  %5426 = vst [vmem:[#allocation20_spill] sm:$0xff] %v4734_v14  ;;  %vm764_vm11 = vcmp.gt.f32.partialorder %v4734_v14, 0.0  ;;  %v4738_v15 = vld [vmem:[%s4422_s17 + $0x8] sm:$0xff]  ;;  %s5442_s17 = sld [smem:[#allocation7_spill]] }
 0x462   :  { %5427 = vst [vmem:[#allocation21_spill] sm:$0xff] %v4738_v15  ;;  %vm765_vm12 = vcmp.gt.f32.partialorder %v4738_v15, 0.0 }
 0x466   :  { %v4251_v16 = vpop.eup %4250 }
 0x467   :  { %v4253_v17 = vpop.eup %4252  ;;  %v793_v27 = vsel %vm777_vm6, %v4251_v16, 0.0 }
 0x468   :  { %v705_v18 = vsel %vm688_vm8, %v4253_v17, 0.0  ;;  %v795_v30 = vsel %vm692_vm7, %v793_v27, 0.0 }
 0x469   :  { %v707_v20 = vsel %vm692_vm7, %v705_v18, 0.0 }
 0x46a   :  { %v4255_v26 = vpop.eup %4254  ;;  %708 = vadd.xlane.f32.xlu0 %v707_v20 }
 0x46b   :  { %v4257_v28 = vpop.eup %4256  ;;  %v794_v32 = vsel %vm778_vm9, %v4255_v26, 0.0 }
 0x46c   :  { %v706_v29 = vsel %vm689_vm10, %v4257_v28, 0.0  ;;  %v798_v34 = vsel %vm692_vm7, %v794_v32, 0.0  ;;  %v4750_v28 = vld [vmem:[%s4427_s21 + $0x8] sm:$0xff] }
 0x46d   :  { %v710_v31 = vsel %vm692_vm7, %v706_v29, 0.0  ;;  %5429 = vst [vmem:[#allocation23_spill] sm:$0xff] %v4750_v28  ;;  %vm853_vm14 = vcmp.gt.f32.partialorder %v4750_v28, 0.0 }
 0x46e   :  { %796 = vadd.xlane.f32.xlu0 %v795_v30  ;;  %711 = vadd.xlane.f32.xlu1 %v710_v31 }
 0x472   :  { %799 = vadd.xlane.f32.xlu1 %v798_v34 }
 0x4f7   :  { %v709_v35 = vpop.xlane.xlu0 %708 }
 0x4f8   :  { %v713_v36 = vmax.f32 %v709_v35, 1e-30 }
 0x4fa   :  { %4258 = vrcp.f32 %v713_v36 }
 0x4fb   :  { %v712_v37 = vpop.xlane.xlu1 %711  ;;  %v797_v38 = vpop.xlane.xlu0 %796 }
 0x4fc   :  { %v714_v39 = vmax.f32 %v712_v37, 1e-30  ;;  %v801_v40 = vmax.f32 %v797_v38, 1e-30 }
 0x4fe   :  { %4260 = vrcp.f32 %v714_v39 }
 0x4ff   :  { %v800_v42 = vpop.xlane.xlu1 %799  ;;  %4262 = vrcp.f32 %v801_v40 }
 0x500   :  { %v802_v44 = vmax.f32 %v800_v42, 1e-30 }
 0x502   :  { %4264 = vrcp.f32 %v802_v44 }
 0x504   :  { %v4259_v46 = vpop.eup %4258 }
 0x505   :  { %v717_v53 = vmul.f32 %v4259_v46, %v705_v18  ;;  %v4744_v18 = vld [vmem:[%s4427_s21] sm:$0xff]  ;;  %s5443_s21 = sld [smem:[#allocation16_spill]] }
 0x506   :  { %5428 = vst [vmem:[#allocation22_spill] sm:$0xff] %v4744_v18  ;;  %vm852_vm13 = vcmp.gt.f32.partialorder %v4744_v18, 0.0 }
 0x508   :  { %v4261_v51 = vpop.eup %4260 }
 0x509   :  { %v718_v54 = vmul.f32 %v4261_v51, %v706_v29  ;;  %v4263_v55 = vpop.eup %4262 }
 0x50a   :  { %v805_v58 = vmul.f32 %v4263_v55, %v793_v27 }
 0x50b   :  { %v719_v56 = vpack.c.bf16 %v718_v54, %v717_v53 }
 0x50c   :  { %v4265_v57 = vpop.eup %4264 }
 0x50d   :  { %865 = vxpose.xlu0.c.b16.start.end [1/1] (short) (narrow) %v719_v56, 16  ;;  %3677 = vmatmul.mubr.msk.bf16.vlgmr.msra.gmra.mrb[12].mxu0 %vm692_vm7, %v719_v56  ;;  %v806_v59 = vmul.f32 %v4265_v57, %v794_v32  ;;  %v4758_v32 = vsub.s32 3, %v4628_v21 }
 0x50e   :  { %3681 = vmatpush3.bf16.msra.mxu0 %v4654_v45  ;;  %3682 = vmatprep.mubr.msk.bf16.mxu0 %vm4394_vm0, %v5397_v1 }
 0x50f   :  { %v807_v60 = vpack.c.bf16 %v806_v59, %v805_v58  ;;  %3686 = vmatprep.subr.bf16.mxu0 %v5397_v1  ;;  %v383_v34 = vrot.slane %v4634_v23, %v4758_v32  ;;  %v4774_v23 = vld [vmem:[%s4462_s24] ss:$16 sps:$4 sm:$0xff]   ;;  %v4791_v58 = vld [vmem:[%s4462_s24 + $0xc] ss:$16 sps:$4 sm:$0xff]   ;;  %v4795_v59 = vld [vmem:[%s4462_s24 + $0x44] ss:$16 sps:$4 sm:$0xff]  }
 0x511   :  { %939 = vxpose.xlu1.c.b16.start.end [1/1] (short) (narrow) %v807_v60, 16  ;;  %v628_v35 = vadd.f32 %v4648_v33, %v383_v34  ;;  %v632_v37 = vadd.f32 %v4650_v41, %v383_v34  ;;  %v4778_v41 = vld [vmem:[%s4462_s24 + $0x24] ss:$16 sps:$4 sm:$0xff]  }
 0x515   :  { %3683 = vmatmul.mubr.msk.bf16.vlgmr.msra.gmra.mrb[16].mxu0 %vm692_vm7, %v807_v60  ;;  %4039 = vset.pattern.permute.xlu1 %v5394_v0 }
 0x516   :  { %4038 = vset.pattern.permute.xlu0 %v5394_v0  ;;  %3688 = vmatprep.mubr.msk.bf16.mxu0 %vm4394_vm0, %v5397_v1 }
 0x51a   :  { %682 = vadd.xlane.f32.xlu0 %v4652_v43 }
 0x51e   :  { %684 = vadd.xlane.f32.xlu1 %v4656_v47 }
 0x573   :  { %v873_v45 = vpop.trf.xlu0 }
 0x577   :  { %v4727_v61 = vpop.trf.xlu1 }
 0x5a7   :  { %v683_v62 = vpop.xlane.xlu0 %682 }
 0x5a8   :  { %v686_v63 = vmul.f32 0.17677669, %v683_v62  ;;  %v4804_v62 = vld [vmem:[%s4462_s24 + $0x40] ss:$16 sps:$4 sm:$0xff]  }
 0x5aa   :  { %v766_v2 = vsub.f32 %v686_v63, %v4694_v6  ;;  %v854_v3 = vsub.f32 %v686_v63, %v4691_v4  ;;  %v4808_v63 = vld [vmem:[%s4462_s24 + $0x2c] ss:$16 sps:$4 sm:$0xff]  }
 0x5ab   :  { %v685_v5 = vpop.xlane.xlu1 %684 }
 0x5ac   :  { %v768_v7 = vmul.f32 1.442695, %v766_v2  ;;  %v687_v8 = vmul.f32 0.17677669, %v685_v5  ;;  %v856_v9 = vmul.f32 1.442695, %v854_v3 }
 0x5ad   :  { %v4815_v2 = vld [vmem:[%s4462_s24 + $0x28] ss:$16 sps:$4 sm:$0xff]   ;;  %v4820_v3 = vld [vmem:[%s4462_s24 + $0x4c] ss:$16 sps:$4 sm:$0xff]  }
 0x5ae   :  { %4266 = vpow2.f32 %v768_v7  ;;  %v767_v43 = vsub.f32 %v687_v8, %v4700_v12  ;;  %v855_v47 = vsub.f32 %v687_v8, %v4697_v10  ;;  %v4825_v5 = vld [vmem:[%s4462_s24 + $0x48] ss:$16 sps:$4 sm:$0xff]   ;;  %v4833_v7 = vld [vmem:[%s4462_s24 + $0x6c] ss:$16 sps:$4 sm:$0xff]   ;;  %v4836_v8 = vld [vmem:[%s4462_s24 + $0x60] ss:$16 sps:$4 sm:$0xff]  }
 0x5af   :  { %4268 = vpow2.f32 %v856_v9  ;;  %v4839_v9 = vld [vmem:[%s4462_s24 + $0x68] ss:$16 sps:$4 sm:$0xff]  }
 0x5b0   :  { %v770_v11 = vmul.f32 1.442695, %v767_v43  ;;  %v858_v13 = vmul.f32 1.442695, %v855_v47  ;;  %v4846_v43 = vld [vmem:[%s4462_s24 + $0x84] ss:$16 sps:$4 sm:$0xff]  }
 0x5b1   :  { %v4849_v47 = vld [vmem:[%s4462_s24 + $0x8c] ss:$16 sps:$4 sm:$0xff]  }
 0x5b2   :  { %4270 = vpow2.f32 %v770_v11  ;;  %v4852_v11 = vld [vmem:[%s4462_s24 + $0x80] ss:$16 sps:$4 sm:$0xff]  }
 0x5b3   :  { %4272 = vpow2.f32 %v858_v13  ;;  %v4855_v13 = vld [vmem:[%s4462_s24 + $0x88] ss:$16 sps:$4 sm:$0xff]  }
 0x5b8   :  { %v4267_v6 = vpop.eup %4266 }
 0x5b9   :  { %v772_v4 = vmul.f32 %v4267_v6, %v4259_v46  ;;  %v4269_v16 = vpop.eup %4268  ;;  %v4769_v46 = vld [vmem:[%s4462_s24 + $0x4] ss:$16 sps:$4 sm:$0xff]  }
 0x5ba   :  { %v860_v26 = vmul.f32 %v4269_v16, %v4263_v55  ;;  %v4862_v6 = vld [vmem:[%s4462_s24 + $0xa4] ss:$16 sps:$4 sm:$0xff]   ;;  %v4868_v16 = vld [vmem:[%s4462_s24 + $0xa0] ss:$16 sps:$4 sm:$0xff]  }
 0x5bb   :  { %v774_v12 = vsel %vm764_vm11, %v772_v4, 0.0  ;;  %v4865_v4 = vld [vmem:[%s4462_s24 + $0xac] ss:$16 sps:$4 sm:$0xff]  }
 0x5bc   :  { %v4271_v10 = vpop.eup %4270  ;;  %927 = vperm.xlu0 %4038, %v774_v12   ;;  %v862_v29 = vsel %vm852_vm13, %v860_v26, 0.0  ;;  %v4871_v12 = vld [vmem:[%s4462_s24 + $0xa8] ss:$16 sps:$4 sm:$0xff]  }
 0x5bd   :  { %v773_v17 = vmul.f32 %v4271_v10, %v4261_v51  ;;  %v4273_v27 = vpop.eup %4272  ;;  %v4878_v10 = vld [vmem:[%s4462_s24 + $0xc4] ss:$16 sps:$4 sm:$0xff]   ;;  %v4887_v26 = vld [vmem:[%s4462_s24 + $0xc8] ss:$16 sps:$4 sm:$0xff]  }
 0x5be   :  { %v861_v30 = vmul.f32 %v4273_v27, %v4265_v57  ;;  %v4787_v57 = vld [vmem:[%s4462_s24 + $0x20] ss:$16 sps:$4 sm:$0xff]   ;;  %v4894_v27 = vld [vmem:[%s4462_s24 + $0xe4] ss:$16 sps:$4 sm:$0xff]  }
 0x5bf   :  { %v775_v20 = vsel %vm765_vm12, %v773_v17, 0.0  ;;  %v4881_v17 = vld [vmem:[%s4462_s24 + $0xcc] ss:$16 sps:$4 sm:$0xff]  }
 0x5c0   :  { %932 = vperm.xlu1 %4039, %v775_v20   ;;  %v863_v31 = vsel %vm853_vm14, %v861_v30, 0.0  ;;  %v4884_v20 = vld [vmem:[%s4462_s24 + $0xc0] ss:$16 sps:$4 sm:$0xff]  }
 0x5c1   :  { %v4900_v30 = vld [vmem:[%s4462_s24 + $0xe0] ss:$16 sps:$4 sm:$0xff]  }
 0x5c4   :  { %1001 = vperm.xlu1 %4039, %v862_v29   ;;  %v4897_v29 = vld [vmem:[%s4462_s24 + $0xec] ss:$16 sps:$4 sm:$0xff]  }
 0x5c8   :  { %1006 = vperm.xlu1 %4039, %v863_v31   ;;  %v4903_v31 = vld [vmem:[%s4462_s24 + $0xe8] ss:$16 sps:$4 sm:$0xff]  }
 0x5e0   :  { %v757_v36 = vpop.f32.mrb[12].mxu0 }
 0x5e1   :  { %v4764_v38 = vadd.f32 %v757_v36, %v628_v35  ;;  %v3678_v39 = vpop.f32.mrb[13].mxu0 }
 0x5e2   :  { %v760_v40 = vpop.f32.mrb[14].mxu0 }
 0x5e3   :  { %v4766_v42 = vadd.f32 %v760_v40, %v632_v37  ;;  %v3679_v44 = vpop.f32.mrb[15].mxu0 }
 0x5e5   :  { %v776_v21 = vpack.c.bf16 %v4766_v42, %v4764_v38 }
 0x5e7   :  { %3687 = vmatpush3.bf16.msra.mxu0 %v776_v21 }
 0x5e8   :  { %v845_v33 = vpop.f32.mrb[16].mxu0  ;;  %1236 = vmatprep.subr.bf16.mxu0 %v4769_v46 }
 0x5e9   :  { %v4780_v51 = vadd.f32 %v845_v33, %v628_v35  ;;  %v3684_v53 = vpop.f32.mrb[17].mxu0 }
 0x5ea   :  { %v848_v54 = vpop.f32.mrb[18].mxu0  ;;  %3689 = vmatmul.mubr.msk.bf16.vlgmr.msra.gmra.mrb[20].mxu0 %vm692_vm7, %v873_v45  ;;  %v4800_v45 = vld [vmem:[%s4462_s24 + $0x8] ss:$16 sps:$4 sm:$0xff]  }
 0x5eb   :  { %v4783_v55 = vadd.f32 %v848_v54, %v632_v37  ;;  %v3685_v56 = vpop.f32.mrb[19].mxu0  ;;  %1237 = vmatpush1.bf16.msra.mxu0 %v4774_v23  ;;  %1268 = vmatprep.mubr.bf16.mxu0 %v5394_v0 }
 0x5ec   :  { %1238 = vmatprep.subr.bf16.mxu0 %v4778_v41 }
 0x5ed   :  { %v864_v60 = vpack.c.bf16 %v4783_v55, %v4780_v51 }
 0x5ef   :  { %3693 = vmatpush3.bf16.msra.mxu1 %v864_v60  ;;  %1239 = vmatpush1.bf16.msra.mxu0 %v4787_v57 }
 0x5f0   :  { %1279 = vmatprep.subr.bf16.mxu1 %v4791_v58  ;;  %1240 = vmatprep.subr.bf16.mxu0 %v4795_v59 }
 0x5f2   :  { %3695 = vmatmul.mubr.msk.bf16.vlgmr.msra.gmra.mrb[8].mxu1 %vm692_vm7, %v4727_v61  ;;  %v4830_v61 = vld [vmem:[%s4462_s24 + $0x64] ss:$16 sps:$4 sm:$0xff]   ;;  %s4396_s24 = smov [#allocation2]  }
 0x5f3   :  { %1280 = vmatpush1.bf16.msra.mxu1 %v4800_v45  ;;  %1241 = vmatpush1.bf16.msra.mxu0 %v4804_v62 }
 0x5f4   :  { %1281 = vmatprep.subr.bf16.mxu1 %v4808_v63  ;;  %1311 = vmatprep.mubr.bf16.mxu1 %v5394_v0 }
 0x5f5   :  { %1242 = vmatprep.subr.bf16.mxu0 %v4830_v61 }
 0x5f7   :  { %1282 = vmatpush1.bf16.msra.mxu1 %v4815_v2  ;;  %1243 = vmatpush1.bf16.msra.mxu0 %v4836_v8 }
 0x5f8   :  { %1283 = vmatprep.subr.bf16.mxu1 %v4820_v3  ;;  %1244 = vmatprep.subr.bf16.mxu0 %v4846_v43 }
 0x5fb   :  { %1284 = vmatpush1.bf16.msra.mxu1 %v4825_v5  ;;  %1245 = vmatpush1.bf16.msra.mxu0 %v4852_v11 }
 0x5fc   :  { %1285 = vmatprep.subr.bf16.mxu1 %v4833_v7  ;;  %1246 = vmatprep.subr.bf16.mxu0 %v4862_v6 }
 0x5ff   :  { %1286 = vmatpush1.bf16.msra.mxu1 %v4839_v9  ;;  %1247 = vmatpush1.bf16.msra.mxu0 %v4868_v16 }
 0x600   :  { %1287 = vmatprep.subr.bf16.mxu1 %v4849_v47  ;;  %1248 = vmatprep.subr.bf16.mxu0 %v4878_v10 }
 0x603   :  { %1288 = vmatpush1.bf16.msra.mxu1 %v4855_v13  ;;  %1249 = vmatpush1.bf16.msra.mxu0 %v4884_v20 }
 0x604   :  { %1289 = vmatprep.subr.bf16.mxu1 %v4865_v4  ;;  %1250 = vmatprep.subr.bf16.mxu0 %v4894_v27 }
 0x607   :  { %1290 = vmatpush1.bf16.msra.mxu1 %v4871_v12  ;;  %1251 = vmatpush1.bf16.msra.mxu0 %v4900_v30 }
 0x608   :  { %1291 = vmatprep.subr.bf16.mxu1 %v4881_v17  ;;  %3698 = vmatprep.subr.bf16.mxu0 %v5397_v1 }
 0x60b   :  { %1292 = vmatpush1.bf16.msra.mxu1 %v4887_v26 }
 0x60c   :  { %1293 = vmatprep.subr.bf16.mxu1 %v4897_v29 }
 0x60f   :  { %1294 = vmatpush1.bf16.msra.mxu1 %v4903_v31 }
 0x610   :  { %3704 = vmatprep.subr.bf16.mxu1 %v5397_v1 }
 0x63b   :  { %v928_v39 = vpop.permute.xlu0 %927 }
 0x63c   :  { %v935_v21 = vmul.f32 %v928_v39, %v4764_v38 }
 0x63f   :  { %v933_v34 = vpop.permute.xlu1 %932 }
 0x640   :  { %v936_v53 = vmul.f32 %v933_v34, %v4766_v42 }
 0x643   :  { %v1002_v35 = vpop.permute.xlu1 %1001 }
 0x644   :  { %v1009_v54 = vmul.f32 %v1002_v35, %v4780_v51  ;;  %v5430_v35 = vmov 0.0  }
 0x647   :  { %v1007_v33 = vpop.permute.xlu1 %1006 }
 0x648   :  { %v1010_v0 = vmul.f32 %v1007_v33, %v4783_v55 }
 0x6bd   :  { %v918_v36 = vpop.f32.mrb[20].mxu0 }
 0x6be   :  { %v3690_v37 = vpop.f32.mrb[21].mxu0  ;;  %v937_v56 = vsub.f32 %v918_v36, %v935_v21 }
 0x6bf   :  { %v921_v40 = vpop.f32.mrb[22].mxu0 }
 0x6c0   :  { %v3691_v44 = vpop.f32.mrb[23].mxu0  ;;  %v938_v19 = vsub.f32 %v921_v40, %v936_v53  ;;  %v1013_v37 = vmul.f32 0.5, %v937_v56 }
 0x6c2   :  { %v1014_v50 = vmul.f32 0.5, %v938_v19 }
 0x6c5   :  { %v992_v60 = vpop.f32.mrb[8].mxu1 }
 0x6c6   :  { %v1011_v1 = vsub.f32 %v992_v60, %v1009_v54  ;;  %v3696_v28 = vpop.f32.mrb[9].mxu1 }
 0x6c7   :  { %v995_v18 = vpop.f32.mrb[10].mxu1  ;;  %v4920_v28 = vld [vmem:[%s4467_s30] sm:$0xf]  ;;  %s3287_s30 = sshll.u32 %s4396_s24, 4  ;;  %s3288_s30 = int_to_ptr.vmem [resolvable:$true] %s3287_s30 }
 0x6c8   :  { %v1015_v15 = vmul.f32 0.5, %v1011_v1  ;;  %v1012_v14 = vsub.f32 %v995_v18, %v1010_v0  ;;  %v3697_v44 = vpop.f32.mrb[11].mxu1  ;;  %v4924_v1 = vrot.slane %v4920_v28, %v4631_v22  ;;  %v4928_v0 = vrot.slane %v4920_v28, %v4637_v24  ;;  %p4345_p1 = scmp.lt.s32.totalorder %s3288_s30, %s3288_s30 }
 0x6c9   :  { %v4932_v19 = vrot.slane %v4920_v28, %v4640_v25 }
 0x6ca   :  { %v1017_v38 = vadd.f32 %v1015_v15, %v1013_v37  ;;  %v1016_v39 = vmul.f32 0.5, %v1012_v14 }
 0x6cc   :  { %v1018_v48 = vadd.f32 %v1016_v39, %v1014_v50  ;;  %v1019_v42 = vmax.f32 %v1017_v38, 0.0 }
 0x6ce   :  { %v1020_v34 = vmax.f32 %v1018_v48, 0.0 }
 0x6d0   :  { %v1021_v51 = vpack.c.bf16 %v1020_v34, %v1019_v42  ;;  %v5431_v34 = vmov 0  }
 0x6d2   :  { %1269 = vmatmul.mubr.bf16.vlgmr.msra.gmra.mrb[24].mxu0 %v1021_v51  ;;  %1312 = vmatmul.mubr.bf16.vlgmr.msra.gmra.mrb[12].mxu1 %v1021_v51 }
 0x6d3   :  { %3700 = vmatprep.mubr.msk.bf16.mxu0 %vm4394_vm0, %v5430_v35  ;;  %3706 = vmatprep.mubr.msk.bf16.mxu1 %vm4394_vm0, %v5430_v35 }
 0x7a5   :  { %v1270_v48 = vpop.f32.mrb[24].mxu0  ;;  %v1313_v50 = vpop.f32.mrb[12].mxu1 }
 0x7a6   :  { %v1271_v14 = vadd.f32 %v1270_v48, %v4924_v1  ;;  %v1272_v15 = vpop.f32.mrb[25].mxu0  ;;  %v4935_v18 = vpop.f32.mrb[13].mxu1  ;;  %v1314_v21 = vadd.f32 %v1313_v50, %v4932_v19 }
 0x7a7   :  { %v1273_v55 = vadd.f32 %v1272_v15, %v4928_v0  ;;  %v1274_v36 = vpop.f32.mrb[26].mxu0  ;;  %v1317_v40 = vpop.f32.mrb[14].mxu1 }
 0x7a8   :  { %v1275_v33 = vadd.f32 %v1274_v36, %v4924_v1  ;;  %v1318_v53 = vadd.f32 %v1317_v40, %v4932_v19  ;;  %v1276_v54 = vpop.f32.mrb[27].mxu0  ;;  %v4941_v56 = vpop.f32.mrb[15].mxu1 }
 0x7a9   :  { %v1277_v60 = vadd.f32 %v1276_v54, %v4928_v0  ;;  %v4944_v37 = vmul.f32 %v1273_v55, %v1271_v14 }
 0x7aa   :  { %v1322_v44 = vpack.c.bf16 %v1275_v33, %v1271_v14  ;;  %v1375_v38 = vpack.c.bf16 %v1318_v53, %v1314_v21 }
 0x7ab   :  { %v1323_v39 = vpack.c.bf16 %v1277_v60, %v1273_v55  ;;  %v4946_v42 = vmul.f32 %v1277_v60, %v1275_v33 }
 0x7ac   :  { %3705 = vmatpush3.bf16.msra.mxu1 %v1375_v38 }
 0x7ad   :  { %3699 = vmatpush3.bf16.xpose.msra.mxu0 %v1323_v39  ;;  %1503 = vmatprep.subr.bf16.mxu1 %v4791_v58 }
 0x7ae   :  { %1460 = vmatprep.subr.bf16.mxu0 %v4769_v46 }
 0x7b4   :  { %3701 = vmatmul.mubr.bf16.vlgmr.msra.gmra.mrb[28].mxu0 %v1322_v44 }
 0x7b5   :  { %1461 = vmatpush1.bf16.msra.mxu0 %v4774_v23  ;;  %1492 = vmatprep.mubr.bf16.mxu0 %v5431_v34 }
 0x7b6   :  { %1462 = vmatprep.subr.bf16.mxu0 %v4778_v41 }
 0x7b9   :  { %1463 = vmatpush1.bf16.msra.mxu0 %v4787_v57 }
 0x7ba   :  { %1464 = vmatprep.subr.bf16.mxu0 %v4795_v59 }
 0x7bd   :  { %1465 = vmatpush1.bf16.msra.mxu0 %v4804_v62 }
 0x7be   :  { %1466 = vmatprep.subr.bf16.mxu0 %v4830_v61 }
 0x7c1   :  { %1467 = vmatpush1.bf16.msra.mxu0 %v4836_v8 }
 0x7c2   :  { %1468 = vmatprep.subr.bf16.mxu0 %v4846_v43 }
 0x7c5   :  { %1469 = vmatpush1.bf16.msra.mxu0 %v4852_v11 }
 0x7c6   :  { %1470 = vmatprep.subr.bf16.mxu0 %v4862_v6 }
 0x7c9   :  { %1471 = vmatpush1.bf16.msra.mxu0 %v4868_v16 }
 0x7ca   :  { %1472 = vmatprep.subr.bf16.mxu0 %v4878_v10 }
 0x7cd   :  { %1473 = vmatpush1.bf16.msra.mxu0 %v4884_v20 }
 0x7ce   :  { %1474 = vmatprep.subr.bf16.mxu0 %v4894_v27 }
 0x7d1   :  { %1475 = vmatpush1.bf16.msra.mxu0 %v4900_v30 }
 0x7d2   :  { %3710 = vmatprep.subr.bf16.mxu0 %v5430_v35 }
 0x887   :  { %v1358_v46 = vpop.f32.mrb[28].mxu0 }
 0x888   :  { %v1365_v23 = vmul.f32 0.17677669, %v1358_v46  ;;  %v3702_v41 = vpop.f32.mrb[29].mxu0 }
 0x889   :  { %v1361_v57 = vpop.f32.mrb[30].mxu0 }
 0x88a   :  { %v1366_v58 = vmul.f32 0.17677669, %v1361_v57  ;;  %v3703_v59 = vpop.f32.mrb[31].mxu0  ;;  %v1376_v62 = vsel %vm688_vm8, %v1365_v23, -1e+30 }
 0x88b   :  { %v1378_v61 = vsel %vm692_vm7, %v1376_v62, -inf }
 0x88c   :  { %1379 = vmax.xlane.f32.xlu1 %v1378_v61  ;;  %v1377_v8 = vsel %vm689_vm10, %v1366_v58, -1e+30 }
 0x88d   :  { %v1381_v43 = vsel %vm692_vm7, %v1377_v8, -inf }
 0x88e   :  { %1382 = vmax.xlane.f32.xlu0 %v1381_v43 }
 0x919   :  { %v4973_v11 = vpop.xlane.xlu1 %1379 }
 0x91a   :  { %v1384_v6 = vsub.f32 %v1376_v62, %v4973_v11 }
 0x91b   :  { %v4976_v16 = vpop.xlane.xlu0 %1382 }
 0x91c   :  { %v1386_v10 = vmul.f32 1.442695, %v1384_v6  ;;  %v1385_v20 = vsub.f32 %v1377_v8, %v4976_v16 }
 0x91e   :  { %4274 = vpow2.f32 %v1386_v10  ;;  %v1388_v27 = vmul.f32 1.442695, %v1385_v20 }
 0x920   :  { %4276 = vpow2.f32 %v1388_v27 }
 0x928   :  { %v4275_v30 = vpop.eup %4274 }
 0x929   :  { %v1390_v51 = vsel %vm688_vm8, %v4275_v30, 0.0 }
 0x92a   :  { %v4277_v48 = vpop.eup %4276  ;;  %v1392_v50 = vsel %vm692_vm7, %v1390_v51, 0.0 }
 0x92b   :  { %1393 = vadd.xlane.f32.xlu1 %v1392_v50  ;;  %v1391_v14 = vsel %vm689_vm10, %v4277_v48, 0.0 }
 0x92c   :  { %v1395_v15 = vsel %vm692_vm7, %v1391_v14, 0.0 }
 0x92f   :  { %1396 = vadd.xlane.f32.xlu1 %v1395_v15 }
 0x9b8   :  { %v1394_v55 = vpop.xlane.xlu1 %1393 }
 0x9b9   :  { %v1398_v36 = vmax.f32 %v1394_v55, 1e-30 }
 0x9bb   :  { %4278 = vrcp.f32 %v1398_v36 }
 0x9bc   :  { %v1397_v40 = vpop.xlane.xlu1 %1396 }
 0x9bd   :  { %v1399_v21 = vmax.f32 %v1397_v40, 1e-30 }
 0x9bf   :  { %4280 = vrcp.f32 %v1399_v21 }
 0x9c5   :  { %v4985_v33 = vpop.eup %4278 }
 0x9c6   :  { %v1402_v54 = vmul.f32 %v4985_v33, %v1390_v51 }
 0x9c9   :  { %v4987_v53 = vpop.eup %4280 }
 0x9ca   :  { %v1403_v60 = vmul.f32 %v4987_v53, %v1391_v14 }
 0x9cc   :  { %v4991_v44 = vpack.c.bf16 %v1403_v60, %v1402_v54 }
 0x9ce   :  { %3707 = vmatmul.mubr.msk.bf16.vlgmr.msra.gmra.mrb[16].mxu1 %vm692_vm7, %v4991_v44 }
 0x9cf   :  { %1504 = vmatpush1.bf16.msra.mxu1 %v4800_v45  ;;  %1535 = vmatprep.mubr.bf16.mxu1 %v5431_v34  ;;  %v5014_v45 = vrot.slane %v4920_v28, %v4758_v32 }
 0x9d0   :  { %1505 = vmatprep.subr.bf16.mxu1 %v4808_v63 }
 0x9d1   :  { %v1316_v63 = vadd.f32 %v4935_v18, %v5014_v45 }
 0x9d3   :  { %1506 = vmatpush1.bf16.msra.mxu1 %v4815_v2 }
 0x9d4   :  { %1507 = vmatprep.subr.bf16.mxu1 %v4820_v3  ;;  %v1320_v3 = vadd.f32 %v4941_v56, %v5014_v45 }
 0x9d7   :  { %1508 = vmatpush1.bf16.msra.mxu1 %v4825_v5 }
 0x9d8   :  { %1509 = vmatprep.subr.bf16.mxu1 %v4833_v7 }
 0x9db   :  { %1510 = vmatpush1.bf16.msra.mxu1 %v4839_v9 }
 0x9dc   :  { %1511 = vmatprep.subr.bf16.mxu1 %v4849_v47 }
 0x9df   :  { %1512 = vmatpush1.bf16.msra.mxu1 %v4855_v13 }
 0x9e0   :  { %1513 = vmatprep.subr.bf16.mxu1 %v4865_v4 }
 0x9e3   :  { %1514 = vmatpush1.bf16.msra.mxu1 %v4871_v12 }
 0x9e4   :  { %1515 = vmatprep.subr.bf16.mxu1 %v4881_v17 }
 0x9e7   :  { %1516 = vmatpush1.bf16.msra.mxu1 %v4887_v26 }
 0x9e8   :  { %1517 = vmatprep.subr.bf16.mxu1 %v4897_v29 }
 0x9eb   :  { %1518 = vmatpush1.bf16.msra.mxu1 %v4903_v31 }
 0x9ec   :  { %3716 = vmatprep.subr.bf16.mxu1 %v5430_v35 }
 0xaa1   :  { %v1442_v2 = vpop.f32.mrb[16].mxu1 }
 0xaa2   :  { %v5020_v5 = vadd.f32 %v1442_v2, %v1316_v63  ;;  %v3708_v7 = vpop.f32.mrb[17].mxu1 }
 0xaa3   :  { %v1445_v9 = vpop.f32.mrb[18].mxu1 }
 0xaa4   :  { %v5022_v47 = vadd.f32 %v1445_v9, %v1320_v3  ;;  %v3709_v13 = vpop.f32.mrb[19].mxu1 }
 0xaa6   :  { %v1459_v4 = vpack.c.bf16 %v5022_v47, %v5020_v5 }
 0xaa8   :  { %1493 = vmatmul.mubr.bf16.vlgmr.msra.gmra.mrb[32].mxu0 %v1459_v4  ;;  %1536 = vmatmul.mubr.bf16.vlgmr.msra.gmra.mrb[20].mxu1 %v1459_v4 }
 0xaa9   :  { %3712 = vmatprep.mubr.msk.bf16.mxu0 %vm4394_vm0, %v5430_v35  ;;  %3718 = vmatprep.mubr.msk.bf16.mxu1 %vm4394_vm0, %v5430_v35 }
 0xb7b   :  { %v1494_v12 = vpop.f32.mrb[32].mxu0  ;;  %v1537_v17 = vpop.f32.mrb[20].mxu1 }
 0xb7c   :  { %v1495_v26 = vadd.f32 %v1494_v12, %v4924_v1  ;;  %v1496_v29 = vpop.f32.mrb[33].mxu0  ;;  %v5031_v31 = vpop.f32.mrb[21].mxu1  ;;  %v1538_v38 = vadd.f32 %v1537_v17, %v4932_v19 }
 0xb7d   :  { %v1497_v28 = vadd.f32 %v1496_v29, %v4928_v0  ;;  %v1498_v18 = vpop.f32.mrb[34].mxu0  ;;  %v1541_v56 = vpop.f32.mrb[22].mxu1 }
 0xb7e   :  { %v1499_v39 = vadd.f32 %v1498_v18, %v4924_v1  ;;  %v1542_v46 = vadd.f32 %v1541_v56, %v4932_v19  ;;  %v1500_v23 = vpop.f32.mrb[35].mxu0  ;;  %v5037_v41 = vpop.f32.mrb[23].mxu1 }
 0xb7f   :  { %v1501_v57 = vadd.f32 %v1500_v23, %v4928_v0  ;;  %v1591_v58 = vmul.f32 %v1497_v28, %v1495_v26 }
 0xb80   :  { %v1546_v59 = vpack.c.bf16 %v1499_v39, %v1495_v26  ;;  %v1599_v62 = vpack.c.bf16 %v1542_v46, %v1538_v38 }
 0xb81   :  { %v1547_v61 = vpack.c.bf16 %v1501_v57, %v1497_v28  ;;  %v1592_v8 = vmul.f32 %v1501_v57, %v1499_v39 }
 0xb82   :  { %3717 = vmatpush3.bf16.msra.mxu1 %v1599_v62 }
 0xb83   :  { %3711 = vmatpush3.bf16.xpose.msra.mxu0 %v1547_v61  ;;  %3728 = vmatprep.subr.bf16.mxu1 %v5430_v35 }
 0xb84   :  { %3722 = vmatprep.subr.bf16.mxu0 %v5430_v35 }
 0xb8a   :  { %3713 = vmatmul.mubr.bf16.vlgmr.msra.gmra.mrb[36].mxu0 %v1546_v59 }
 0xb8b   :  { %3723 = vmatpush3.bf16.msra.mxu0 %v1459_v4  ;;  %3724 = vmatprep.mubr.msk.bf16.mxu0 %vm4394_vm0, %v5430_v35 }
 0xc5d   :  { %v1582_v1 = vpop.f32.mrb[36].mxu0 }
 0xc5e   :  { %v1589_v19 = vmul.f32 0.17677669, %v1582_v1  ;;  %v3714_v43 = vpop.f32.mrb[37].mxu0 }
 0xc5f   :  { %v1585_v0 = vpop.f32.mrb[38].mxu0 }
 0xc60   :  { %v1590_v6 = vmul.f32 0.17677669, %v1585_v0  ;;  %v3715_v10 = vpop.f32.mrb[39].mxu0  ;;  %v1600_v27 = vsel %vm777_vm6, %v1589_v19, -1e+30 }
 0xc61   :  { %v1602_v30 = vsel %vm692_vm7, %v1600_v27, -inf }
 0xc62   :  { %1603 = vmax.xlane.f32.xlu1 %v1602_v30  ;;  %v1601_v48 = vsel %vm778_vm9, %v1590_v6, -1e+30 }
 0xc63   :  { %v1605_v50 = vsel %vm692_vm7, %v1601_v48, -inf }
 0xc66   :  { %1606 = vmax.xlane.f32.xlu1 %v1605_v50 }
 0xcef   :  { %v1604_v14 = vpop.xlane.xlu1 %1603 }
 0xcf0   :  { %v1608_v15 = vsub.f32 %v1600_v27, %v1604_v14 }
 0xcf2   :  { %v1610_v55 = vmul.f32 1.442695, %v1608_v15 }
 0xcf3   :  { %v1607_v36 = vpop.xlane.xlu1 %1606 }
 0xcf4   :  { %4282 = vpow2.f32 %v1610_v55  ;;  %v1609_v40 = vsub.f32 %v1601_v48, %v1607_v36 }
 0xcf6   :  { %v1612_v21 = vmul.f32 1.442695, %v1609_v40 }
 0xcf8   :  { %4284 = vpow2.f32 %v1612_v21 }
 0xcfe   :  { %v4283_v54 = vpop.eup %4282 }
 0xcff   :  { %v1614_v60 = vsel %vm777_vm6, %v4283_v54, 0.0 }
 0xd00   :  { %v1616_v63 = vsel %vm692_vm7, %v1614_v60, 0.0 }
 0xd01   :  { %1617 = vadd.xlane.f32.xlu0 %v1616_v63  ;;  %v4154_v63 = vld [vmem:[%s5435_s0 + $0x24] ss:$16 sps:$4 sm:$0xff]  }
 0xd02   :  { %v4285_v2 = vpop.eup %4284 }
 0xd03   :  { %v1615_v3 = vsel %vm778_vm9, %v4285_v2, 0.0  ;;  %v4152_v2 = vld [vmem:[%s5435_s0 + $0x20] ss:$16 sps:$4 sm:$0xff]  }
 0xd04   :  { %v1619_v7 = vsel %vm692_vm7, %v1615_v3, 0.0 }
 0xd05   :  { %1620 = vadd.xlane.f32.xlu1 %v1619_v7  ;;  %v4158_v7 = vld [vmem:[%s5435_s0 + $0x40] ss:$16 sps:$4 sm:$0xff]  }
 0xd2e   :  { %1684 = vxpose.xlu0.c.b16.start.end [1/1] (short) (narrow) %v4991_v44, 16 }
 0xd3b   :  { %1369 = vadd.xlane.f32.xlu0 %v4944_v37 }
 0xd3f   :  { %1593 = vadd.xlane.f32.xlu0 %v1591_v58 }
 0xd8e   :  { %v1618_v9 = vpop.xlane.xlu0 %1617 }
 0xd8f   :  { %v1622_v13 = vmax.f32 %v1618_v9, 1e-30  ;;  %v4166_v9 = vld [vmem:[%s5435_s0 + $0x64] ss:$16 sps:$4 sm:$0xff]  }
 0xd91   :  { %4286 = vrcp.f32 %v1622_v13  ;;  %v4164_v13 = vld [vmem:[%s5435_s0 + $0x60] ss:$16 sps:$4 sm:$0xff]  }
 0xd92   :  { %v1621_v4 = vpop.xlane.xlu1 %1620 }
 0xd93   :  { %v1623_v12 = vmax.f32 %v1621_v4, 1e-30  ;;  %v4172_v4 = vld [vmem:[%s5435_s0 + $0x84] ss:$16 sps:$4 sm:$0xff]  }
 0xd94   :  { %v1692_v17 = vpop.trf.xlu0 }
 0xd95   :  { %4288 = vrcp.f32 %v1623_v12  ;;  %3725 = vmatmul.mubr.msk.bf16.vlgmr.msra.gmra.mrb[40].mxu0 %vm692_vm7, %v1692_v17  ;;  %v4170_v12 = vld [vmem:[%s5435_s0 + $0x80] ss:$16 sps:$4 sm:$0xff]  }
 0xd96   :  { %2087 = vmatprep.mubr.bf16.mxu0 %v5431_v34 }
 0xd9b   :  { %v4287_v26 = vpop.eup %4286 }
 0xd9c   :  { %v1626_v28 = vmul.f32 %v4287_v26, %v1614_v60  ;;  %v4148_v60 = vld [vmem:[%s5435_s0 + $0x4] ss:$16 sps:$4 sm:$0xff]  }
 0xd9d   :  { %2055 = vmatprep.subr.bf16.mxu0 %v4148_v60 }
 0xd9f   :  { %v4289_v29 = vpop.eup %4288 }
 0xda0   :  { %v1627_v18 = vmul.f32 %v4289_v29, %v1615_v3  ;;  %v4160_v3 = vld [vmem:[%s5435_s0 + $0x44] ss:$16 sps:$4 sm:$0xff]  }
 0xda2   :  { %v1628_v56 = vpack.c.bf16 %v1627_v18, %v1626_v28  ;;  %v1540_v18 = vadd.f32 %v5031_v31, %v5014_v45  ;;  %v4157_v31 = vld [vmem:[%s5435_s0 + $0x2c] ss:$16 sps:$4 sm:$0xff]  }
 0xda4   :  { %1758 = vxpose.xlu1.c.b16.start.end [1/1] (short) (narrow) %v1628_v56, 16  ;;  %3719 = vmatmul.mubr.msk.bf16.vlgmr.msra.gmra.mrb[24].mxu1 %vm692_vm7, %v1628_v56 }
 0xda5   :  { %3730 = vmatprep.mubr.msk.bf16.mxu1 %vm4394_vm0, %v5430_v35 }
 0xdb1   :  { %1371 = vadd.xlane.f32.xlu1 %v4946_v42 }
 0xdb5   :  { %1595 = vadd.xlane.f32.xlu1 %v1592_v8 }
 0xdc8   :  { %v1370_v37 = vpop.xlane.xlu0 %1369 }
 0xdc9   :  { %v1373_v44 = vmul.f32 0.17677669, %v1370_v37  ;;  %v1544_v37 = vadd.f32 %v5037_v41, %v5014_v45  ;;  %v4155_v45 = vld [vmem:[%s5435_s0 + $0x28] ss:$16 sps:$4 sm:$0xff]   ;;  %v4163_v41 = vld [vmem:[%s5435_s0 + $0x4c] ss:$16 sps:$4 sm:$0xff]  }
 0xdcb   :  { %v1449_v38 = vsub.f32 %v1373_v44, %v4973_v11 }
 0xdcc   :  { %v1594_v59 = vpop.xlane.xlu0 %1593 }
 0xdcd   :  { %v1451_v39 = vmul.f32 1.442695, %v1449_v38  ;;  %v1597_v62 = vmul.f32 0.17677669, %v1594_v59 }
 0xdcf   :  { %4290 = vpow2.f32 %v1451_v39  ;;  %v1673_v1 = vsub.f32 %v1597_v62, %v1604_v14  ;;  %v4149_v62 = vld [vmem:[%s5435_s0 + $0x8] ss:$16 sps:$4 sm:$0xff]  }
 0xdd1   :  { %v1675_v19 = vmul.f32 1.442695, %v1673_v1  ;;  %v4161_v1 = vld [vmem:[%s5435_s0 + $0x48] ss:$16 sps:$4 sm:$0xff]  }
 0xdd3   :  { %4292 = vpow2.f32 %v1675_v19  ;;  %v4173_v19 = vld [vmem:[%s5435_s0 + $0x88] ss:$16 sps:$4 sm:$0xff]  }
 0xdd9   :  { %v4291_v46 = vpop.eup %4290 }
 0xdda   :  { %v1455_v23 = vmul.f32 %v4291_v46, %v4985_v33 }
 0xddc   :  { %v1457_v58 = vsel %vm764_vm11, %v1455_v23, 0.0 }
 0xddd   :  { %1746 = vperm.xlu0 %4038, %v1457_v58   ;;  %v4293_v27 = vpop.eup %4292  ;;  %v4151_v58 = vld [vmem:[%s5435_s0 + $0xc] ss:$16 sps:$4 sm:$0xff]  }
 0xe0a   :  { %v5068_v61 = vpop.trf.xlu1 }
 0xe3e   :  { %v1372_v42 = vpop.xlane.xlu1 %1371 }
 0xe3f   :  { %v1374_v8 = vmul.f32 0.17677669, %v1372_v42  ;;  %v4169_v42 = vld [vmem:[%s5435_s0 + $0x6c] ss:$16 sps:$4 sm:$0xff]  }
 0xe41   :  { %v1450_v43 = vsub.f32 %v1374_v8, %v4976_v16  ;;  %v1679_v16 = vmul.f32 %v4293_v27, %v4287_v26  ;;  %v4167_v8 = vld [vmem:[%s5435_s0 + $0x68] ss:$16 sps:$4 sm:$0xff]   ;;  %v4182_v27 = vld [vmem:[%s5435_s0 + $0xc0] ss:$16 sps:$4 sm:$0xff]  }
 0xe42   :  { %v1596_v11 = vpop.xlane.xlu1 %1595 }
 0xe43   :  { %v1453_v0 = vmul.f32 1.442695, %v1450_v43  ;;  %v1598_v6 = vmul.f32 0.17677669, %v1596_v11  ;;  %v4178_v43 = vld [vmem:[%s5435_s0 + $0xa4] ss:$16 sps:$4 sm:$0xff]  }
 0xe44   :  { %v4181_v11 = vld [vmem:[%s5435_s0 + $0xac] ss:$16 sps:$4 sm:$0xff]  }
 0xe45   :  { %4294 = vpow2.f32 %v1453_v0  ;;  %v1674_v33 = vsub.f32 %v1598_v6, %v1607_v36  ;;  %v1681_v36 = vsel %vm852_vm13, %v1679_v16, 0.0  ;;  %v4176_v0 = vld [vmem:[%s5435_s0 + $0xa0] ss:$16 sps:$4 sm:$0xff]   ;;  %v4179_v6 = vld [vmem:[%s5435_s0 + $0xa8] ss:$16 sps:$4 sm:$0xff]  }
 0xe46   :  { %v4188_v16 = vld [vmem:[%s5435_s0 + $0xe0] ss:$16 sps:$4 sm:$0xff]  }
 0xe47   :  { %v1677_v10 = vmul.f32 1.442695, %v1674_v33  ;;  %v4184_v33 = vld [vmem:[%s5435_s0 + $0xc4] ss:$16 sps:$4 sm:$0xff]  }
 0xe49   :  { %4296 = vpow2.f32 %v1677_v10  ;;  %v4187_v10 = vld [vmem:[%s5435_s0 + $0xcc] ss:$16 sps:$4 sm:$0xff]  }
 0xe4f   :  { %v4295_v30 = vpop.eup %4294 }
 0xe50   :  { %v1456_v48 = vmul.f32 %v4295_v30, %v4987_v53  ;;  %v4146_v53 = vld [vmem:[%s5435_s0] ss:$16 sps:$4 sm:$0xff]   ;;  %v4185_v30 = vld [vmem:[%s5435_s0 + $0xc8] ss:$16 sps:$4 sm:$0xff]  }
 0xe51   :  { %2056 = vmatpush1.bf16.msra.mxu0 %v4146_v53 }
 0xe52   :  { %v1458_v14 = vsel %vm765_vm12, %v1456_v48, 0.0  ;;  %2057 = vmatprep.subr.bf16.mxu0 %v4154_v63  ;;  %v4190_v48 = vld [vmem:[%s5435_s0 + $0xe4] ss:$16 sps:$4 sm:$0xff]  }
 0xe53   :  { %v4297_v15 = vpop.eup %4296  ;;  %1751 = vperm.xlu1 %4039, %v1458_v14   ;;  %v4193_v14 = vld [vmem:[%s5435_s0 + $0xec] ss:$16 sps:$4 sm:$0xff]  }
 0xe54   :  { %v1680_v55 = vmul.f32 %v4297_v15, %v4289_v29  ;;  %v4191_v15 = vld [vmem:[%s5435_s0 + $0xe8] ss:$16 sps:$4 sm:$0xff]  }
 0xe55   :  { %2058 = vmatpush1.bf16.msra.mxu0 %v4152_v2 }
 0xe56   :  { %v1682_v54 = vsel %vm853_vm14, %v1680_v55, 0.0  ;;  %2059 = vmatprep.subr.bf16.mxu0 %v4160_v3 }
 0xe57   :  { %1820 = vperm.xlu1 %4039, %v1681_v36   ;;  %1825 = vperm.xlu0 %4038, %v1682_v54  }
 0xe59   :  { %2060 = vmatpush1.bf16.msra.mxu0 %v4158_v7 }
 0xe5a   :  { %2061 = vmatprep.subr.bf16.mxu0 %v4166_v9 }
 0xe5c   :  { %v1747_v36 = vpop.permute.xlu0 %1746 }
 0xe5d   :  { %2062 = vmatpush1.bf16.msra.mxu0 %v4164_v13  ;;  %v1754_v53 = vmul.f32 %v1747_v36, %v5020_v5 }
 0xe5e   :  { %2063 = vmatprep.subr.bf16.mxu0 %v4172_v4 }
 0xe61   :  { %2064 = vmatpush1.bf16.msra.mxu0 %v4170_v12 }
 0xe62   :  { %2065 = vmatprep.subr.bf16.mxu0 %v4178_v43 }
 0xe65   :  { %2066 = vmatpush1.bf16.msra.mxu0 %v4176_v0 }
 0xe66   :  { %2067 = vmatprep.subr.bf16.mxu0 %v4184_v33 }
 0xe68   :  { %v5088_v17 = vpop.f32.mrb[40].mxu0 }
 0xe69   :  { %v3726_v26 = vpop.f32.mrb[41].mxu0  ;;  %2068 = vmatpush1.bf16.msra.mxu0 %v4182_v27  ;;  %v1756_v2 = vsub.f32 %v5088_v17, %v1754_v53 }
 0xe6a   :  { %v5090_v29 = vpop.f32.mrb[42].mxu0  ;;  %2069 = vmatprep.subr.bf16.mxu0 %v4190_v48 }
 0xe6b   :  { %v3727_v28 = vpop.f32.mrb[43].mxu0 }
 0xe6c   :  { %v1832_v28 = vmul.f32 0.5, %v1756_v2 }
 0xe6d   :  { %2070 = vmatpush1.bf16.msra.mxu0 %v4188_v16 }
 0xe6e   :  { %3734 = vmatprep.subr.bf16.mxu0 %v5430_v35 }
 0xe77   :  { %v1666_v56 = vpop.f32.mrb[24].mxu1 }
 0xe78   :  { %v1667_v44 = vadd.f32 %v1666_v56, %v1540_v18  ;;  %v3720_v38 = vpop.f32.mrb[25].mxu1 }
 0xe79   :  { %v1669_v39 = vpop.f32.mrb[26].mxu1 }
 0xe7a   :  { %v1670_v46 = vadd.f32 %v1669_v39, %v1544_v37  ;;  %v3721_v23 = vpop.f32.mrb[27].mxu1 }
 0xe7c   :  { %v1683_v59 = vpack.c.bf16 %v1670_v46, %v1667_v44 }
 0xe7e   :  { %3729 = vmatpush3.bf16.msra.mxu1 %v1683_v59 }
 0xe7f   :  { %2098 = vmatprep.subr.bf16.mxu1 %v4151_v58 }
 0xe81   :  { %3731 = vmatmul.mubr.msk.bf16.vlgmr.msra.gmra.mrb[28].mxu1 %vm692_vm7, %v5068_v61  ;;  %v4175_v61 = vld [vmem:[%s5435_s0 + $0x8c] ss:$16 sps:$4 sm:$0xff]  }
 0xe82   :  { %2099 = vmatpush1.bf16.msra.mxu1 %v4149_v62  ;;  %2130 = vmatprep.mubr.bf16.mxu1 %v5431_v34 }
 0xe83   :  { %2100 = vmatprep.subr.bf16.mxu1 %v4157_v31 }
 0xe86   :  { %2101 = vmatpush1.bf16.msra.mxu1 %v4155_v45 }
 0xe87   :  { %2102 = vmatprep.subr.bf16.mxu1 %v4163_v41 }
 0xe8a   :  { %2103 = vmatpush1.bf16.msra.mxu1 %v4161_v1 }
 0xe8b   :  { %2104 = vmatprep.subr.bf16.mxu1 %v4169_v42 }
 0xe8e   :  { %2105 = vmatpush1.bf16.msra.mxu1 %v4167_v8 }
 0xe8f   :  { %2106 = vmatprep.subr.bf16.mxu1 %v4175_v61 }
 0xe92   :  { %2107 = vmatpush1.bf16.msra.mxu1 %v4173_v19 }
 0xe93   :  { %2108 = vmatprep.subr.bf16.mxu1 %v4181_v11 }
 0xe96   :  { %2109 = vmatpush1.bf16.msra.mxu1 %v4179_v6 }
 0xe97   :  { %2110 = vmatprep.subr.bf16.mxu1 %v4187_v10 }
 0xe9a   :  { %2111 = vmatpush1.bf16.msra.mxu1 %v4185_v30 }
 0xe9b   :  { %2112 = vmatprep.subr.bf16.mxu1 %v4193_v14 }
 0xe9e   :  { %2113 = vmatpush1.bf16.msra.mxu1 %v4191_v15 }
 0xe9f   :  { %3740 = vmatprep.subr.bf16.mxu1 %v5430_v35 }
 0xed2   :  { %v1752_v55 = vpop.permute.xlu1 %1751 }
 0xed3   :  { %v1755_v60 = vmul.f32 %v1752_v55, %v5022_v47 }
 0xed5   :  { %v1757_v9 = vsub.f32 %v5090_v29, %v1755_v60  ;;  %v5132_v29 = vld [vmem:[%s5439_s5] sm:$0xf] }
 0xed6   :  { %v1821_v54 = vpop.permute.xlu1 %1820  ;;  %v1826_v63 = vpop.permute.xlu0 %1825  ;;  %v1886_v59 = vrot.slane %v5132_v29, %v4640_v25 }
 0xed7   :  { %v1828_v3 = vmul.f32 %v1821_v54, %v1667_v44  ;;  %v1829_v13 = vmul.f32 %v1826_v63, %v1670_v46  ;;  %v1833_v38 = vmul.f32 0.5, %v1757_v9  ;;  %v1878_v44 = vrot.slane %v5132_v29, %v4631_v22 }
 0xed8   :  { %v1882_v46 = vrot.slane %v5132_v29, %v4637_v24 }
 0xf54   :  { %v1811_v7 = vpop.f32.mrb[28].mxu1 }
 0xf55   :  { %v1830_v4 = vsub.f32 %v1811_v7, %v1828_v3  ;;  %v3732_v12 = vpop.f32.mrb[29].mxu1 }
 0xf56   :  { %v1814_v26 = vpop.f32.mrb[30].mxu1 }
 0xf57   :  { %v1834_v18 = vmul.f32 0.5, %v1830_v4  ;;  %v1831_v56 = vsub.f32 %v1814_v26, %v1829_v13  ;;  %v3733_v37 = vpop.f32.mrb[31].mxu1 }
 0xf59   :  { %v1836_v5 = vadd.f32 %v1834_v18, %v1832_v28  ;;  %v1835_v39 = vmul.f32 0.5, %v1831_v56 }
 0xf5b   :  { %v1837_v47 = vadd.f32 %v1835_v39, %v1833_v38  ;;  %v1838_v23 = vmax.f32 %v1836_v5, 0.0 }
 0xf5d   :  { %v1839_v58 = vmax.f32 %v1837_v47, 0.0 }
 0xf5f   :  { %v1840_v17 = vpack.c.bf16 %v1839_v58, %v1838_v23 }
 0xf61   :  { %2088 = vmatmul.mubr.bf16.vlgmr.msra.gmra.mrb[44].mxu0 %v1840_v17  ;;  %2131 = vmatmul.mubr.bf16.vlgmr.msra.gmra.mrb[32].mxu1 %v1840_v17 }
 0xf62   :  { %3736 = vmatprep.mubr.msk.bf16.mxu0 %vm4394_vm0, %v5430_v35  ;;  %3742 = vmatprep.mubr.msk.bf16.mxu1 %vm4394_vm0, %v5430_v35 }
0x1034   :  { %v2089_v62 = vpop.f32.mrb[44].mxu0  ;;  %v2132_v31 = vpop.f32.mrb[32].mxu1 }
0x1035   :  { %v2090_v45 = vadd.f32 %v2089_v62, %v1878_v44  ;;  %v2091_v41 = vpop.f32.mrb[45].mxu0  ;;  %v5140_v1 = vpop.f32.mrb[33].mxu1  ;;  %v2133_v19 = vadd.f32 %v2132_v31, %v1886_v59 }
0x1036   :  { %v2092_v42 = vadd.f32 %v2091_v41, %v1882_v46  ;;  %v2093_v8 = vpop.f32.mrb[46].mxu0  ;;  %v2136_v61 = vpop.f32.mrb[34].mxu1 }
0x1037   :  { %v2094_v43 = vadd.f32 %v2093_v8, %v1878_v44  ;;  %v2137_v11 = vadd.f32 %v2136_v61, %v1886_v59  ;;  %v2095_v0 = vpop.f32.mrb[47].mxu0  ;;  %v5142_v6 = vpop.f32.mrb[35].mxu1 }
0x1038   :  { %v2096_v33 = vadd.f32 %v2095_v0, %v1882_v46  ;;  %v5144_v10 = vmul.f32 %v2092_v42, %v2090_v45 }
0x1039   :  { %v2142_v27 = vpack.c.bf16 %v2094_v43, %v2090_v45  ;;  %v2141_v25 = vpack.c.bf16 %v2137_v11, %v2133_v19 }
0x103a   :  { %v2143_v30 = vpack.c.bf16 %v2096_v33, %v2092_v42  ;;  %v5146_v48 = vmul.f32 %v2096_v33, %v2094_v43 }
0x103b   :  { %3741 = vmatpush3.bf16.msra.mxu1 %v2141_v25 }
0x103c   :  { %3735 = vmatpush3.bf16.xpose.msra.mxu0 %v2143_v30  ;;  %3752 = vmatprep.subr.bf16.mxu1 %v5430_v35 }
0x103d   :  { %3746 = vmatprep.subr.bf16.mxu0 %v5430_v35 }
0x1043   :  { %3737 = vmatmul.mubr.bf16.vlgmr.msra.gmra.mrb[48].mxu0 %v2142_v27 }
0x1044   :  { %3747 = vmatpush3.bf16.msra.mxu0 %v2141_v25  ;;  %3748 = vmatprep.mubr.msk.bf16.mxu0 %vm4394_vm0, %v5430_v35 }
0x1045   :  { %3758 = vmatprep.subr.bf16.mxu0 %v5430_v35 }
0x1116   :  { %v2178_v14 = vpop.f32.mrb[48].mxu0 }
0x1117   :  { %v2185_v16 = vmul.f32 0.20412415, %v2178_v14  ;;  %v3738_v15 = vpop.f32.mrb[49].mxu0 }
0x1118   :  { %v2181_v55 = vpop.f32.mrb[50].mxu0 }
0x1119   :  { %v2186_v36 = vmul.f32 0.20412415, %v2181_v55  ;;  %v3739_v54 = vpop.f32.mrb[51].mxu0  ;;  %v2195_v53 = vsel %vm688_vm8, %v2185_v16, -1e+30 }
0x111a   :  { %v2197_v60 = vsel %vm692_vm7, %v2195_v53, -inf  ;;  %v2279_v7 = vsel %vm777_vm6, %v2185_v16, -1e+30 }
0x111b   :  { %2198 = vmax.xlane.f32.xlu1 %v2197_v60  ;;  %v2196_v63 = vsel %vm689_vm10, %v2186_v36, -1e+30  ;;  %v2280_v2 = vsel %vm778_vm9, %v2186_v36, -1e+30  ;;  %v2281_v13 = vsel %vm692_vm7, %v2279_v7, -inf }
0x111c   :  { %v2200_v3 = vsel %vm692_vm7, %v2196_v63, -inf  ;;  %v2284_v9 = vsel %vm692_vm7, %v2280_v2, -inf }
0x111d   :  { %2201 = vmax.xlane.f32.xlu0 %v2200_v3 }
0x111f   :  { %2285 = vmax.xlane.f32.xlu1 %v2284_v9 }
0x1121   :  { %2282 = vmax.xlane.f32.xlu0 %v2281_v13 }
0x11a8   :  { %v5165_v4 = vpop.xlane.xlu1 %2198 }
0x11a9   :  { %v2203_v12 = vsub.f32 %v2195_v53, %v5165_v4 }
0x11aa   :  { %v5168_v26 = vpop.xlane.xlu0 %2201 }
0x11ab   :  { %v2205_v28 = vmul.f32 1.442695, %v2203_v12  ;;  %v2204_v18 = vsub.f32 %v2196_v63, %v5168_v26 }
0x11ac   :  { %v5171_v56 = vpop.xlane.xlu1 %2285 }
0x11ad   :  { %4298 = vpow2.f32 %v2205_v28  ;;  %v2207_v37 = vmul.f32 1.442695, %v2204_v18  ;;  %v2288_v38 = vsub.f32 %v2280_v2, %v5171_v56 }
0x11ae   :  { %v5174_v5 = vpop.xlane.xlu0 %2282 }
0x11af   :  { %4300 = vpow2.f32 %v2207_v37  ;;  %v2291_v39 = vmul.f32 1.442695, %v2288_v38  ;;  %v2287_v47 = vsub.f32 %v2279_v7, %v5174_v5 }
0x11b1   :  { %4302 = vpow2.f32 %v2291_v39  ;;  %v2289_v23 = vmul.f32 1.442695, %v2287_v47 }
0x11b3   :  { %4304 = vpow2.f32 %v2289_v23 }
0x11b7   :  { %v4299_v58 = vpop.eup %4298 }
0x11b8   :  { %v2209_v17 = vsel %vm688_vm8, %v4299_v58, 0.0 }
0x11b9   :  { %v4301_v44 = vpop.eup %4300  ;;  %v2211_v46 = vsel %vm692_vm7, %v2209_v17, 0.0 }
0x11ba   :  { %2212 = vadd.xlane.f32.xlu0 %v2211_v46  ;;  %v2210_v59 = vsel %vm689_vm10, %v4301_v44, 0.0  ;;  %v1890_v44 = vrot.slane %v5132_v29, %v4758_v32 }
0x11bb   :  { %v4303_v62 = vpop.eup %4302  ;;  %v2214_v31 = vsel %vm692_vm7, %v2210_v59, 0.0 }
0x11bc   :  { %2215 = vadd.xlane.f32.xlu1 %v2214_v31  ;;  %v2294_v45 = vsel %vm778_vm9, %v4303_v62, 0.0  ;;  %v2135_v46 = vadd.f32 %v5140_v1, %v1890_v44  ;;  %v2139_v21 = vadd.f32 %v5142_v6, %v1890_v44  ;;  %v5227_v6 = vld [vmem:[%s4527_s27] sm:$0xff] }
0x11bd   :  { %v4305_v41 = vpop.eup %4304  ;;  %v2298_v49 = vsel %vm692_vm7, %v2294_v45, 0.0  ;;  %v4220_v44 = vld [vmem:[%s5442_s17 + $0x4] ss:$8 sps:$4 sm:$0xff]  }
0x11be   :  { %v2293_v42 = vsel %vm777_vm6, %v4305_v41, 0.0 }
0x11bf   :  { %v2295_v8 = vsel %vm692_vm7, %v2293_v42, 0.0 }
0x11c0   :  { %2299 = vadd.xlane.f32.xlu1 %v2298_v49  ;;  %2296 = vadd.xlane.f32.xlu0 %v2295_v8 }
0x1247   :  { %v2213_v61 = vpop.xlane.xlu0 %2212 }
0x1248   :  { %v2217_v52 = vmax.f32 %v2213_v61, 1e-30  ;;  %v3226_v61 = vmul.f32 %v5227_v6, %v5227_v6 }
0x1249   :  { %v2216_v19 = vpop.xlane.xlu1 %2215 }
0x124a   :  { %4306 = vrcp.f32 %v2217_v52  ;;  %v2218_v43 = vmax.f32 %v2216_v19, 1e-30 }
0x124c   :  { %4308 = vrcp.f32 %v2218_v43 }
0x124d   :  { %v2300_v11 = vpop.xlane.xlu1 %2299  ;;  %v2297_v0 = vpop.xlane.xlu0 %2296 }
0x124e   :  { %v2302_v51 = vmax.f32 %v2300_v11, 1e-30  ;;  %v2301_v33 = vmax.f32 %v2297_v0, 1e-30  ;;  %v2520_v11 = vld [vmem:[%s5440_s9] sm:$0xff]  ;;  %v2521_v0 = vld [vmem:[%s5440_s9 + $0x8] sm:$0xff] }
0x1250   :  { %4310 = vrcp.f32 %v2302_v51  ;;  %v4194_v51 = vld [vmem:[%s5441_s13] ss:$8 sps:$4 sm:$0xff]  }
0x1251   :  { %4312 = vrcp.f32 %v2301_v33  ;;  %v3869_v33 = vpack.c.bf16 %v2521_v0, %v2520_v11 }
0x1254   :  { %v4307_v20 = vpop.eup %4306 }
0x1255   :  { %v2221_v25 = vmul.f32 %v4307_v20, %v2209_v17 }
0x1256   :  { %v4309_v27 = vpop.eup %4308 }
0x1257   :  { %v2222_v30 = vmul.f32 %v4309_v27, %v2210_v59  ;;  %v5213_v59 = vld [vmem:[%s4527_s27 + $0x8] sm:$0xff] }
0x1258   :  { %v3227_v50 = vmul.f32 %v5213_v59, %v5213_v59 }
0x1259   :  { %v2223_v14 = vpack.c.bf16 %v2222_v30, %v2221_v25  ;;  %v2523_v25 = vld [vmem:[%s5440_s9 + $0x18] sm:$0xff] }
0x125a   :  { %v4311_v16 = vpop.eup %4310 }
0x125b   :  { %v4313_v15 = vpop.eup %4312  ;;  %2363 = vxpose.xlu0.c.b16.start.end [1/1] (short) (narrow) %v2223_v14, 16  ;;  %3743 = vmatmul.mubr.msk.bf16.vlgmr.msra.gmra.mrb[36].mxu1 %vm692_vm7, %v2223_v14  ;;  %v2306_v55 = vmul.f32 %v4311_v16, %v2294_v45  ;;  %v4199_v14 = vld [vmem:[%s5441_s13 + $0x14] ss:$8 sps:$4 sm:$0xff]  }
0x125c   :  { %v2305_v36 = vmul.f32 %v4313_v15, %v2293_v42  ;;  %3754 = vmatprep.mubr.msk.bf16.mxu1 %vm4394_vm0, %v5430_v35 }
0x125e   :  { %v2307_v54 = vpack.c.bf16 %v2306_v55, %v2305_v36  ;;  %v4197_v55 = vld [vmem:[%s5441_s13 + $0x10] ss:$8 sps:$4 sm:$0xff]  }
0x1260   :  { %2437 = vxpose.xlu1.c.b16.start.end [1/1] (short) (narrow) %v2307_v54, 16  ;;  %3749 = vmatmul.mubr.msk.bf16.vlgmr.msra.gmra.mrb[52].mxu0 %vm692_vm7, %v2307_v54  ;;  %v4202_v54 = vld [vmem:[%s5441_s13 + $0x24] ss:$8 sps:$4 sm:$0xff]  }
0x1261   :  { %3760 = vmatprep.mubr.msk.bf16.mxu0 %vm4394_vm0, %v5430_v35 }
0x1268   :  { %2189 = vadd.xlane.f32.xlu0 %v5144_v10 }
0x126d   :  { %2191 = vadd.xlane.f32.xlu1 %v5146_v48 }
0x12c1   :  { %v2371_v53 = vpop.trf.xlu0 }
0x12c6   :  { %v2445_v60 = vpop.trf.xlu1 }
0x12f5   :  { %v2190_v63 = vpop.xlane.xlu0 %2189 }
0x12f6   :  { %v2193_v2 = vmul.f32 0.20412415, %v2190_v63  ;;  %v4200_v63 = vld [vmem:[%s5441_s13 + $0x20] ss:$8 sps:$4 sm:$0xff]  }
0x12f8   :  { %v2268_v3 = vsub.f32 %v2193_v2, %v5165_v4  ;;  %v2352_v7 = vsub.f32 %v2193_v2, %v5174_v5 }
0x12fa   :  { %v2270_v9 = vmul.f32 1.442695, %v2268_v3  ;;  %v2192_v13 = vpop.xlane.xlu1 %2191  ;;  %v2354_v28 = vmul.f32 1.442695, %v2352_v7  ;;  %v4205_v3 = vld [vmem:[%s5441_s13 + $0x34] ss:$8 sps:$4 sm:$0xff]  }
0x12fb   :  { %v2194_v12 = vmul.f32 0.20412415, %v2192_v13  ;;  %v2528_v7 = vld [vmem:[%s5440_s9 + $0x40] sm:$0xff]  ;;  %v4203_v13 = vld [vmem:[%s5441_s13 + $0x30] ss:$8 sps:$4 sm:$0xff]  }
0x12fc   :  { %4314 = vpow2.f32 %v2270_v9  ;;  %v2529_v9 = vld [vmem:[%s5440_s9 + $0x48] sm:$0xff] }
0x12fd   :  { %v2269_v18 = vsub.f32 %v2194_v12, %v5168_v26  ;;  %v2353_v35 = vsub.f32 %v2194_v12, %v5171_v56  ;;  %4316 = vpow2.f32 %v2354_v28  ;;  %v3885_v12 = vpack.c.bf16 %v2529_v9, %v2528_v7  ;;  %v4208_v28 = vld [vmem:[%s5441_s13 + $0x44] ss:$8 sps:$4 sm:$0xff]   ;;  %v4230_v7 = vld [vmem:[%s5442_s17 + $0x40] ss:$8 sps:$4 sm:$0xff]   ;;  %v4233_v9 = vld [vmem:[%s5442_s17 + $0x50] ss:$8 sps:$4 sm:$0xff]  }
0x12ff   :  { %v2272_v10 = vmul.f32 1.442695, %v2269_v18  ;;  %v2356_v37 = vmul.f32 1.442695, %v2353_v35  ;;  %v4206_v18 = vld [vmem:[%s5441_s13 + $0x40] ss:$8 sps:$4 sm:$0xff]  }
0x1300   :  { %v2530_v35 = vld [vmem:[%s5440_s9 + $0x50] sm:$0xff] }
0x1301   :  { %4318 = vpow2.f32 %v2272_v10  ;;  %v2531_v10 = vld [vmem:[%s5440_s9 + $0x58] sm:$0xff] }
0x1302   :  { %4320 = vpow2.f32 %v2356_v37  ;;  %v3889_v37 = vpack.c.bf16 %v2531_v10, %v2530_v35  ;;  %v3061_v35 = vld [vmem:[%s5444_s25 + $0x8] sm:$0xff]  ;;  %v4239_v10 = vld [vmem:[%s5442_s17 + $0x70] ss:$8 sps:$4 sm:$0xff]  }
0x1306   :  { %v4315_v48 = vpop.eup %4314 }
0x1307   :  { %v2274_v38 = vmul.f32 %v4315_v48, %v4307_v20  ;;  %v4317_v5 = vpop.eup %4316  ;;  %v4196_v20 = vld [vmem:[%s5441_s13 + $0x4] ss:$8 sps:$4 sm:$0xff]   ;;  %v4211_v48 = vld [vmem:[%s5441_s13 + $0x54] ss:$8 sps:$4 sm:$0xff]  }
0x1308   :  { %v2358_v56 = vmul.f32 %v4317_v5, %v4313_v15  ;;  %v2525_v15 = vld [vmem:[%s5440_s9 + $0x28] sm:$0xff] }
0x1309   :  { %v2276_v4 = vsel %vm764_vm11, %v2274_v38, 0.0  ;;  %v4209_v38 = vld [vmem:[%s5441_s13 + $0x50] ss:$8 sps:$4 sm:$0xff]   ;;  %v2533_v5 = vld [vmem:[%s5440_s9 + $0x68] sm:$0xff] }
0x130a   :  { %2425 = vperm.xlu0 %4038, %v2276_v4   ;;  %v2360_v57 = vsel %vm852_vm13, %v2358_v56, 0.0  ;;  %v2532_v4 = vld [vmem:[%s5440_s9 + $0x60] sm:$0xff] }
0x130b   :  { %v4319_v39 = vpop.eup %4318 }
0x130c   :  { %v4321_v47 = vpop.eup %4320  ;;  %v2275_v23 = vmul.f32 %v4319_v39, %v4309_v27  ;;  %v2522_v27 = vld [vmem:[%s5440_s9 + $0x10] sm:$0xff]  ;;  %v3893_v39 = vpack.c.bf16 %v2533_v5, %v2532_v4  ;;  %v3063_v4 = vld [vmem:[%s5444_s25 + $0x18] sm:$0xff] }
0x130d   :  { %v2359_v58 = vmul.f32 %v4321_v47, %v4311_v16  ;;  %v3873_v30 = vpack.c.bf16 %v2523_v25, %v2522_v27  ;;  %v2524_v16 = vld [vmem:[%s5440_s9 + $0x20] sm:$0xff] }
0x130e   :  { %v2277_v26 = vsel %vm765_vm12, %v2275_v23, 0.0  ;;  %v3877_v36 = vpack.c.bf16 %v2525_v15, %v2524_v16  ;;  %v4214_v47 = vld [vmem:[%s5441_s13 + $0x64] ss:$8 sps:$4 sm:$0xff]   ;;  %v4212_v23 = vld [vmem:[%s5441_s13 + $0x60] ss:$8 sps:$4 sm:$0xff]  }
0x130f   :  { %2430 = vperm.xlu1 %4039, %v2277_v26   ;;  %v2361_v17 = vsel %vm853_vm14, %v2359_v58, 0.0  ;;  %v2534_v58 = vld [vmem:[%s5440_s9 + $0x70] sm:$0xff]  ;;  %v2535_v26 = vld [vmem:[%s5440_s9 + $0x78] sm:$0xff]  ;;  %v4218_v16 = vld [vmem:[%s5442_s17] ss:$8 sps:$4 sm:$0xff]  }
0x1310   :  { %2504 = vperm.xlu0 %4038, %v2361_v17   ;;  %v3897_v56 = vpack.c.bf16 %v2535_v26, %v2534_v58  ;;  %v4217_v17 = vld [vmem:[%s5441_s13 + $0x74] ss:$8 sps:$4 sm:$0xff]  }
0x1311   :  { %v3066_v58 = vld [vmem:[%s5444_s25 + $0x30] sm:$0xff]  ;;  %v3067_v26 = vld [vmem:[%s5444_s25 + $0x38] sm:$0xff] }
0x1313   :  { %2499 = vperm.xlu1 %4039, %v2360_v57   ;;  %v4215_v57 = vld [vmem:[%s5441_s13 + $0x70] ss:$8 sps:$4 sm:$0xff]  }
0x132e   :  { %v2261_v62 = vpop.f32.mrb[36].mxu1 }
0x132f   :  { %3230 = vadd.xlane.f32.xlu0 %v3227_v50  ;;  %v5218_v31 = vadd.f32 %v2261_v62, %v2135_v46  ;;  %v3744_v40 = vpop.f32.mrb[37].mxu1 }
0x1330   :  { %v2264_v45 = vpop.f32.mrb[38].mxu1 }
0x1331   :  { %v5220_v41 = vadd.f32 %v2264_v45, %v2139_v21  ;;  %v3745_v42 = vpop.f32.mrb[39].mxu1 }
0x1333   :  { %v2278_v32 = vpack.c.bf16 %v5220_v41, %v5218_v31  ;;  %v2345_v29 = vpop.f32.mrb[52].mxu0 }
0x1334   :  { %v5224_v1 = vadd.f32 %v2345_v29, %v2135_v46  ;;  %v3750_v49 = vpop.f32.mrb[53].mxu0 }
0x1335   :  { %v2348_v8 = vpop.f32.mrb[54].mxu0  ;;  %3753 = vmatpush3.bf16.msra.mxu1 %v2278_v32 }
0x1336   :  { %v5231_v52 = vadd.f32 %v2348_v8, %v2139_v21  ;;  %v3751_v19 = vpop.f32.mrb[55].mxu0  ;;  %3870 = vmatprep.subr.bf16.mxu1 %v3869_v33 }
0x1337   :  { %3228 = vadd.xlane.f32.xlu1 %v3226_v61 }
0x1338   :  { %v2362_v43 = vpack.c.bf16 %v5231_v52, %v5224_v1  ;;  %3755 = vmatmul.mubr.msk.bf16.vlgmr.msra.gmra.mrb[40].mxu1 %vm692_vm7, %v2371_v53  ;;  %v2526_v53 = vld [vmem:[%s5440_s9 + $0x30] sm:$0xff] }
0x1339   :  { %3872 = vmatpush3.bf16.msra.mxu1 %v3869_v33 }
0x133a   :  { %3759 = vmatpush3.bf16.msra.mxu0 %v2362_v43  ;;  %3874 = vmatprep.subr.bf16.mxu1 %v3873_v30 }
0x133b   :  { %2725 = vmatprep.subr.bf16.mxu0 %v4196_v20 }
0x133d   :  { %3761 = vmatmul.mubr.msk.bf16.vlgmr.msra.gmra.mrb[56].mxu0 %vm692_vm7, %v2445_v60  ;;  %v2527_v60 = vld [vmem:[%s5440_s9 + $0x38] sm:$0xff]  ;;  %3876 = vmatpush3.bf16.msra.mxu1 %v3873_v30 }
0x133e   :  { %2757 = vmatprep.mubr.bf16.mxu0 %v5431_v34  ;;  %2726 = vmatpush1.bf16.msra.mxu0 %v4194_v51  ;;  %v3881_v2 = vpack.c.bf16 %v2527_v60, %v2526_v53  ;;  %v4226_v53 = vld [vmem:[%s5442_s17 + $0x24] ss:$8 sps:$4 sm:$0xff]   ;;  %v4224_v60 = vld [vmem:[%s5442_s17 + $0x20] ss:$8 sps:$4 sm:$0xff]  }
0x133f   :  { %2727 = vmatprep.subr.bf16.mxu0 %v4199_v14  ;;  %3878 = vmatprep.subr.bf16.mxu1 %v3877_v36 }
0x1341   :  { %3880 = vmatpush3.bf16.msra.mxu1 %v3877_v36  ;;  %v4223_v36 = vld [vmem:[%s5442_s17 + $0x14] ss:$8 sps:$4 sm:$0xff]  }
0x1342   :  { %2728 = vmatpush1.bf16.msra.mxu0 %v4197_v55  ;;  %3882 = vmatprep.subr.bf16.mxu1 %v3881_v2 }
0x1343   :  { %2729 = vmatprep.subr.bf16.mxu0 %v4202_v54  ;;  %v4221_v54 = vld [vmem:[%s5442_s17 + $0x10] ss:$8 sps:$4 sm:$0xff]  }
0x1345   :  { %3884 = vmatpush3.bf16.msra.mxu1 %v3881_v2  ;;  %v4227_v2 = vld [vmem:[%s5442_s17 + $0x30] ss:$8 sps:$4 sm:$0xff]  }
0x1346   :  { %2730 = vmatpush1.bf16.msra.mxu0 %v4200_v63  ;;  %3886 = vmatprep.subr.bf16.mxu1 %v3885_v12  ;;  %v4229_v63 = vld [vmem:[%s5442_s17 + $0x34] ss:$8 sps:$4 sm:$0xff]  }
0x1347   :  { %2731 = vmatprep.subr.bf16.mxu0 %v4205_v3  ;;  %v4232_v3 = vld [vmem:[%s5442_s17 + $0x44] ss:$8 sps:$4 sm:$0xff]  }
0x1349   :  { %3888 = vmatpush3.bf16.msra.mxu1 %v3885_v12  ;;  %v4236_v12 = vld [vmem:[%s5442_s17 + $0x60] ss:$8 sps:$4 sm:$0xff]  }
0x134a   :  { %2732 = vmatpush1.bf16.msra.mxu0 %v4203_v13  ;;  %3890 = vmatprep.subr.bf16.mxu1 %v3889_v37  ;;  %v4238_v13 = vld [vmem:[%s5442_s17 + $0x64] ss:$8 sps:$4 sm:$0xff]  }
0x134b   :  { %2733 = vmatprep.subr.bf16.mxu0 %v4208_v28  ;;  %v4241_v28 = vld [vmem:[%s5442_s17 + $0x74] ss:$8 sps:$4 sm:$0xff]  }
0x134d   :  { %3892 = vmatpush3.bf16.msra.mxu1 %v3889_v37 }
0x134e   :  { %2734 = vmatpush1.bf16.msra.mxu0 %v4206_v18  ;;  %3894 = vmatprep.subr.bf16.mxu1 %v3893_v39  ;;  %v3060_v18 = vld [vmem:[%s5444_s25] sm:$0xff] }
0x134f   :  { %2735 = vmatprep.subr.bf16.mxu0 %v4211_v48  ;;  %v3933_v37 = vpack.c.bf16 %v3061_v35, %v3060_v18  ;;  %v5445_v48 = vld [vmem:[#allocation17_spill] sm:$0xff] }
0x1350   :  { %v2945_v18 = vld [vmem:[%s5446_s29 + $0x50] sm:$0xff] }
0x1351   :  { %3896 = vmatpush3.bf16.msra.mxu1 %v3893_v39  ;;  %v3064_v39 = vld [vmem:[%s5444_s25 + $0x20] sm:$0xff] }
0x1352   :  { %2736 = vmatpush1.bf16.msra.mxu0 %v4209_v38  ;;  %3898 = vmatprep.subr.bf16.mxu1 %v3897_v56  ;;  %v3062_v38 = vld [vmem:[%s5444_s25 + $0x10] sm:$0xff] }
0x1353   :  { %2737 = vmatprep.subr.bf16.mxu0 %v4214_v47  ;;  %v3937_v5 = vpack.c.bf16 %v3063_v4, %v3062_v38  ;;  %v3065_v47 = vld [vmem:[%s5444_s25 + $0x28] sm:$0xff]  ;;  %v2947_v38 = vld [vmem:[%s5446_s29 + $0x60] sm:$0xff] }
0x1354   :  { %v2948_v4 = vld [vmem:[%s5446_s29 + $0x68] sm:$0xff] }
0x1355   :  { %3900 = vmatpush3.bf16.msra.mxu1 %v3897_v56  ;;  %v3945_v56 = vpack.c.bf16 %v3067_v26, %v3066_v58  ;;  %v2950_v26 = vld [vmem:[%s5446_s29 + $0x78] sm:$0xff] }
0x1356   :  { %2738 = vmatpush1.bf16.msra.mxu0 %v4212_v23  ;;  %v3941_v23 = vpack.c.bf16 %v3065_v47, %v3064_v39  ;;  %v2965_v39 = vld [vmem:[%s5446_s29 + $0xf0] sm:$0xff]  ;;  %v2966_v47 = vld [vmem:[%s5446_s29 + $0xf8] sm:$0xff] }
0x1357   :  { %2739 = vmatprep.subr.bf16.mxu0 %v4217_v17  ;;  %v3068_v17 = vld [vmem:[%s5444_s25 + $0x40] sm:$0xff]  ;;  %v3929_v58 = vpack.c.bf16 %v2966_v47, %v2965_v39 }
0x135a   :  { %2740 = vmatpush1.bf16.msra.mxu0 %v4215_v57  ;;  %v3069_v57 = vld [vmem:[%s5444_s25 + $0x48] sm:$0xff] }
0x135b   :  { %2848 = vmatprep.subr.bf16.mxu0 %v4220_v44  ;;  %v3949_v44 = vpack.c.bf16 %v3069_v57, %v3068_v17  ;;  %v3044_v17 = vld [vmem:[%s5447_s3] sm:$0xff]  ;;  %v3045_v57 = vld [vmem:[%s5447_s3 + $0x8] sm:$0xff] }
0x1389   :  { %v2426_v50 = vpop.permute.xlu0 %2425 }
0x138a   :  { %v2433_v45 = vmul.f32 %v2426_v50, %v5218_v31  ;;  %v3071_v50 = vld [vmem:[%s5444_s25 + $0x58] sm:$0xff] }
0x138e   :  { %v2431_v46 = vpop.permute.xlu1 %2430 }
0x138f   :  { %v2505_v32 = vpop.permute.xlu0 %2504  ;;  %v2434_v49 = vmul.f32 %v2431_v46, %v5220_v41  ;;  %v3070_v46 = vld [vmem:[%s5444_s25 + $0x50] sm:$0xff] }
0x1390   :  { %v2508_v43 = vmul.f32 %v2505_v32, %v5231_v52  ;;  %v3075_v32 = vld [vmem:[%s5444_s25 + $0x78] sm:$0xff] }
0x1392   :  { %v2500_v21 = vpop.permute.xlu1 %2499 }
0x1393   :  { %v2507_v8 = vmul.f32 %v2500_v21, %v5224_v1  ;;  %v3072_v21 = vld [vmem:[%s5444_s25 + $0x60] sm:$0xff] }
0x140b   :  { %v2416_v62 = vpop.f32.mrb[40].mxu1 }
0x140c   :  { %v3756_v40 = vpop.f32.mrb[41].mxu1  ;;  %v2435_v61 = vsub.f32 %v2416_v62, %v2433_v45  ;;  %v3953_v62 = vpack.c.bf16 %v3071_v50, %v3070_v46 }
0x140d   :  { %v2419_v42 = vpop.f32.mrb[42].mxu1  ;;  %v3073_v40 = vld [vmem:[%s5444_s25 + $0x68] sm:$0xff] }
0x140e   :  { %v3757_v29 = vpop.f32.mrb[43].mxu1  ;;  %v2436_v11 = vsub.f32 %v2419_v42, %v2434_v49  ;;  %v2511_v20 = vmul.f32 0.5, %v2435_v61  ;;  %v3957_v45 = vpack.c.bf16 %v3073_v40, %v3072_v21  ;;  %v3074_v42 = vld [vmem:[%s5444_s25 + $0x70] sm:$0xff]  ;;  %v2951_v49 = vld [vmem:[%s5446_s29 + $0x80] sm:$0xff] }
0x140f   :  { %v3961_v29 = vpack.c.bf16 %v3075_v32, %v3074_v42  ;;  %v2935_v61 = vld [vmem:[%s5446_s29] sm:$0xff] }
0x1410   :  { %v2490_v19 = vpop.f32.mrb[56].mxu0  ;;  %v2512_v30 = vmul.f32 0.5, %v2436_v11  ;;  %v2953_v11 = vld [vmem:[%s5446_s29 + $0x90] sm:$0xff] }
0x1411   :  { %v2509_v0 = vsub.f32 %v2490_v19, %v2507_v8  ;;  %v3762_v51 = vpop.f32.mrb[57].mxu0  ;;  %v2952_v8 = vld [vmem:[%s5446_s29 + $0x88] sm:$0xff] }
0x1412   :  { %v2493_v33 = vpop.f32.mrb[58].mxu0  ;;  %v3901_v19 = vpack.c.bf16 %v2952_v8, %v2951_v49 }
0x1413   :  { %v2513_v31 = vmul.f32 0.5, %v2509_v0  ;;  %v2510_v27 = vsub.f32 %v2493_v33, %v2508_v43  ;;  %v3763_v25 = vpop.f32.mrb[59].mxu0  ;;  %v2936_v43 = vld [vmem:[%s5446_s29 + $0x8] sm:$0xff]  ;;  %v2954_v0 = vld [vmem:[%s5446_s29 + $0x98] sm:$0xff] }
0x1414   :  { %v3903_v51 = vpack.c.bf16 %v2936_v43, %v2935_v61  ;;  %v3905_v33 = vpack.c.bf16 %v2954_v0, %v2953_v11  ;;  %3902 = vmatprep.subr.bf16.mxu1 %v3901_v19  ;;  %v2956_v25 = vld [vmem:[%s5446_s29 + $0xa8] sm:$0xff] }
0x1415   :  { %v2515_v41 = vadd.f32 %v2513_v31, %v2511_v20  ;;  %v2514_v14 = vmul.f32 0.5, %v2510_v27  ;;  %v2937_v20 = vld [vmem:[%s5446_s29 + $0x10] sm:$0xff]  ;;  %v2938_v31 = vld [vmem:[%s5446_s29 + $0x18] sm:$0xff]  ;;  %v2955_v27 = vld [vmem:[%s5446_s29 + $0xa0] sm:$0xff] }
0x1417   :  { %2518 = vst [vmem:[%s5443_s21] sm:$0xff] %v2515_v41  ;;  %v5276_v1 = vadd.f32 %v2514_v14, %v2512_v30  ;;  %3796 = vmatprep.mubr.f32.mxu1 %v2515_v41  ;;  %v3232_v52 = vmul.f32 %v2515_v41, %v2515_v41  ;;  %v3907_v30 = vpack.c.bf16 %v2938_v31, %v2937_v20  ;;  %v2939_v14 = vld [vmem:[%s5446_s29 + $0x20] sm:$0xff] }
0x1419   :  { %2519 = vst [vmem:[%s5443_s21 + $0x8] sm:$0xff] %v5276_v1  ;;  %3234 = vadd.xlane.f32.xlu0 %v3232_v52  ;;  %3797 = vmatmul.mubr.f32.vlgmr.msra.gmra.mrb[44].mxu1 %v5276_v1  ;;  %v3233_v15 = vmul.f32 %v5276_v1, %v5276_v1  ;;  %v2517_v55 = vpack.c.bf16 %v5276_v1, %v2515_v41  ;;  %v2940_v52 = vld [vmem:[%s5446_s29 + $0x28] sm:$0xff] }
0x141a   :  { %3904 = vmatpush3.bf16.msra.mxu1 %v3903_v51 }
0x141b   :  { %3236 = vadd.xlane.f32.xlu1 %v3233_v15  ;;  %2758 = vmatmul.mubr.bf16.vlgmr.msra.gmra.mrb[60].mxu0 %v2517_v55  ;;  %v2958_v15 = vld [vmem:[%s5446_s29 + $0xb8] sm:$0xff]  ;;  %v3911_v55 = vpack.c.bf16 %v2940_v52, %v2939_v14 }
0x141c   :  { %2849 = vmatpush1.bf16.msra.mxu0 %v4218_v16  ;;  %2880 = vmatprep.mubr.bf16.mxu0 %v5431_v34  ;;  %v4235_v34 = vld [vmem:[%s5442_s17 + $0x54] ss:$8 sps:$4 sm:$0xff]  }
0x141d   :  { %2850 = vmatprep.subr.bf16.mxu0 %v4223_v36  ;;  %3906 = vmatprep.subr.bf16.mxu1 %v3905_v33  ;;  %v2957_v16 = vld [vmem:[%s5446_s29 + $0xb0] sm:$0xff] }
0x141e   :  { %3908 = vmatpush3.bf16.msra.mxu1 %v3907_v30  ;;  %v3913_v36 = vpack.c.bf16 %v2958_v15, %v2957_v16  ;;  %v3046_v30 = vld [vmem:[%s5447_s3 + $0x10] sm:$0xff] }
0x1420   :  { %2851 = vmatpush1.bf16.msra.mxu0 %v4221_v54  ;;  %v2941_v54 = vld [vmem:[%s5446_s29 + $0x30] sm:$0xff] }
0x1421   :  { %2852 = vmatprep.subr.bf16.mxu0 %v4226_v53  ;;  %v2942_v53 = vld [vmem:[%s5446_s29 + $0x38] sm:$0xff] }
0x1424   :  { %2853 = vmatpush1.bf16.msra.mxu0 %v4224_v60  ;;  %v3915_v60 = vpack.c.bf16 %v2942_v53, %v2941_v54 }
0x1425   :  { %2854 = vmatprep.subr.bf16.mxu0 %v4229_v63  ;;  %v2959_v63 = vld [vmem:[%s5446_s29 + $0xc0] sm:$0xff] }
0x1428   :  { %2855 = vmatpush1.bf16.msra.mxu0 %v4227_v2  ;;  %v2960_v2 = vld [vmem:[%s5446_s29 + $0xc8] sm:$0xff] }
0x1429   :  { %2856 = vmatprep.subr.bf16.mxu0 %v4232_v3  ;;  %v3917_v3 = vpack.c.bf16 %v2960_v2, %v2959_v63  ;;  %v3048_v2 = vld [vmem:[%s5447_s3 + $0x20] sm:$0xff] }
0x142c   :  { %2857 = vmatpush1.bf16.msra.mxu0 %v4230_v7  ;;  %v2943_v7 = vld [vmem:[%s5446_s29 + $0x40] sm:$0xff] }
0x142d   :  { %2858 = vmatprep.subr.bf16.mxu0 %v4235_v34  ;;  %v2944_v34 = vld [vmem:[%s5446_s29 + $0x48] sm:$0xff] }
0x1430   :  { %2859 = vmatpush1.bf16.msra.mxu0 %v4233_v9  ;;  %v3919_v9 = vpack.c.bf16 %v2944_v34, %v2943_v7  ;;  %v3050_v34 = vld [vmem:[%s5447_s3 + $0x30] sm:$0xff] }
0x1431   :  { %2860 = vmatprep.subr.bf16.mxu0 %v4238_v13  ;;  %v2961_v13 = vld [vmem:[%s5446_s29 + $0xd0] sm:$0xff] }
0x1434   :  { %2861 = vmatpush1.bf16.msra.mxu0 %v4236_v12  ;;  %v2962_v12 = vld [vmem:[%s5446_s29 + $0xd8] sm:$0xff] }
0x1435   :  { %2862 = vmatprep.subr.bf16.mxu0 %v4241_v28  ;;  %v3921_v28 = vpack.c.bf16 %v2962_v12, %v2961_v13  ;;  %v3052_v12 = vld [vmem:[%s5447_s3 + $0x40] sm:$0xff] }
0x1438   :  { %2863 = vmatpush1.bf16.msra.mxu0 %v4239_v10  ;;  %v2963_v10 = vld [vmem:[%s5446_s29 + $0xe0] sm:$0xff] }
0x1439   :  { %3934 = vmatprep.subr.bf16.mxu0 %v3933_v37 }
0x143b   :  { %2881 = vmatmul.mubr.bf16.vlgmr.msra.gmra.mrb[60].mxu0 %v5445_v48 }
0x143c   :  { %3831 = vmatprep.mubr.f32.mxu0 %v2515_v41  ;;  %v3909_v41 = vpack.c.bf16 %v2956_v25, %v2955_v27 }
0x143e   :  { %3910 = vmatprep.subr.bf16.mxu1 %v3909_v41  ;;  %v3047_v41 = vld [vmem:[%s5447_s3 + $0x18] sm:$0xff] }
0x143f   :  { %3912 = vmatpush3.bf16.msra.mxu1 %v3911_v55  ;;  %v3969_v53 = vpack.c.bf16 %v3047_v41, %v3046_v30 }
0x1440   :  { %3914 = vmatprep.subr.bf16.mxu1 %v3913_v36 }
0x1441   :  { %3936 = vmatpush3.bf16.xpose.msra.mxu0 %v3933_v37  ;;  %v2964_v37 = vld [vmem:[%s5446_s29 + $0xe8] sm:$0xff] }
0x1442   :  { %3938 = vmatprep.subr.bf16.mxu0 %v3937_v5  ;;  %v3925_v48 = vpack.c.bf16 %v2964_v37, %v2963_v10  ;;  %v3056_v10 = vld [vmem:[%s5447_s3 + $0x60] sm:$0xff]  ;;  %v3057_v37 = vld [vmem:[%s5447_s3 + $0x68] sm:$0xff] }
0x1443   :  { %3916 = vmatpush3.bf16.msra.mxu1 %v3915_v60 }
0x1444   :  { %3918 = vmatprep.subr.bf16.mxu1 %v3917_v3  ;;  %v3049_v3 = vld [vmem:[%s5447_s3 + $0x28] sm:$0xff] }
0x1445   :  { %v3973_v7 = vpack.c.bf16 %v3049_v3, %v3048_v2 }
0x1447   :  { %3920 = vmatpush3.bf16.msra.mxu1 %v3919_v9  ;;  %v3051_v9 = vld [vmem:[%s5447_s3 + $0x38] sm:$0xff] }
0x1448   :  { %3922 = vmatprep.subr.bf16.mxu1 %v3921_v28  ;;  %v3977_v13 = vpack.c.bf16 %v3051_v9, %v3050_v34  ;;  %v3053_v28 = vld [vmem:[%s5447_s3 + $0x48] sm:$0xff] }
0x1449   :  { %3940 = vmatpush3.bf16.xpose.msra.mxu0 %v3937_v5  ;;  %v3927_v5 = vpack.c.bf16 %v2948_v4, %v2947_v38  ;;  %v3058_v38 = vld [vmem:[%s5447_s3 + $0x70] sm:$0xff]  ;;  %v3059_v4 = vld [vmem:[%s5447_s3 + $0x78] sm:$0xff] }
0x144a   :  { %3942 = vmatprep.subr.bf16.mxu0 %v3941_v23  ;;  %v3993_v39 = vpack.c.bf16 %v3059_v4, %v3058_v38 }
0x1451   :  { %3944 = vmatpush3.bf16.xpose.msra.mxu0 %v3941_v23  ;;  %v2949_v23 = vld [vmem:[%s5446_s29 + $0x70] sm:$0xff] }
0x1452   :  { %3946 = vmatprep.subr.bf16.mxu0 %v3945_v56 }
0x1459   :  { %3948 = vmatpush3.bf16.xpose.msra.mxu0 %v3945_v56  ;;  %v3931_v56 = vpack.c.bf16 %v2950_v26, %v2949_v23 }
0x145a   :  { %3950 = vmatprep.subr.bf16.mxu0 %v3949_v44 }
0x1461   :  { %3952 = vmatpush3.bf16.xpose.msra.mxu0 %v3949_v44  ;;  %v3965_v44 = vpack.c.bf16 %v3045_v57, %v3044_v17 }
0x1462   :  { %3954 = vmatprep.subr.bf16.mxu0 %v3953_v62 }
0x1469   :  { %3956 = vmatpush3.bf16.xpose.msra.mxu0 %v3953_v62  ;;  %v2891_v62 = vld [vmem:[%s5448_s8] sm:$0x3] }
0x146a   :  { %3958 = vmatprep.subr.bf16.mxu0 %v3957_v45  ;;  %v2896_v21 = vrot.slane %v2891_v62, %v4631_v22  ;;  %v2900_v40 = vrot.slane %v2891_v62, %v4637_v24 }
0x1471   :  { %3960 = vmatpush3.bf16.xpose.msra.mxu0 %v3957_v45 }
0x1472   :  { %3962 = vmatprep.subr.bf16.mxu0 %v3961_v29 }
0x1479   :  { %3964 = vmatpush3.bf16.xpose.msra.mxu0 %v3961_v29 }
0x1480   :  { %3832 = vmatmul.mubr.f32.vlgmr.msra.gmra.mrb[64].mxu0 %v5276_v1  ;;  %v2946_v1 = vld [vmem:[%s5446_s29 + $0x58] sm:$0xff] }
0x1481   :  { %v3923_v35 = vpack.c.bf16 %v2946_v1, %v2945_v18  ;;  %v3981_v18 = vpack.c.bf16 %v3053_v28, %v3052_v12  ;;  %v3054_v1 = vld [vmem:[%s5447_s3 + $0x50] sm:$0xff] }
0x1483   :  { %3924 = vmatpush3.bf16.msra.mxu1 %v3923_v35  ;;  %v3055_v35 = vld [vmem:[%s5447_s3 + $0x58] sm:$0xff] }
0x1484   :  { %3926 = vmatprep.subr.bf16.mxu1 %v3925_v48  ;;  %v3989_v48 = vpack.c.bf16 %v3057_v37, %v3056_v10 }
0x1487   :  { %3928 = vmatpush3.bf16.msra.mxu1 %v3927_v5 }
0x1488   :  { %3930 = vmatprep.subr.bf16.mxu1 %v3929_v58 }
0x148b   :  { %3932 = vmatpush3.bf16.msra.mxu1 %v3931_v56 }
0x148c   :  { %3966 = vmatprep.subr.bf16.mxu1 %v3965_v44 }
0x14ec   :  { %v3798_v46 = vpop.f32.mrb[44].mxu1 }
0x14ed   :  { %2612 = vst [vmem:[%s4537_s12 + $0x8] sm:$0xff] %v3798_v46  ;;  %v2602_v50 = vpop.f32.mrb[45].mxu1  ;;  %v3231_v46 = vpop.xlane.xlu0 %3230 }
0x14ee   :  { %2611 = vst [vmem:[%s4537_s12] sm:$0xff] %v2602_v50  ;;  %s4340_s12 = scalar_lea.vmem %s3288_s30, 256 }
0x14ef   :  { %p4341_p0 = scmp.ne.s32.totalorder %s3288_s30, %s4340_s12  ;;  %p4346_p2 = scmp.lt.s32.totalorder %s4340_s12, %s4340_s12 }
0x14f1   :  { %v3235_v62 = vpop.xlane.xlu0 %3234  ;;  %p4347_p3 = por %p4346_p2, %p4345_p1 }
0x14f3   :  { %p4348_p4 = pnand %p4347_p3, %p4341_p0 }
0x150e   :  { %v2882_v45 = vpop.f32.mrb[60].mxu0 }
0x150f   :  { %v2903_v42 = vadd.f32 %v2896_v21, %v2882_v45  ;;  %v2884_v32 = vpop.f32.mrb[61].mxu0 }
0x1510   :  { %v2904_v29 = vadd.f32 %v2900_v40, %v2884_v32  ;;  %v2886_v49 = vpop.f32.mrb[62].mxu0 }
0x1511   :  { %v2911_v8 = vmin.f32 %v2903_v42, 0.0  ;;  %v2905_v61 = vadd.f32 %v2896_v21, %v2886_v49  ;;  %v2888_v19 = vpop.f32.mrb[63].mxu0  ;;  %vm2907_vm15 = vcmp.gt.f32.partialorder %v2903_v42, 0.0 }
0x1512   :  { %v2912_v43 = vmin.f32 %v2904_v29, 0.0  ;;  %v2906_v11 = vadd.f32 %v2900_v40, %v2888_v19  ;;  %vm2908_vm0 = vcmp.gt.f32.partialorder %v2904_v29, 0.0 }
0x1513   :  { %v2915_v0 = vmul.f32 1.442695, %v2911_v8  ;;  %v2913_v51 = vmin.f32 %v2905_v61, 0.0  ;;  %vm2909_vm1 = vcmp.gt.f32.partialorder %v2905_v61, 0.0 }
0x1514   :  { %v2917_v33 = vmul.f32 1.442695, %v2912_v43  ;;  %v2914_v20 = vmin.f32 %v2906_v11, 0.0  ;;  %vm2910_vm2 = vcmp.gt.f32.partialorder %v2906_v11, 0.0 }
0x1515   :  { %4322 = vpow2.f32 %v2915_v0  ;;  %v2919_v22 = vmul.f32 1.442695, %v2913_v51 }
0x1516   :  { %4324 = vpow2.f32 %v2917_v33  ;;  %v2921_v24 = vmul.f32 1.442695, %v2914_v20  ;;  %v3503_v33 = vld [vmem:[%s5450_s19] ss:$0 sm:$0xff] }
0x1517   :  { %4326 = vpow2.f32 %v2919_v22 }
0x1518   :  { %4328 = vpow2.f32 %v2921_v24 }
0x151f   :  { %v4323_v31 = vpop.eup %4322 }
0x1520   :  { %v4325_v27 = vpop.eup %4324  ;;  %v3498_v25 = vadd.f32 -1.0, %v4323_v31 }
0x1521   :  { %v4327_v14 = vpop.eup %4326  ;;  %v3499_v52 = vadd.f32 -1.0, %v4325_v27 }
0x1522   :  { %v4329_v16 = vpop.eup %4328  ;;  %v2927_v15 = vsel %vm2907_vm15, %v2903_v42, %v3498_v25  ;;  %v3500_v55 = vadd.f32 -1.0, %v4327_v14  ;;  %v3502_v42 = vld [vmem:[%s5449_s14] ss:$0 sm:$0xff] }
0x1523   :  { %v2928_v36 = vsel %vm2908_vm0, %v2904_v29, %v3499_v52  ;;  %2931 = vst [vmem:[%s4552_s4] sm:$0xff] %v2927_v15  ;;  %v3501_v54 = vadd.f32 -1.0, %v4329_v16 }
0x1524   :  { %2932 = vst [vmem:[%s4552_s4 + $0x8] sm:$0xff] %v2928_v36  ;;  %3031 = vmatprep.mubr.f32.mxu1 %v2928_v36  ;;  %v2929_v60 = vsel %vm2909_vm1, %v2905_v61, %v3500_v55 }
0x1525   :  { %3032 = vmatmul.mubr.f32.vlgmr.msra.gmra.mrb[46].mxu1 %v2927_v15  ;;  %v2930_v63 = vsel %vm2910_vm2, %v2906_v11, %v3501_v54  ;;  %2933 = vst [vmem:[%s4552_s4 + $0x10] sm:$0xff] %v2929_v60 }
0x1526   :  { %3968 = vmatpush3.bf16.xpose.msra.mxu1 %v3965_v44  ;;  %2934 = vst [vmem:[%s4552_s4 + $0x18] sm:$0xff] %v2930_v63  ;;  %3036 = vmatprep.mubr.f32.mxu1 %v2930_v63  ;;  %v3229_v44 = vpop.xlane.xlu1 %3228 }
0x1527   :  { %3970 = vmatprep.subr.bf16.mxu1 %v3969_v53  ;;  %v3238_v40 = vadd.f32 %v3235_v62, %v3229_v44 }
0x1529   :  { %3037 = vmatmul.mubr.f32.gmra.mrb[48].mxu1 %v2929_v60  ;;  %v3247_v61 = vadd.f32 %v3502_v42, %v3238_v40 }
0x152a   :  { %3866 = vmatprep.mubr.f32.mxu1 %v5227_v6  ;;  %v3985_v6 = vpack.c.bf16 %v3055_v35, %v3054_v1  ;;  %v3237_v50 = vpop.xlane.xlu1 %3236 }
0x152b   :  { %v3239_v21 = vadd.f32 %v3237_v50, %v3231_v46 }
0x152d   :  { %v3248_v49 = vadd.f32 %v3502_v42, %v3239_v21 }
0x152e   :  { %3972 = vmatpush3.bf16.xpose.msra.mxu1 %v3969_v53 }
0x152f   :  { %3974 = vmatprep.subr.bf16.mxu1 %v3973_v7 }
0x1536   :  { %3976 = vmatpush3.bf16.xpose.msra.mxu1 %v3973_v7 }
0x1537   :  { %3978 = vmatprep.subr.bf16.mxu1 %v3977_v13 }
0x153e   :  { %3980 = vmatpush3.bf16.xpose.msra.mxu1 %v3977_v13 }
0x153f   :  { %3982 = vmatprep.subr.bf16.mxu1 %v3981_v18 }
0x1546   :  { %3984 = vmatpush3.bf16.xpose.msra.mxu1 %v3981_v18 }
0x1547   :  { %3986 = vmatprep.subr.bf16.mxu1 %v3985_v6 }
0x154e   :  { %3988 = vmatpush3.bf16.xpose.msra.mxu1 %v3985_v6 }
0x154f   :  { %3990 = vmatprep.subr.bf16.mxu1 %v3989_v48 }
0x1553   :  { %v3833_v5 = vpop.f32.mrb[64].mxu0 }
0x1554   :  { %v3142_v47 = vpop.f32.mrb[65].mxu0 }
0x1556   :  { %3992 = vmatpush3.bf16.xpose.msra.mxu1 %v3989_v48 }
0x1557   :  { %3994 = vmatprep.subr.bf16.mxu1 %v3993_v39 }
0x155e   :  { %3996 = vmatpush3.bf16.xpose.msra.mxu1 %v3993_v39 }
0x1565   :  { %3867 = vmatmul.mubr.f32.vlgmr.msra.gmra.mrb[50].mxu1 %v5213_v59 }
0x15f8   :  { %v3598_v23 = vpop.f32.mrb[46].mxu1 }
0x15f9   :  { %v3599_v58 = vpop.f32.mrb[47].mxu1 }
0x15fa   :  { %v3600_v26 = vadd.f32 %v3599_v58, %v3598_v23 }
0x15fc   :  { %3042 = vst [vmem:[#allocation2] sm:$0xff] %v3600_v26  ;;  %v3601_v56 = vpop.f32.mrb[48].mxu1 }
0x15fd   :  { %v3602_v17 = vpop.f32.mrb[49].mxu1 }
0x15fe   :  { %v3603_v57 = vadd.f32 %v3602_v17, %v3601_v56 }
0x1600   :  { %3043 = vst [vmem:[#allocation2 + $0x8] sm:$0xff] %v3603_v57 }
0x1638   :  { %v3868_v45 = vpop.f32.mrb[50].mxu1 }
0x1639   :  { %v3223_v32 = vadd.f32 %v3868_v45, %v3833_v5  ;;  %v3217_v59 = vpop.f32.mrb[51].mxu1 }
0x163a   :  { %v3218_v29 = vadd.f32 %v3217_v59, %v3142_v47 }
0x163b   :  { %v3250_v8 = vmul.f32 2.0, %v3223_v32 }
0x163c   :  { %v3249_v19 = vmul.f32 2.0, %v3218_v29 }
0x163d   :  { %v3252_v43 = vsub.f32 %v3248_v49, %v3250_v8 }
0x163e   :  { %v3251_v11 = vsub.f32 %v3247_v61, %v3249_v19 }
0x163f   :  { %v3255_v0 = vadd.f32 1.0, %v3252_v43 }
0x1640   :  { %v3254_v51 = vadd.f32 1.0, %v3251_v11 }
0x1641   :  { %4330 = vrcp.f32 %v3255_v0 }
0x1642   :  { %4332 = vrcp.f32 %v3254_v51 }
0x164b   :  { %v4331_v20 = vpop.eup %4330 }
0x164c   :  { %v4333_v22 = vpop.eup %4332  ;;  %v3265_v24 = vmul.f32 %v4331_v20, %v3503_v33 }
0x164d   :  { %v3263_v31 = vmul.f32 %v4333_v22, %v3503_v33 }
0x164e   :  { %3268 = vadd.xlane.f32.xlu1 %v3265_v24 }
0x164f   :  { %3266 = vadd.xlane.f32.xlu0 %v3263_v31 }
0x1650   :  { %4351 = shalt.err (!%p4348_p4)
}
0x1651   :  { %s4352_s27 = scalar_lea.hbm %s4542_s20, 256 }
0x1652   :  { %p4353_p5 = scmp.ne.s32.totalorder %s4542_s20, %s4352_s27  ;;  %p4356_p6 = scmp.lt.u32.totalorder %s4352_s27, %s4542_s20 }
0x1654   :  { %p4358_p7 = pnand %p4356_p6, %p4353_p5 }
0x1656   :  { %4361 = shalt.err (!%p4358_p7)
}
0x1657   :  { %s4397_s4 = smov 128   ;;  %s4398_s7 = smov 8  }
0x1658   :  { %3293 = dma.vmem_to_hbm [thread:$0]  %s3288_s30, 256, %s4542_s20, [#allocation3], %s4397_s4, %s4397_s4, %s4398_s7  }
0x16db   :  { %v3269_v27 = vpop.xlane.xlu1 %3268 }
0x16dc   :  { %4334 = vrcp.f32 %v3269_v27  ;;  %v3267_v25 = vpop.xlane.xlu0 %3266 }
0x16dd   :  { %4336 = vrcp.f32 %v3267_v25 }
0x16e6   :  { %v4335_v30 = vpop.eup %4334 }
0x16e7   :  { %v4337_v41 = vpop.eup %4336  ;;  %v3273_v14 = vmul.f32 %v4335_v30, %v3265_v24 }
0x16e8   :  { %v3271_v52 = vmul.f32 %v4337_v41, %v3263_v31 }
0x16e9   :  { %3275 = vst [vmem:[%s4547_s6 + $0x8] sm:$0xff] %v3273_v14 }
0x16ea   :  { %3274 = vst [vmem:[%s4547_s6] sm:$0xff] %v3271_v52 }
0x16eb   :  { %4362 = dma.done.wait [#allocation3], 256  }
0x16ec   :  { %4363 = vsyncadd [#allocation3], 4294967040 }
0x16ed   :  { %3311 = vsyncpa [#allocation3], 1 }

</bundles_post_ra>
